<compile_context>
chip_gen: v7x
topology: tpu7x:2x2x1
jax: 0.10.0
libtpu: 0.0.40
codegen_flags: <defaults>
</compile_context>

<pallas_src>
import functools

import jax
import jax.numpy as jnp
from jax.experimental import pallas as pl
from jax.experimental.pallas import tpu as pltpu

H_IN = 28             # input image side
K1 = 8                # conv1 kernel size
H_OUT = 21            # conv1 output side (28 - 8 + 1); also conv2 kernel size
C1 = 10               # conv1 out channels
C2 = 10               # conv2 out channels (= classes)
ROW_K = K1 * H_IN     # 224: reduction length for one conv1 output row (kh, p)
ROW_N = H_OUT * C1    # 210: real outputs per conv1 row, ordered (col j, channel c)
ROW_NP = 256          # lane-padded row width (multiple of 128; fills the MXU N tile)
HID_P = H_OUT * ROW_NP  # 5376: padded hidden width for the fused conv2 matmul


# ---------------- fused Pallas kernel ----------------

def fused_forward_kernel(x_ref, w1_ref, b1_ref, w2_ref, b2_ref, o_ref, h_ref):
    """Whole Conv2dTanh_4 forward for one batch tile, entirely in VMEM.

    x_ref : (TB, 784)  bf16   flattened 28x28 inputs
    w1_ref: (224, 256) bf16   conv1 width-Toeplitz weight, lane-padded 210->256
    b1_ref: (1, 256)   f32    conv1 bias tiled over 21 output columns (padding = 0)
    w2_ref: (5376, 10) bf16   conv2 weights [(row i, col j, c1) padded, c2]
    b2_ref: (1, 10)    f32    conv2 bias
    o_ref : (TB, 10)   f32    log-softmax outputs
    h_ref : (TB, 5376) bf16   VMEM scratch holding all tanh'd conv1 rows
    """
    w1 = w1_ref[...]                      # (224, 256) bf16, VMEM resident
    b1 = b1_ref[...]                      # (1, 256) f32

    # Unrolled loop over the 21 conv1 output rows.  Each iteration's result is
    # immediately stored to the h scratch (bf16), which kills its live range.
    for i in range(H_OUT):
        # The 8 input rows feeding output row i are contiguous in the flat image:
        # x[:, i*28 : i*28 + 224]  ==  x_img[:, i:i+8, :] flattened.
        xwin = x_ref[:, pl.ds(i * H_IN, ROW_K)]                   # (TB, 224) bf16
        # conv1 row i (+ bias + tanh in f32).  Padding columns are exactly
        # tanh(0 + 0) = 0, so the aligned 256-wide store needs no masking/init.
        h = jnp.tanh(
            jnp.dot(xwin, w1, preferred_element_type=jnp.float32) + b1)
        h_ref[:, pl.ds(i * ROW_NP, ROW_NP)] = h.astype(jnp.bfloat16)

    # conv2 as ONE fused matmul over all 21 rows (padded weight rows are zero).
    logits = jnp.dot(h_ref[...], w2_ref[...],
                     preferred_element_type=jnp.float32) + b2_ref[...]  # (TB, 10)

    # log-softmax over the 10 classes.
    m = jnp.max(logits, axis=-1, keepdims=True)
    s = logits - m
    o_ref[...] = s - jnp.log(jnp.sum(jnp.exp(s), axis=-1, keepdims=True))


# ---------------- trace-side weight preparation (tiny, one-time) ----------------

def _prep_weights(W1, b1, W2, b2):
    # conv1 -> stacked width-Toeplitz: W1t[kh*28 + p, j*10 + c] = W1[c,0,kh,p-j]
    # (zero where p-j is outside [0, 8)).
    kw = jnp.arange(H_IN)[:, None] - jnp.arange(H_OUT)[None, :]      # (28, 21) = p - j
    valid = (kw >= 0) & (kw < K1)
    gath = W1[:, 0][:, :, jnp.clip(kw, 0, K1 - 1)]                   # (10, 8, 28, 21)
    gath = jnp.where(valid[None, None], gath, 0.0)
    W1t = gath.transpose(1, 2, 3, 0).reshape(ROW_K, ROW_N)           # (224, 210)
    b1t = jnp.tile(b1, H_OUT).reshape(1, ROW_N)                      # (1, 210)

    # Lane-pad 210 -> 256 output columns (zero weight + zero bias => tanh -> 0).
    W1p = jnp.pad(W1t, ((0, 0), (0, ROW_NP - ROW_N)))                # (224, 256)
    b1p = jnp.pad(b1t, ((0, 0), (0, ROW_NP - ROW_N)))                # (1, 256)

    # conv2: W2t[i, j*10 + c1, c2] = W2[c2, c1, i, j]; pad each row block to 256
    # and flatten so conv2 becomes a single (TB,5376)x(5376,10) matmul.
    W2t = W2.transpose(2, 3, 1, 0).reshape(H_OUT, ROW_N, C2)         # (21, 210, 10)
    W2p = jnp.pad(W2t, ((0, 0), (0, ROW_NP - ROW_N), (0, 0)))        # (21, 256, 10)
    W2p = W2p.reshape(HID_P, C2)                                     # (5376, 10)
    b2r = b2.reshape(1, C2)

    # bf16 MXU operands, f32 biases (added to the f32 accumulator).
    return (W1p.astype(jnp.bfloat16), b1p.astype(jnp.float32),
            W2p.astype(jnp.bfloat16), b2r.astype(jnp.float32))


def _round_up(v, m):
    return -(-v // m) * m


# ---------------- wrapper ----------------

@functools.partial(jax.jit, static_argnames=("block_b",))
def conv2dtanh_4_forward(x, W1, b1, W2, b2, *, block_b=256):
    """x: (B, 784); W1: (10,1,8,8); b1: (10,); W2: (10,10,21,21); b2: (10,)."""
    B = x.shape[0]
    x = x.reshape(B, H_IN * H_IN).astype(jnp.bfloat16)
    W1p, b1p, W2p, b2r = _prep_weights(W1, b1, W2, b2)

    # Batch tiling: TB must be a multiple of 16 (bf16 (16,128) tile).  For small
    # batches force >= 2 grid blocks so v7x's second TensorCore gets work (weights
    # are tiny, so duplicating their VMEM residency per core is free).
    block_b = max(16, _round_up(block_b, 16))
    if B >= 2 * block_b:
        tb = block_b
        n_blocks = pl.cdiv(B, tb)
    else:
        tb = max(16, _round_up(pl.cdiv(B, 2), 16))
        n_blocks = max(2, pl.cdiv(B, tb))
    Bp = n_blocks * tb
    if Bp != B:
        x = jnp.pad(x, ((0, Bp - B), (0, 0)))

    flops = 2 * Bp * (H_OUT * ROW_K * ROW_NP + HID_P * C2)
    transcendentals = Bp * (H_OUT * ROW_NP + C2)
    bytes_accessed = (2 * (Bp * H_IN * H_IN + W1p.size + W2p.size)
                      + 4 * (b1p.size + b2r.size + Bp * C2))

    out = pl.pallas_call(
        fused_forward_kernel,
        out_shape=jax.ShapeDtypeStruct((Bp, C2), jnp.float32),
        grid=(n_blocks,),
        in_specs=[
            pl.BlockSpec((tb, H_IN * H_IN), lambda b: (b, 0)),      # batch-tiled input
            pl.BlockSpec((ROW_K, ROW_NP), lambda b: (0, 0)),        # resident weights
            pl.BlockSpec((1, ROW_NP), lambda b: (0, 0)),
            pl.BlockSpec((HID_P, C2), lambda b: (0, 0)),
            pl.BlockSpec((1, C2), lambda b: (0, 0)),
        ],
        out_specs=pl.BlockSpec((tb, C2), lambda b: (b, 0)),
        scratch_shapes=[pltpu.VMEM((tb, HID_P), jnp.bfloat16)],      # tanh'd rows
        compiler_params=pltpu.CompilerParams(
            dimension_semantics=("parallel",)),
        cost_estimate=pl.CostEstimate(
            flops=flops, transcendentals=transcendentals,
            bytes_accessed=bytes_accessed),
    )(x, W1p, b1p, W2p, b2r)
    return out[:B]


# ---------------- pure-JAX reference for self-check ----------------

def reference(x, W1, b1, W2, b2):
    B = x.shape[0]
    xi = x.reshape(B, 1, 28, 28).astype(jnp.float32)
    dn = ("NCHW", "OIHW", "NCHW")
    y = jax.lax.conv_general_dilated(xi, W1, (1, 1), "VALID", dimension_numbers=dn)
    y = jnp.tanh(y + b1[None, :, None, None])
    z = jax.lax.conv_general_dilated(y, W2, (1, 1), "VALID", dimension_numbers=dn)
    z = (z + b2[None, :, None, None]).reshape(B, 10)
    return jax.nn.log_softmax(z, axis=1)


if __name__ == "__main__":
    key = jax.random.PRNGKey(0)
    k_x, k_w1, k_b1, k_w2, k_b2 = jax.random.split(key, 5)

    # Deterministic synthetic parameters (shapes from the nn.Conv2d definitions).
    W1 = 0.1 * jax.random.normal(k_w1, (10, 1, 8, 8), dtype=jnp.float32)
    b1 = 0.1 * jax.random.normal(k_b1, (10,), dtype=jnp.float32)
    W2 = 0.05 * jax.random.normal(k_w2, (10, 10, 21, 21), dtype=jnp.float32)
    b2 = 0.1 * jax.random.normal(k_b2, (10,), dtype=jnp.float32)

    # bf16 MXU operands (f32 accumulation) => looser tolerance than pure f32.
    TOL = dict(rtol=5e-2, atol=5e-2)

    # Primary small test: B = 2 (pads to 2 blocks of 16 -> exercises v7x 2-TC path).
    B = 2
    x = jax.random.normal(k_x, (B, 784), dtype=jnp.float32)
    out = jax.block_until_ready(conv2dtanh_4_forward(x, W1, b1, W2, b2))
    ref = reference(x, W1, b1, W2, b2)
    assert out.shape == (B, 10)
    assert jnp.allclose(out, ref, **TOL), "mismatch vs reference (B=2)"

    # Exercises multi-block grid + batch padding with default tiling.
    B2 = 12
    x2 = jax.random.normal(jax.random.PRNGKey(1), (B2, 784), dtype=jnp.float32)
    out2 = jax.block_until_ready(conv2dtanh_4_forward(x2, W1, b1, W2, b2))
    ref2 = reference(x2, W1, b1, W2, b2)
    assert out2.shape == (B2, 10)
    assert jnp.allclose(out2, ref2, **TOL), "mismatch vs reference (B=12)"

    # Exercises the large-batch path (B >= 2*block_b -> 3 blocks of 16, padded to 48).
    B3 = 40
    x3 = jax.random.normal(jax.random.PRNGKey(2), (B3, 784), dtype=jnp.float32)
    out3 = jax.block_until_ready(conv2dtanh_4_forward(x3, W1, b1, W2, b2, block_b=16))
    ref3 = reference(x3, W1, b1, W2, b2)
    assert out3.shape == (B3, 10)
    assert jnp.allclose(out3, ref3, **TOL), "mismatch vs reference (B=40)"

    print("KERNEL_OK")
</pallas_src>

<mosaic_0001>
module attributes {stable_mosaic.version = 11 : i64} {
  func.func @fused_forward_kernel(%arg0: i32, %arg1: memref<16x784xbf16, #tpu.memory_space<vmem>>, %arg2: memref<224x256xbf16, #tpu.memory_space<vmem>>, %arg3: memref<1x256xf32, #tpu.memory_space<vmem>>, %arg4: memref<5376x10xbf16, #tpu.memory_space<vmem>>, %arg5: memref<1x10xf32, #tpu.memory_space<vmem>>, %arg6: memref<16x10xf32, #tpu.memory_space<vmem>>, %arg7: memref<16x5376xbf16, #tpu.memory_space<vmem>>) attributes {dimension_semantics = [#tpu.dimension_semantics<parallel>], iteration_bounds = array<i64: 2>, scalar_prefetch = 0 : i64, scratch_operands = 1 : i64, tpu.core_type = #tpu.core_type<tc>, window_params = [{transform_indices = @transform_0, window_bounds = array<i64: 16, 784>}, {pipeline_mode = #tpu.pipeline_mode<synchronous>, transform_indices = @transform_1, window_bounds = array<i64: 224, 256>}, {pipeline_mode = #tpu.pipeline_mode<synchronous>, transform_indices = @transform_2, window_bounds = array<i64: 1, 256>}, {pipeline_mode = #tpu.pipeline_mode<synchronous>, transform_indices = @transform_3, window_bounds = array<i64: 5376, 10>}, {pipeline_mode = #tpu.pipeline_mode<synchronous>, transform_indices = @transform_4, window_bounds = array<i64: 1, 10>}, {transform_indices = @transform_5, window_bounds = array<i64: 16, 10>}]} {
    %c0 = arith.constant 0 : index
    %c0_0 = arith.constant 0 : index
    %0 = vector.load %arg2[%c0, %c0_0] : memref<224x256xbf16, #tpu.memory_space<vmem>>, vector<224x256xbf16>
    %c0_1 = arith.constant 0 : index
    %c0_2 = arith.constant 0 : index
    %1 = vector.load %arg3[%c0_1, %c0_2] : memref<1x256xf32, #tpu.memory_space<vmem>>, vector<1x256xf32>
    %c0_3 = arith.constant 0 : index
    %c0_4 = arith.constant 0 : index
    %2 = vector.load %arg1[%c0_3, %c0_4] : memref<16x784xbf16, #tpu.memory_space<vmem>>, vector<16x224xbf16>
    %cst = arith.constant dense<0.000000e+00> : vector<16x256xf32>
    %3 = tpu.matmul %2, %0, %cst {dimension_numbers = #tpu.dot_dimension_numbers<[1], [0], [0], [1], [0, 0, 1, 1], [], []>} : vector<16x224xbf16>, vector<224x256xbf16>, vector<16x256xf32> -> vector<16x256xf32>
    %4 = vector.broadcast %1 : vector<1x256xf32> to vector<16x256xf32>
    %5 = arith.addf %3, %4 : vector<16x256xf32>
    %6 = math.tanh %5 : vector<16x256xf32>
    %7 = arith.truncf %6 : vector<16x256xf32> to vector<16x256xbf16>
    %c0_5 = arith.constant 0 : index
    %c0_6 = arith.constant 0 : index
    %8 = vector.load %arg7[%c0_5, %c0_6] : memref<16x5376xbf16, #tpu.memory_space<vmem>>, vector<16x256xbf16>
    tpu.vector_store %arg7[%c0_5, %c0_6], %7 {strides = array<i32>} : memref<16x5376xbf16, #tpu.memory_space<vmem>>, vector<16x256xbf16>,
    %c0_7 = arith.constant 0 : index
    %c28 = arith.constant 28 : index
    %9 = vector.load %arg1[%c0_7, %c28] : memref<16x784xbf16, #tpu.memory_space<vmem>>, vector<16x224xbf16>
    %cst_8 = arith.constant dense<0.000000e+00> : vector<16x256xf32>
    %10 = tpu.matmul %9, %0, %cst_8 {dimension_numbers = #tpu.dot_dimension_numbers<[1], [0], [0], [1], [0, 0, 1, 1], [], []>} : vector<16x224xbf16>, vector<224x256xbf16>, vector<16x256xf32> -> vector<16x256xf32>
    %11 = vector.broadcast %1 : vector<1x256xf32> to vector<16x256xf32>
    %12 = arith.addf %10, %11 : vector<16x256xf32>
    %13 = math.tanh %12 : vector<16x256xf32>
    %14 = arith.truncf %13 : vector<16x256xf32> to vector<16x256xbf16>
    %c0_9 = arith.constant 0 : index
    %c256 = arith.constant 256 : index
    %15 = vector.load %arg7[%c0_9, %c256] : memref<16x5376xbf16, #tpu.memory_space<vmem>>, vector<16x256xbf16>
    tpu.vector_store %arg7[%c0_9, %c256], %14 {strides = array<i32>} : memref<16x5376xbf16, #tpu.memory_space<vmem>>, vector<16x256xbf16>,
    %c0_10 = arith.constant 0 : index
    %c56 = arith.constant 56 : index
    %16 = vector.load %arg1[%c0_10, %c56] : memref<16x784xbf16, #tpu.memory_space<vmem>>, vector<16x224xbf16>
    %cst_11 = arith.constant dense<0.000000e+00> : vector<16x256xf32>
    %17 = tpu.matmul %16, %0, %cst_11 {dimension_numbers = #tpu.dot_dimension_numbers<[1], [0], [0], [1], [0, 0, 1, 1], [], []>} : vector<16x224xbf16>, vector<224x256xbf16>, vector<16x256xf32> -> vector<16x256xf32>
    %18 = vector.broadcast %1 : vector<1x256xf32> to vector<16x256xf32>
    %19 = arith.addf %17, %18 : vector<16x256xf32>
    %20 = math.tanh %19 : vector<16x256xf32>
    %21 = arith.truncf %20 : vector<16x256xf32> to vector<16x256xbf16>
    %c0_12 = arith.constant 0 : index
    %c512 = arith.constant 512 : index
    %22 = vector.load %arg7[%c0_12, %c512] : memref<16x5376xbf16, #tpu.memory_space<vmem>>, vector<16x256xbf16>
    tpu.vector_store %arg7[%c0_12, %c512], %21 {strides = array<i32>} : memref<16x5376xbf16, #tpu.memory_space<vmem>>, vector<16x256xbf16>,
    %c0_13 = arith.constant 0 : index
    %c84 = arith.constant 84 : index
    %23 = vector.load %arg1[%c0_13, %c84] : memref<16x784xbf16, #tpu.memory_space<vmem>>, vector<16x224xbf16>
    %cst_14 = arith.constant dense<0.000000e+00> : vector<16x256xf32>
    %24 = tpu.matmul %23, %0, %cst_14 {dimension_numbers = #tpu.dot_dimension_numbers<[1], [0], [0], [1], [0, 0, 1, 1], [], []>} : vector<16x224xbf16>, vector<224x256xbf16>, vector<16x256xf32> -> vector<16x256xf32>
    %25 = vector.broadcast %1 : vector<1x256xf32> to vector<16x256xf32>
    %26 = arith.addf %24, %25 : vector<16x256xf32>
    %27 = math.tanh %26 : vector<16x256xf32>
    %28 = arith.truncf %27 : vector<16x256xf32> to vector<16x256xbf16>
    %c0_15 = arith.constant 0 : index
    %c768 = arith.constant 768 : index
    %29 = vector.load %arg7[%c0_15, %c768] : memref<16x5376xbf16, #tpu.memory_space<vmem>>, vector<16x256xbf16>
    tpu.vector_store %arg7[%c0_15, %c768], %28 {strides = array<i32>} : memref<16x5376xbf16, #tpu.memory_space<vmem>>, vector<16x256xbf16>,
    %c0_16 = arith.constant 0 : index
    %c112 = arith.constant 112 : index
    %30 = vector.load %arg1[%c0_16, %c112] : memref<16x784xbf16, #tpu.memory_space<vmem>>, vector<16x224xbf16>
    %cst_17 = arith.constant dense<0.000000e+00> : vector<16x256xf32>
    %31 = tpu.matmul %30, %0, %cst_17 {dimension_numbers = #tpu.dot_dimension_numbers<[1], [0], [0], [1], [0, 0, 1, 1], [], []>} : vector<16x224xbf16>, vector<224x256xbf16>, vector<16x256xf32> -> vector<16x256xf32>
    %32 = vector.broadcast %1 : vector<1x256xf32> to vector<16x256xf32>
    %33 = arith.addf %31, %32 : vector<16x256xf32>
    %34 = math.tanh %33 : vector<16x256xf32>
    %35 = arith.truncf %34 : vector<16x256xf32> to vector<16x256xbf16>
    %c0_18 = arith.constant 0 : index
    %c1024 = arith.constant 1024 : index
    %36 = vector.load %arg7[%c0_18, %c1024] : memref<16x5376xbf16, #tpu.memory_space<vmem>>, vector<16x256xbf16>
    tpu.vector_store %arg7[%c0_18, %c1024], %35 {strides = array<i32>} : memref<16x5376xbf16, #tpu.memory_space<vmem>>, vector<16x256xbf16>,
    %c0_19 = arith.constant 0 : index
    %c140 = arith.constant 140 : index
    %37 = vector.load %arg1[%c0_19, %c140] : memref<16x784xbf16, #tpu.memory_space<vmem>>, vector<16x224xbf16>
    %cst_20 = arith.constant dense<0.000000e+00> : vector<16x256xf32>
    %38 = tpu.matmul %37, %0, %cst_20 {dimension_numbers = #tpu.dot_dimension_numbers<[1], [0], [0], [1], [0, 0, 1, 1], [], []>} : vector<16x224xbf16>, vector<224x256xbf16>, vector<16x256xf32> -> vector<16x256xf32>
    %39 = vector.broadcast %1 : vector<1x256xf32> to vector<16x256xf32>
    %40 = arith.addf %38, %39 : vector<16x256xf32>
    %41 = math.tanh %40 : vector<16x256xf32>
    %42 = arith.truncf %41 : vector<16x256xf32> to vector<16x256xbf16>
    %c0_21 = arith.constant 0 : index
    %c1280 = arith.constant 1280 : index
    %43 = vector.load %arg7[%c0_21, %c1280] : memref<16x5376xbf16, #tpu.memory_space<vmem>>, vector<16x256xbf16>
    tpu.vector_store %arg7[%c0_21, %c1280], %42 {strides = array<i32>} : memref<16x5376xbf16, #tpu.memory_space<vmem>>, vector<16x256xbf16>,
    %c0_22 = arith.constant 0 : index
    %c168 = arith.constant 168 : index
    %44 = vector.load %arg1[%c0_22, %c168] : memref<16x784xbf16, #tpu.memory_space<vmem>>, vector<16x224xbf16>
    %cst_23 = arith.constant dense<0.000000e+00> : vector<16x256xf32>
    %45 = tpu.matmul %44, %0, %cst_23 {dimension_numbers = #tpu.dot_dimension_numbers<[1], [0], [0], [1], [0, 0, 1, 1], [], []>} : vector<16x224xbf16>, vector<224x256xbf16>, vector<16x256xf32> -> vector<16x256xf32>
    %46 = vector.broadcast %1 : vector<1x256xf32> to vector<16x256xf32>
    %47 = arith.addf %45, %46 : vector<16x256xf32>
    %48 = math.tanh %47 : vector<16x256xf32>
    %49 = arith.truncf %48 : vector<16x256xf32> to vector<16x256xbf16>
    %c0_24 = arith.constant 0 : index
    %c1536 = arith.constant 1536 : index
    %50 = vector.load %arg7[%c0_24, %c1536] : memref<16x5376xbf16, #tpu.memory_space<vmem>>, vector<16x256xbf16>
    tpu.vector_store %arg7[%c0_24, %c1536], %49 {strides = array<i32>} : memref<16x5376xbf16, #tpu.memory_space<vmem>>, vector<16x256xbf16>,
    %c0_25 = arith.constant 0 : index
    %c196 = arith.constant 196 : index
    %51 = vector.load %arg1[%c0_25, %c196] : memref<16x784xbf16, #tpu.memory_space<vmem>>, vector<16x224xbf16>
    %cst_26 = arith.constant dense<0.000000e+00> : vector<16x256xf32>
    %52 = tpu.matmul %51, %0, %cst_26 {dimension_numbers = #tpu.dot_dimension_numbers<[1], [0], [0], [1], [0, 0, 1, 1], [], []>} : vector<16x224xbf16>, vector<224x256xbf16>, vector<16x256xf32> -> vector<16x256xf32>
    %53 = vector.broadcast %1 : vector<1x256xf32> to vector<16x256xf32>
    %54 = arith.addf %52, %53 : vector<16x256xf32>
    %55 = math.tanh %54 : vector<16x256xf32>
    %56 = arith.truncf %55 : vector<16x256xf32> to vector<16x256xbf16>
    %c0_27 = arith.constant 0 : index
    %c1792 = arith.constant 1792 : index
    %57 = vector.load %arg7[%c0_27, %c1792] : memref<16x5376xbf16, #tpu.memory_space<vmem>>, vector<16x256xbf16>
    tpu.vector_store %arg7[%c0_27, %c1792], %56 {strides = array<i32>} : memref<16x5376xbf16, #tpu.memory_space<vmem>>, vector<16x256xbf16>,
    %c0_28 = arith.constant 0 : index
    %c224 = arith.constant 224 : index
    %58 = vector.load %arg1[%c0_28, %c224] : memref<16x784xbf16, #tpu.memory_space<vmem>>, vector<16x224xbf16>
    %cst_29 = arith.constant dense<0.000000e+00> : vector<16x256xf32>
    %59 = tpu.matmul %58, %0, %cst_29 {dimension_numbers = #tpu.dot_dimension_numbers<[1], [0], [0], [1], [0, 0, 1, 1], [], []>} : vector<16x224xbf16>, vector<224x256xbf16>, vector<16x256xf32> -> vector<16x256xf32>
    %60 = vector.broadcast %1 : vector<1x256xf32> to vector<16x256xf32>
    %61 = arith.addf %59, %60 : vector<16x256xf32>
    %62 = math.tanh %61 : vector<16x256xf32>
    %63 = arith.truncf %62 : vector<16x256xf32> to vector<16x256xbf16>
    %c0_30 = arith.constant 0 : index
    %c2048 = arith.constant 2048 : index
    %64 = vector.load %arg7[%c0_30, %c2048] : memref<16x5376xbf16, #tpu.memory_space<vmem>>, vector<16x256xbf16>
    tpu.vector_store %arg7[%c0_30, %c2048], %63 {strides = array<i32>} : memref<16x5376xbf16, #tpu.memory_space<vmem>>, vector<16x256xbf16>,
    %c0_31 = arith.constant 0 : index
    %c252 = arith.constant 252 : index
    %65 = vector.load %arg1[%c0_31, %c252] : memref<16x784xbf16, #tpu.memory_space<vmem>>, vector<16x224xbf16>
    %cst_32 = arith.constant dense<0.000000e+00> : vector<16x256xf32>
    %66 = tpu.matmul %65, %0, %cst_32 {dimension_numbers = #tpu.dot_dimension_numbers<[1], [0], [0], [1], [0, 0, 1, 1], [], []>} : vector<16x224xbf16>, vector<224x256xbf16>, vector<16x256xf32> -> vector<16x256xf32>
    %67 = vector.broadcast %1 : vector<1x256xf32> to vector<16x256xf32>
    %68 = arith.addf %66, %67 : vector<16x256xf32>
    %69 = math.tanh %68 : vector<16x256xf32>
    %70 = arith.truncf %69 : vector<16x256xf32> to vector<16x256xbf16>
    %c0_33 = arith.constant 0 : index
    %c2304 = arith.constant 2304 : index
    %71 = vector.load %arg7[%c0_33, %c2304] : memref<16x5376xbf16, #tpu.memory_space<vmem>>, vector<16x256xbf16>
    tpu.vector_store %arg7[%c0_33, %c2304], %70 {strides = array<i32>} : memref<16x5376xbf16, #tpu.memory_space<vmem>>, vector<16x256xbf16>,
    %c0_34 = arith.constant 0 : index
    %c280 = arith.constant 280 : index
    %72 = vector.load %arg1[%c0_34, %c280] : memref<16x784xbf16, #tpu.memory_space<vmem>>, vector<16x224xbf16>
    %cst_35 = arith.constant dense<0.000000e+00> : vector<16x256xf32>
    %73 = tpu.matmul %72, %0, %cst_35 {dimension_numbers = #tpu.dot_dimension_numbers<[1], [0], [0], [1], [0, 0, 1, 1], [], []>} : vector<16x224xbf16>, vector<224x256xbf16>, vector<16x256xf32> -> vector<16x256xf32>
    %74 = vector.broadcast %1 : vector<1x256xf32> to vector<16x256xf32>
    %75 = arith.addf %73, %74 : vector<16x256xf32>
    %76 = math.tanh %75 : vector<16x256xf32>
    %77 = arith.truncf %76 : vector<16x256xf32> to vector<16x256xbf16>
    %c0_36 = arith.constant 0 : index
    %c2560 = arith.constant 2560 : index
    %78 = vector.load %arg7[%c0_36, %c2560] : memref<16x5376xbf16, #tpu.memory_space<vmem>>, vector<16x256xbf16>
    tpu.vector_store %arg7[%c0_36, %c2560], %77 {strides = array<i32>} : memref<16x5376xbf16, #tpu.memory_space<vmem>>, vector<16x256xbf16>,
    %c0_37 = arith.constant 0 : index
    %c308 = arith.constant 308 : index
    %79 = vector.load %arg1[%c0_37, %c308] : memref<16x784xbf16, #tpu.memory_space<vmem>>, vector<16x224xbf16>
    %cst_38 = arith.constant dense<0.000000e+00> : vector<16x256xf32>
    %80 = tpu.matmul %79, %0, %cst_38 {dimension_numbers = #tpu.dot_dimension_numbers<[1], [0], [0], [1], [0, 0, 1, 1], [], []>} : vector<16x224xbf16>, vector<224x256xbf16>, vector<16x256xf32> -> vector<16x256xf32>
    %81 = vector.broadcast %1 : vector<1x256xf32> to vector<16x256xf32>
    %82 = arith.addf %80, %81 : vector<16x256xf32>
    %83 = math.tanh %82 : vector<16x256xf32>
    %84 = arith.truncf %83 : vector<16x256xf32> to vector<16x256xbf16>
    %c0_39 = arith.constant 0 : index
    %c2816 = arith.constant 2816 : index
    %85 = vector.load %arg7[%c0_39, %c2816] : memref<16x5376xbf16, #tpu.memory_space<vmem>>, vector<16x256xbf16>
    tpu.vector_store %arg7[%c0_39, %c2816], %84 {strides = array<i32>} : memref<16x5376xbf16, #tpu.memory_space<vmem>>, vector<16x256xbf16>,
    %c0_40 = arith.constant 0 : index
    %c336 = arith.constant 336 : index
    %86 = vector.load %arg1[%c0_40, %c336] : memref<16x784xbf16, #tpu.memory_space<vmem>>, vector<16x224xbf16>
    %cst_41 = arith.constant dense<0.000000e+00> : vector<16x256xf32>
    %87 = tpu.matmul %86, %0, %cst_41 {dimension_numbers = #tpu.dot_dimension_numbers<[1], [0], [0], [1], [0, 0, 1, 1], [], []>} : vector<16x224xbf16>, vector<224x256xbf16>, vector<16x256xf32> -> vector<16x256xf32>
    %88 = vector.broadcast %1 : vector<1x256xf32> to vector<16x256xf32>
    %89 = arith.addf %87, %88 : vector<16x256xf32>
    %90 = math.tanh %89 : vector<16x256xf32>
    %91 = arith.truncf %90 : vector<16x256xf32> to vector<16x256xbf16>
    %c0_42 = arith.constant 0 : index
    %c3072 = arith.constant 3072 : index
    %92 = vector.load %arg7[%c0_42, %c3072] : memref<16x5376xbf16, #tpu.memory_space<vmem>>, vector<16x256xbf16>
    tpu.vector_store %arg7[%c0_42, %c3072], %91 {strides = array<i32>} : memref<16x5376xbf16, #tpu.memory_space<vmem>>, vector<16x256xbf16>,
    %c0_43 = arith.constant 0 : index
    %c364 = arith.constant 364 : index
    %93 = vector.load %arg1[%c0_43, %c364] : memref<16x784xbf16, #tpu.memory_space<vmem>>, vector<16x224xbf16>
    %cst_44 = arith.constant dense<0.000000e+00> : vector<16x256xf32>
    %94 = tpu.matmul %93, %0, %cst_44 {dimension_numbers = #tpu.dot_dimension_numbers<[1], [0], [0], [1], [0, 0, 1, 1], [], []>} : vector<16x224xbf16>, vector<224x256xbf16>, vector<16x256xf32> -> vector<16x256xf32>
    %95 = vector.broadcast %1 : vector<1x256xf32> to vector<16x256xf32>
    %96 = arith.addf %94, %95 : vector<16x256xf32>
    %97 = math.tanh %96 : vector<16x256xf32>
    %98 = arith.truncf %97 : vector<16x256xf32> to vector<16x256xbf16>
    %c0_45 = arith.constant 0 : index
    %c3328 = arith.constant 3328 : index
    %99 = vector.load %arg7[%c0_45, %c3328] : memref<16x5376xbf16, #tpu.memory_space<vmem>>, vector<16x256xbf16>
    tpu.vector_store %arg7[%c0_45, %c3328], %98 {strides = array<i32>} : memref<16x5376xbf16, #tpu.memory_space<vmem>>, vector<16x256xbf16>,
    %c0_46 = arith.constant 0 : index
    %c392 = arith.constant 392 : index
    %100 = vector.load %arg1[%c0_46, %c392] : memref<16x784xbf16, #tpu.memory_space<vmem>>, vector<16x224xbf16>
    %cst_47 = arith.constant dense<0.000000e+00> : vector<16x256xf32>
    %101 = tpu.matmul %100, %0, %cst_47 {dimension_numbers = #tpu.dot_dimension_numbers<[1], [0], [0], [1], [0, 0, 1, 1], [], []>} : vector<16x224xbf16>, vector<224x256xbf16>, vector<16x256xf32> -> vector<16x256xf32>
    %102 = vector.broadcast %1 : vector<1x256xf32> to vector<16x256xf32>
    %103 = arith.addf %101, %102 : vector<16x256xf32>
    %104 = math.tanh %103 : vector<16x256xf32>
    %105 = arith.truncf %104 : vector<16x256xf32> to vector<16x256xbf16>
    %c0_48 = arith.constant 0 : index
    %c3584 = arith.constant 3584 : index
    %106 = vector.load %arg7[%c0_48, %c3584] : memref<16x5376xbf16, #tpu.memory_space<vmem>>, vector<16x256xbf16>
    tpu.vector_store %arg7[%c0_48, %c3584], %105 {strides = array<i32>} : memref<16x5376xbf16, #tpu.memory_space<vmem>>, vector<16x256xbf16>,
    %c0_49 = arith.constant 0 : index
    %c420 = arith.constant 420 : index
    %107 = vector.load %arg1[%c0_49, %c420] : memref<16x784xbf16, #tpu.memory_space<vmem>>, vector<16x224xbf16>
    %cst_50 = arith.constant dense<0.000000e+00> : vector<16x256xf32>
    %108 = tpu.matmul %107, %0, %cst_50 {dimension_numbers = #tpu.dot_dimension_numbers<[1], [0], [0], [1], [0, 0, 1, 1], [], []>} : vector<16x224xbf16>, vector<224x256xbf16>, vector<16x256xf32> -> vector<16x256xf32>
    %109 = vector.broadcast %1 : vector<1x256xf32> to vector<16x256xf32>
    %110 = arith.addf %108, %109 : vector<16x256xf32>
    %111 = math.tanh %110 : vector<16x256xf32>
    %112 = arith.truncf %111 : vector<16x256xf32> to vector<16x256xbf16>
    %c0_51 = arith.constant 0 : index
    %c3840 = arith.constant 3840 : index
    %113 = vector.load %arg7[%c0_51, %c3840] : memref<16x5376xbf16, #tpu.memory_space<vmem>>, vector<16x256xbf16>
    tpu.vector_store %arg7[%c0_51, %c3840], %112 {strides = array<i32>} : memref<16x5376xbf16, #tpu.memory_space<vmem>>, vector<16x256xbf16>,
    %c0_52 = arith.constant 0 : index
    %c448 = arith.constant 448 : index
    %114 = vector.load %arg1[%c0_52, %c448] : memref<16x784xbf16, #tpu.memory_space<vmem>>, vector<16x224xbf16>
    %cst_53 = arith.constant dense<0.000000e+00> : vector<16x256xf32>
    %115 = tpu.matmul %114, %0, %cst_53 {dimension_numbers = #tpu.dot_dimension_numbers<[1], [0], [0], [1], [0, 0, 1, 1], [], []>} : vector<16x224xbf16>, vector<224x256xbf16>, vector<16x256xf32> -> vector<16x256xf32>
    %116 = vector.broadcast %1 : vector<1x256xf32> to vector<16x256xf32>
    %117 = arith.addf %115, %116 : vector<16x256xf32>
    %118 = math.tanh %117 : vector<16x256xf32>
    %119 = arith.truncf %118 : vector<16x256xf32> to vector<16x256xbf16>
    %c0_54 = arith.constant 0 : index
    %c4096 = arith.constant 4096 : index
    %120 = vector.load %arg7[%c0_54, %c4096] : memref<16x5376xbf16, #tpu.memory_space<vmem>>, vector<16x256xbf16>
    tpu.vector_store %arg7[%c0_54, %c4096], %119 {strides = array<i32>} : memref<16x5376xbf16, #tpu.memory_space<vmem>>, vector<16x256xbf16>,
    %c0_55 = arith.constant 0 : index
    %c476 = arith.constant 476 : index
    %121 = vector.load %arg1[%c0_55, %c476] : memref<16x784xbf16, #tpu.memory_space<vmem>>, vector<16x224xbf16>
    %cst_56 = arith.constant dense<0.000000e+00> : vector<16x256xf32>
    %122 = tpu.matmul %121, %0, %cst_56 {dimension_numbers = #tpu.dot_dimension_numbers<[1], [0], [0], [1], [0, 0, 1, 1], [], []>} : vector<16x224xbf16>, vector<224x256xbf16>, vector<16x256xf32> -> vector<16x256xf32>
    %123 = vector.broadcast %1 : vector<1x256xf32> to vector<16x256xf32>
    %124 = arith.addf %122, %123 : vector<16x256xf32>
    %125 = math.tanh %124 : vector<16x256xf32>
    %126 = arith.truncf %125 : vector<16x256xf32> to vector<16x256xbf16>
    %c0_57 = arith.constant 0 : index
    %c4352 = arith.constant 4352 : index
    %127 = vector.load %arg7[%c0_57, %c4352] : memref<16x5376xbf16, #tpu.memory_space<vmem>>, vector<16x256xbf16>
    tpu.vector_store %arg7[%c0_57, %c4352], %126 {strides = array<i32>} : memref<16x5376xbf16, #tpu.memory_space<vmem>>, vector<16x256xbf16>,
    %c0_58 = arith.constant 0 : index
    %c504 = arith.constant 504 : index
    %128 = vector.load %arg1[%c0_58, %c504] : memref<16x784xbf16, #tpu.memory_space<vmem>>, vector<16x224xbf16>
    %cst_59 = arith.constant dense<0.000000e+00> : vector<16x256xf32>
    %129 = tpu.matmul %128, %0, %cst_59 {dimension_numbers = #tpu.dot_dimension_numbers<[1], [0], [0], [1], [0, 0, 1, 1], [], []>} : vector<16x224xbf16>, vector<224x256xbf16>, vector<16x256xf32> -> vector<16x256xf32>
    %130 = vector.broadcast %1 : vector<1x256xf32> to vector<16x256xf32>
    %131 = arith.addf %129, %130 : vector<16x256xf32>
    %132 = math.tanh %131 : vector<16x256xf32>
    %133 = arith.truncf %132 : vector<16x256xf32> to vector<16x256xbf16>
    %c0_60 = arith.constant 0 : index
    %c4608 = arith.constant 4608 : index
    %134 = vector.load %arg7[%c0_60, %c4608] : memref<16x5376xbf16, #tpu.memory_space<vmem>>, vector<16x256xbf16>
    tpu.vector_store %arg7[%c0_60, %c4608], %133 {strides = array<i32>} : memref<16x5376xbf16, #tpu.memory_space<vmem>>, vector<16x256xbf16>,
    %c0_61 = arith.constant 0 : index
    %c532 = arith.constant 532 : index
    %135 = vector.load %arg1[%c0_61, %c532] : memref<16x784xbf16, #tpu.memory_space<vmem>>, vector<16x224xbf16>
    %cst_62 = arith.constant dense<0.000000e+00> : vector<16x256xf32>
    %136 = tpu.matmul %135, %0, %cst_62 {dimension_numbers = #tpu.dot_dimension_numbers<[1], [0], [0], [1], [0, 0, 1, 1], [], []>} : vector<16x224xbf16>, vector<224x256xbf16>, vector<16x256xf32> -> vector<16x256xf32>
    %137 = vector.broadcast %1 : vector<1x256xf32> to vector<16x256xf32>
    %138 = arith.addf %136, %137 : vector<16x256xf32>
    %139 = math.tanh %138 : vector<16x256xf32>
    %140 = arith.truncf %139 : vector<16x256xf32> to vector<16x256xbf16>
    %c0_63 = arith.constant 0 : index
    %c4864 = arith.constant 4864 : index
    %141 = vector.load %arg7[%c0_63, %c4864] : memref<16x5376xbf16, #tpu.memory_space<vmem>>, vector<16x256xbf16>
    tpu.vector_store %arg7[%c0_63, %c4864], %140 {strides = array<i32>} : memref<16x5376xbf16, #tpu.memory_space<vmem>>, vector<16x256xbf16>,
    %c0_64 = arith.constant 0 : index
    %c560 = arith.constant 560 : index
    %142 = vector.load %arg1[%c0_64, %c560] : memref<16x784xbf16, #tpu.memory_space<vmem>>, vector<16x224xbf16>
    %cst_65 = arith.constant dense<0.000000e+00> : vector<16x256xf32>
    %143 = tpu.matmul %142, %0, %cst_65 {dimension_numbers = #tpu.dot_dimension_numbers<[1], [0], [0], [1], [0, 0, 1, 1], [], []>} : vector<16x224xbf16>, vector<224x256xbf16>, vector<16x256xf32> -> vector<16x256xf32>
    %144 = vector.broadcast %1 : vector<1x256xf32> to vector<16x256xf32>
    %145 = arith.addf %143, %144 : vector<16x256xf32>
    %146 = math.tanh %145 : vector<16x256xf32>
    %147 = arith.truncf %146 : vector<16x256xf32> to vector<16x256xbf16>
    %c0_66 = arith.constant 0 : index
    %c5120 = arith.constant 5120 : index
    %148 = vector.load %arg7[%c0_66, %c5120] : memref<16x5376xbf16, #tpu.memory_space<vmem>>, vector<16x256xbf16>
    tpu.vector_store %arg7[%c0_66, %c5120], %147 {strides = array<i32>} : memref<16x5376xbf16, #tpu.memory_space<vmem>>, vector<16x256xbf16>,
    %c0_67 = arith.constant 0 : index
    %c0_68 = arith.constant 0 : index
    %149 = vector.load %arg7[%c0_67, %c0_68] : memref<16x5376xbf16, #tpu.memory_space<vmem>>, vector<16x5376xbf16>
    %c0_69 = arith.constant 0 : index
    %c0_70 = arith.constant 0 : index
    %150 = vector.load %arg4[%c0_69, %c0_70] : memref<5376x10xbf16, #tpu.memory_space<vmem>>, vector<5376x10xbf16>
    %cst_71 = arith.constant dense<0.000000e+00> : vector<16x10xf32>
    %151 = tpu.matmul %149, %150, %cst_71 {dimension_numbers = #tpu.dot_dimension_numbers<[1], [0], [0], [1], [0, 0, 1, 1], [], []>} : vector<16x5376xbf16>, vector<5376x10xbf16>, vector<16x10xf32> -> vector<16x10xf32>
    %c0_72 = arith.constant 0 : index
    %c0_73 = arith.constant 0 : index
    %152 = vector.load %arg5[%c0_72, %c0_73] : memref<1x10xf32, #tpu.memory_space<vmem>>, vector<1x10xf32>
    %153 = vector.broadcast %152 : vector<1x10xf32> to vector<16x10xf32>
    %154 = arith.addf %151, %153 : vector<16x10xf32>
    %cst_74 = arith.constant dense<0xFF800000> : vector<16xf32>
    %155 = vector.multi_reduction <maximumf>, %154, %cst_74 [1] : vector<16x10xf32> to vector<16xf32>
    %156 = vector.shape_cast %155 : vector<16xf32> to vector<16x1xf32>
    %157 = vector.broadcast %156 : vector<16x1xf32> to vector<16x10xf32>
    %158 = arith.subf %154, %157 : vector<16x10xf32>
    %159 = math.exp %158 : vector<16x10xf32>
    %cst_75 = arith.constant dense<0.000000e+00> : vector<16xf32>
    %160 = vector.multi_reduction <add>, %159, %cst_75 [1] : vector<16x10xf32> to vector<16xf32>
    %161 = vector.shape_cast %160 : vector<16xf32> to vector<16x1xf32>
    %162 = math.log %161 : vector<16x1xf32>
    %163 = vector.broadcast %162 : vector<16x1xf32> to vector<16x10xf32>
    %164 = arith.subf %158, %163 : vector<16x10xf32>
    %c0_76 = arith.constant 0 : index
    %c0_77 = arith.constant 0 : index
    %165 = vector.load %arg6[%c0_76, %c0_77] : memref<16x10xf32, #tpu.memory_space<vmem>>, vector<16x10xf32>
    tpu.vector_store %arg6[%c0_76, %c0_77], %164 {strides = array<i32>} : memref<16x10xf32, #tpu.memory_space<vmem>>, vector<16x10xf32>,
    return
  }
  func.func @transform_0(%arg0: i32) -> (i32, i32) {
    %c0_i32 = arith.constant 0 : i32
    %c0_i32_0 = arith.constant 0 : i32
    return %arg0, %c0_i32 : i32, i32
  }
  func.func @transform_1(%arg0: i32) -> (i32, i32) {
    %c0_i32 = arith.constant 0 : i32
    %c0_i32_0 = arith.constant 0 : i32
    %c0_i32_1 = arith.constant 0 : i32
    return %c0_i32, %c0_i32_0 : i32, i32
  }
  func.func @transform_2(%arg0: i32) -> (i32, i32) {
    %c0_i32 = arith.constant 0 : i32
    %c0_i32_0 = arith.constant 0 : i32
    %c0_i32_1 = arith.constant 0 : i32
    return %c0_i32, %c0_i32_0 : i32, i32
  }
  func.func @transform_3(%arg0: i32) -> (i32, i32) {
    %c0_i32 = arith.constant 0 : i32
    %c0_i32_0 = arith.constant 0 : i32
    %c0_i32_1 = arith.constant 0 : i32
    return %c0_i32, %c0_i32_0 : i32, i32
  }
  func.func @transform_4(%arg0: i32) -> (i32, i32) {
    %c0_i32 = arith.constant 0 : i32
    %c0_i32_0 = arith.constant 0 : i32
    %c0_i32_1 = arith.constant 0 : i32
    return %c0_i32, %c0_i32_0 : i32, i32
  }
  func.func @transform_5(%arg0: i32) -> (i32, i32) {
    %c0_i32 = arith.constant 0 : i32
    %c0_i32_0 = arith.constant 0 : i32
    return %arg0, %c0_i32 : i32, i32
  }
}

</mosaic_0001>

<bundles_post_ra>
// kernel: tile.8
= control target key start
LH: loop header
LB: loop body
LE: loop exit
PB: predicated region body
PF: predicated region fallthrough
CT: control target
= control target key end

     0   :  { %s34_s0 = inlined_call_operand.vmem [shape: f32[10], index: 0, kind: input, shape index: {}]   ;;  %s35_s1 = inlined_call_operand.vmem [shape: f32[21,10], index: 1, kind: output, shape index: {}]  }
   0x1   :  { %v4_v0 = vld [vmem:[%s34_s0] ss:$0 sm:$0xff] }
   0x2   :  { %5 = vst [vmem:[%s35_s1] sm:$0xff] %v4_v0  ;;  %10 = vst [vmem:[%s35_s1 + $0x8] sm:$0xff] %v4_v0 }
   0x3   :  { %11 = vst [vmem:[%s35_s1 + $0x10] sm:$0xff] %v4_v0 }

// kernel: tile.9
= control target key start
LH: loop header
LB: loop body
LE: loop exit
PB: predicated region body
PF: predicated region fallthrough
CT: control target
= control target key end

     0   :  { %vm9_vm0 = vcmask 64512   ;;  %s193_s10 = smov 100   ;;  %s194_s15 = smov 120   ;;  %vm3_vm1 = vcmask 80896   ;;  %vm13_vm2 = vcmask 15360   ;;  %vm16_vm3 = vcmask 1048512   ;;  %s295_s0 = inlined_call_operand.vmem [shape: f32[21,10], index: 0, kind: input, shape index: {}]   ;;  %s296_s1 = inlined_call_operand.vmem [shape: f32[1,210], index: 1, kind: output, shape index: {}]  }
   0x1   :  { %v154_v0 = vld [vmem:[%s295_s0 + $0xa] sm:$0x1]   ;;  %v151_v1 = vld [vmem:[%s295_s0 + $0xc] sm:$0x1]   ;;  %v155_v4 = vld [vmem:[%s295_s0 + $0x9] sm:$0x1]  }
   0x2   :  { %26 = vrot.lane.b32.xlu1 %v154_v0, %s193_s10  ;;  %v152_v2 = vld [vmem:[%s295_s0 + $0xc] sm:$0x1]   ;;  %v153_v5 = vld [vmem:[%s295_s0 + $0xb] sm:$0x1]   ;;  %s195_s18 = smov 90   ;;  %s196_s21 = smov 110  }
   0x3   :  { %v10_v3 = vsel %vm9_vm0, %v152_v2, %v151_v1  ;;  %v157_v6 = vld [vmem:[%s295_s0 + $0x14] sm:$0x1]   ;;  %v156_v7 = vld [vmem:[%s295_s0 + $0x8] sm:$0x1]   ;;  %s197_s24 = smov 72   ;;  %s198_s27 = smov 80  }
   0x4   :  { %11 = vrot.lane.b32.xlu0 %v10_v3, %s194_s15  ;;  %v159_v8 = vld [vmem:[%s295_s0 + $0x13] sm:$0x1]   ;;  %v2_v9 = vld [vmem:[%s295_s0] sm:$0x1]   ;;  %v158_v10 = vld [vmem:[%s295_s0 + $0x7] sm:$0x1]  }
   0x5   :  { %4 = vst.msk [vmem:[#allocation0] sm:$0x1] %vm3_vm1, %v2_v9   ;;  %s199_s3 = smov 62   ;;  %v161_v11 = vld [vmem:[%s295_s0 + $0x12] sm:$0x1]   ;;  %s200_s6 = smov 70  }
   0x6   :  { %32 = vrot.lane.b32.xlu1 %v155_v4, %s195_s18  ;;  %v160_v12 = vld [vmem:[%s295_s0 + $0x6] sm:$0x1]   ;;  %s201_s9 = smov 52   ;;  %v163_v13 = vld [vmem:[%s295_s0 + $0x11] sm:$0x1]   ;;  %s202_s12 = smov 60  }
   0x7   :  { %v162_v14 = vld [vmem:[%s295_s0 + $0x5] sm:$0x1]   ;;  %s203_s15 = smov 42   ;;  %v165_v15 = vld [vmem:[%s295_s0 + $0x10] sm:$0x1]   ;;  %s204_s18 = smov 50  }
   0x8   :  { %20 = vrot.lane.b32.xlu0 %v153_v5, %s196_s21  ;;  %v164_v16 = vld [vmem:[%s295_s0 + $0x4] sm:$0x1]   ;;  %s205_s21 = smov 32   ;;  %v167_v17 = vld [vmem:[%s295_s0 + $0xf] sm:$0x1]   ;;  %s208_s30 = smov 30  }
   0x9   :  { %v166_v18 = vld [vmem:[%s295_s0 + $0x3] sm:$0x1]   ;;  %v169_v19 = vld [vmem:[%s295_s0 + $0xe] sm:$0x1]   ;;  %v168_v20 = vld [vmem:[%s295_s0 + $0x2] sm:$0x1]  }
   0xa   :  { %44 = vrot.lane.b32.xlu1 %v157_v6, %s197_s24  ;;  %s206_s24 = smov 40   ;;  %s209_s4 = smov 12   ;;  %v171_v21 = vld [vmem:[%s295_s0 + $0xd] sm:$0x1]   ;;  %v170_v22 = vld [vmem:[%s295_s0 + $0x1] sm:$0x1]  }
   0xb   :  { %s210_s7 = smov 20   ;;  %s211_s0 = smov 2   ;;  %vm22_vm4 = vcmask 982896   ;;  %vm28_vm5 = vcmask 900896   ;;  %vm34_vm6 = vcmask 818896   ;;  %vm46_vm7 = vcmask 671296  }
   0xc   :  { %38 = vrot.lane.b32.xlu0 %v156_v7, %s198_s27  ;;  %s207_s27 = smov 22   ;;  %s212_s10 = smov 10   ;;  %vm40_vm8 = vcmask 736896   ;;  %vm59_vm9 = vcmask 589296   ;;  %vm53_vm10 = vcmask 654896   ;;  %vm72_vm11 = vcmask 507296  }
   0xd   :  { %vm66_vm12 = vcmask 572896   ;;  %vm85_vm13 = vcmask 425296   ;;  %vm79_vm14 = vcmask 490896   ;;  %vm98_vm15 = vcmask 343296  }
   0xe   :  { %57 = vrot.lane.b32.xlu1 %v159_v8, %s199_s3  ;;  %vm92_vm0 = vcmask 408896   ;;  %vm111_vm1 = vcmask 261296  }
  0x10   :  { %51 = vrot.lane.b32.xlu0 %v158_v10, %s200_s6 }
  0x12   :  { %70 = vrot.lane.b32.xlu1 %v161_v11, %s201_s9 }
  0x14   :  { %64 = vrot.lane.b32.xlu0 %v160_v12, %s202_s12 }
  0x16   :  { %83 = vrot.lane.b32.xlu1 %v163_v13, %s203_s15 }
  0x18   :  { %77 = vrot.lane.b32.xlu0 %v162_v14, %s204_s18 }
  0x1a   :  { %96 = vrot.lane.b32.xlu1 %v165_v15, %s205_s21 }
  0x1c   :  { %90 = vrot.lane.b32.xlu0 %v164_v16, %s206_s24 }
  0x1e   :  { %109 = vrot.lane.b32.xlu1 %v167_v17, %s207_s27 }
  0x20   :  { %103 = vrot.lane.b32.xlu0 %v166_v18, %s208_s30 }
  0x22   :  { %122 = vrot.lane.b32.xlu1 %v169_v19, %s209_s4 }
  0x24   :  { %116 = vrot.lane.b32.xlu0 %v168_v20, %s210_s7 }
  0x26   :  { %135 = vrot.lane.b32.xlu1 %v171_v21, %s211_s0 }
  0x28   :  { %129 = vrot.lane.b32.xlu0 %v170_v22, %s212_s10 }
  0x74   :  { %v27_v23 = vpop.permute.xlu1 %26  }
  0x76   :  { %v12_v24 = vpop.permute.xlu0 %11  }
  0x77   :  { %15 = vst.msk [vmem:[#allocation0 + $0x8] sm:$0x1] %vm13_vm2, %v12_v24   ;;  %vm105_vm2 = vcmask 326896  }
  0x78   :  { %17 = vst.msk [vmem:[#allocation0] sm:$0x1] %vm16_vm3, %v12_v24   ;;  %v33_v25 = vpop.permute.xlu1 %32   ;;  %vm124_vm3 = vcmask 179296  }
  0x7a   :  { %v21_v26 = vpop.permute.xlu0 %20  }
  0x7b   :  { %23 = vst.msk [vmem:[#allocation0] sm:$0x1] %vm22_vm4, %v21_v26   ;;  %vm118_vm4 = vcmask 244896  }
  0x7c   :  { %29 = vst.msk [vmem:[#allocation0] sm:$0x1] %vm28_vm5, %v27_v23   ;;  %v45_v27 = vpop.permute.xlu1 %44   ;;  %vm137_vm5 = vcmask 97296  }
  0x7d   :  { %48 = vst.msk [vmem:[#allocation0 + $0x8] sm:$0x1] %vm46_vm7, %v45_v27  }
  0x7e   :  { %35 = vst.msk [vmem:[#allocation0] sm:$0x1] %vm34_vm6, %v33_v25   ;;  %v39_v28 = vpop.permute.xlu0 %38   ;;  %vm131_vm6 = vcmask 162896  }
  0x7f   :  { %41 = vst.msk [vmem:[#allocation0] sm:$0x1] %vm40_vm8, %v39_v28  }
  0x80   :  { %v58_v29 = vpop.permute.xlu1 %57  }
  0x81   :  { %61 = vst.msk [vmem:[#allocation0 + $0x8] sm:$0x1] %vm59_vm9, %v58_v29  }
  0x82   :  { %v52_v30 = vpop.permute.xlu0 %51  }
  0x83   :  { %54 = vst.msk [vmem:[#allocation0] sm:$0x1] %vm53_vm10, %v52_v30  }
  0x84   :  { %v71_v31 = vpop.permute.xlu1 %70  }
  0x85   :  { %74 = vst.msk [vmem:[#allocation0 + $0x8] sm:$0x1] %vm72_vm11, %v71_v31  }
  0x86   :  { %v65_v32 = vpop.permute.xlu0 %64  }
  0x87   :  { %67 = vst.msk [vmem:[#allocation0] sm:$0x1] %vm66_vm12, %v65_v32  }
  0x88   :  { %v84_v33 = vpop.permute.xlu1 %83  }
  0x89   :  { %87 = vst.msk [vmem:[#allocation0 + $0x8] sm:$0x1] %vm85_vm13, %v84_v33  }
  0x8a   :  { %v78_v34 = vpop.permute.xlu0 %77  }
  0x8b   :  { %80 = vst.msk [vmem:[#allocation0] sm:$0x1] %vm79_vm14, %v78_v34  }
  0x8c   :  { %v97_v35 = vpop.permute.xlu1 %96  }
  0x8d   :  { %100 = vst.msk [vmem:[#allocation0 + $0x8] sm:$0x1] %vm98_vm15, %v97_v35  }
  0x8e   :  { %v91_v36 = vpop.permute.xlu0 %90  }
  0x8f   :  { %93 = vst.msk [vmem:[#allocation0] sm:$0x1] %vm92_vm0, %v91_v36  }
  0x90   :  { %v110_v37 = vpop.permute.xlu1 %109  }
  0x91   :  { %113 = vst.msk [vmem:[#allocation0 + $0x8] sm:$0x1] %vm111_vm1, %v110_v37  }
  0x92   :  { %v104_v38 = vpop.permute.xlu0 %103  }
  0x93   :  { %106 = vst.msk [vmem:[#allocation0] sm:$0x1] %vm105_vm2, %v104_v38  }
  0x94   :  { %v123_v39 = vpop.permute.xlu1 %122  }
  0x95   :  { %126 = vst.msk [vmem:[#allocation0 + $0x8] sm:$0x1] %vm124_vm3, %v123_v39  }
  0x96   :  { %v117_v40 = vpop.permute.xlu0 %116  }
  0x97   :  { %119 = vst.msk [vmem:[#allocation0] sm:$0x1] %vm118_vm4, %v117_v40  }
  0x98   :  { %v136_v41 = vpop.permute.xlu1 %135  }
  0x99   :  { %139 = vst.msk [vmem:[#allocation0 + $0x8] sm:$0x1] %vm137_vm5, %v136_v41  }
  0x9a   :  { %v130_v42 = vpop.permute.xlu0 %129  }
  0x9b   :  { %132 = vst.msk [vmem:[#allocation0] sm:$0x1] %vm131_vm6, %v130_v42  }
  0xa0   :  { %v147_v43 = vld [vmem:[#allocation0 + $0x8] sm:$0x1] }
  0xa1   :  { %172 = vst [vmem:[%s296_s1 + $0x1] sm:$0x1] %v147_v43 }
  0xa2   :  { %v143_v44 = vld [vmem:[#allocation0] sm:$0x1] }
  0xa3   :  { %145 = vst [vmem:[%s296_s1] sm:$0x1] %v143_v44 }

// kernel: conv2dtanh_4_forward.1
= control target key start
LH: loop header
LB: loop body
LE: loop exit
PB: predicated region body
PF: predicated region fallthrough
CT: control target
= control target key end

     0   :  { %s7399_s18 = smov 0   ;;  %s10163_s0 = inlined_call_operand.vmem [shape: bf16[32,784], index: 0, kind: input, shape index: {}]   ;;  %s10164_s1 = inlined_call_operand.vmem [shape: bf16[224,256], index: 1, kind: input, shape index: {}]   ;;  %s10165_s2 = inlined_call_operand.vmem [shape: f32[1,256], index: 2, kind: input, shape index: {}]   ;;  %s10166_s3 = inlined_call_operand.vmem [shape: bf16[5376,10], index: 3, kind: input, shape index: {}]   ;;  %s10167_s4 = inlined_call_operand.vmem [shape: f32[1,10], index: 4, kind: input, shape index: {}]   ;;  %s10168_s5 = inlined_call_operand.vmem [shape: f32[32,10], index: 5, kind: output, shape index: {}]  }
   0x1 LB: > { %s5729_s19 = sadd.s32 4294967295, %s7347_s18   ;;  %p5733_p0 = scmp.ge.s32.totalorder %s7347_s18, 1  ;;  %s7347_s18 = sphi %s7399_s18, %s15_s18  }
   0x2   : > { %p189_p1 = scmp.lt.s32.totalorder %s7347_s18, 3 }
   0x4   : > { %p190_p2 = pnand %p5733_p0, %p189_p1 }
   0x6   : > { %193 = sbr.rel (%p190_p2) target bundleno = 1535 (0x5ff), region = 40 }
   0xd   : > { %s5734_s20 = sshll.u32 %s5729_s19, 1  ;;  %v7410_v0 = vld [vmem:[%s10164_s1 + $0x4] ss:$8 sps:$4 sm:$0xff]   ;;  %v7415_v1 = vld [vmem:[%s10164_s1] ss:$8 sps:$4 sm:$0xff]   ;;  %vm423_vm0 = vcmask 785408  }
   0xe   : > { %p219_p3 = scmp.lt.s32.totalorder %s5734_s20, 3  ;;  %427 = vmatprep.subr.bf16.mxu0 %v7410_v0  ;;  %v7421_v2 = vld [vmem:[%s10164_s1 + $0x14] ss:$8 sps:$4 sm:$0xff]   ;;  %498 = vmatprep.subr.bf16.mxu1 %v7410_v0  ;;  %v7430_v3 = vld [vmem:[%s10164_s1 + $0x10] ss:$8 sps:$4 sm:$0xff]   ;;  %s7349_s14 = smov 100  }
   0xf   : > { %428 = vmatpush1.bf16.msra.mxu0 %v7415_v1  ;;  %499 = vmatpush1.bf16.msra.mxu1 %v7415_v1  ;;  %v7437_v4 = vld [vmem:[%s10164_s1 + $0x24] ss:$8 sps:$4 sm:$0xff]   ;;  %v7450_v5 = vld [vmem:[%s10164_s1 + $0x20] ss:$8 sps:$4 sm:$0xff]   ;;  %v7455_v6 = vld [vmem:[%s10164_s1 + $0x34] ss:$8 sps:$4 sm:$0xff]  }
  0x10   : > { %s10216_s20 = smov (!%p219_p3, %s5734_s20), 3  ;;  %429 = vmatprep.subr.bf16.mxu0 %v7421_v2  ;;  %500 = vmatprep.subr.bf16.mxu1 %v7421_v2  ;;  %s7350_s15 = smov 72   ;;  %v7470_v10 = vld [vmem:[%s10164_s1 + $0x30] ss:$8 sps:$4 sm:$0xff]   ;;  %v7476_v11 = vld [vmem:[%s10164_s1 + $0x44] ss:$8 sps:$4 sm:$0xff]  }
  0x11   : > { %s6645_s6 = smul.u32 28, %s10216_s20  ;;  %v7485_v12 = vld [vmem:[%s10164_s1 + $0x40] ss:$8 sps:$4 sm:$0xff]   ;;  %v7491_v13 = vld [vmem:[%s10164_s1 + $0x54] ss:$8 sps:$4 sm:$0xff]   ;;  %s7351_s28 = smov 44  }
  0x12   : > { %v7498_v14 = vld [vmem:[%s10164_s1 + $0x50] ss:$8 sps:$4 sm:$0xff]   ;;  %v7507_v16 = vld [vmem:[%s10164_s1 + $0x64] ss:$8 sps:$4 sm:$0xff]   ;;  %v7513_v17 = vld [vmem:[%s10164_s1 + $0x60] ss:$8 sps:$4 sm:$0xff]  }
  0x13   : > { %s7444_s9 = scalar_lea.vmem %s10163_s0, %s6645_s6  ;;  %430 = vmatpush1.bf16.msra.mxu0 %v7430_v3  ;;  %501 = vmatpush1.bf16.msra.mxu1 %v7430_v3  ;;  %v7523_v19 = vld [vmem:[%s10164_s1 + $0x74] ss:$8 sps:$4 sm:$0xff]   ;;  %v7528_v20 = vld [vmem:[%s10164_s1 + $0x70] ss:$8 sps:$4 sm:$0xff]   ;;  %v7537_v22 = vld [vmem:[%s10164_s1 + $0x84] ss:$8 sps:$4 sm:$0xff]  }
  0x14   : > { %v7459_v7 = vld [vmem:[%s7444_s9] ss:$28 sps:$4 sm:$0xff]   ;;  %431 = vmatprep.subr.bf16.mxu0 %v7437_v4  ;;  %502 = vmatprep.subr.bf16.mxu1 %v7437_v4  ;;  %v6677_v9 = vld [vmem:[%s7444_s9 + $0x8] ss:$28 sps:$4 sm:$0xff]   ;;  %s7353_s22 = smov 116   ;;  %s7354_s27 = smov 88  }
  0x15   : > { %v6676_v8 = vld [vmem:[%s7444_s9 + $0x4] ss:$28 sps:$4 sm:$0xff]   ;;  %488 = vrot.lane.b32.xlu0 %v7459_v7, %s7349_s14  ;;  %v7554_v25 = vld [vmem:[%s10164_s1 + $0x94] ss:$8 sps:$4 sm:$0xff]   ;;  %v6725_v26 = vld [vmem:[%s7444_s9 + $0xc] ss:$28 sps:$4 sm:$0xff]  }
  0x16   : > { %568 = vrot.lane.b32.xlu1 %v6676_v8, %s7350_s15  ;;  %5768 = vmatprep.mubr.msk.bf16.mxu0 %vm423_vm0, %v6676_v8  ;;  %v6714_v15 = vld [vmem:[%s7444_s9 + $0x8] ss:$28 sps:$4 sm:$0xff]   ;;  %v7565_v27 = vld [vmem:[%s10164_s1 + $0x90] ss:$8 sps:$4 sm:$0xff]   ;;  %v6711_v30 = vld [vmem:[%s10164_s1 + $0xb4] ss:$8 sps:$4 sm:$0xff]  }
  0x17   : > { %432 = vmatpush1.bf16.msra.mxu0 %v7450_v5  ;;  %503 = vmatpush1.bf16.msra.mxu1 %v7450_v5  ;;  %v6720_v18 = vld [vmem:[%s7444_s9 + $0x8] ss:$28 sps:$4 sm:$0xff]   ;;  %v6713_v31 = vld [vmem:[%s10164_s1 + $0xb0] ss:$8 sps:$4 sm:$0xff]   ;;  %v6718_v34 = vld [vmem:[%s10164_s1 + $0xd4] ss:$8 sps:$4 sm:$0xff]  }
  0x18   : > { %433 = vmatprep.subr.bf16.mxu0 %v7455_v6  ;;  %504 = vmatprep.subr.bf16.mxu1 %v7455_v6  ;;  %v7532_v21 = vld [vmem:[%s7444_s9 + $0x4] ss:$28 sps:$4 sm:$0xff]   ;;  %v6726_v35 = vld [vmem:[%s7444_s9 + $0xc] ss:$28 sps:$4 sm:$0xff]   ;;  %v6721_v36 = vld [vmem:[%s10164_s1 + $0xd0] ss:$8 sps:$4 sm:$0xff]  }
  0x19   : > { %490 = vrot.lane.b32.xlu0 %v6676_v8, %s7349_s14  ;;  %v7543_v23 = vld [vmem:[%s7444_s9 + $0x8] ss:$28 sps:$4 sm:$0xff]   ;;  %s7355_s14 = smov 60   ;;  %s7356_s21 = smov 32   ;;  %vm492_vm1 = vcmask 818176   ;;  %vm572_vm2 = vcmask 588800  }
  0x1a   : > { %570 = vrot.lane.b32.xlu1 %v6677_v9, %s7350_s15  ;;  %v7548_v24 = vld [vmem:[%s10164_s1 + $0x80] ss:$8 sps:$4 sm:$0xff]   ;;  %v7571_v28 = vld [vmem:[%s10164_s1 + $0xa4] ss:$8 sps:$4 sm:$0xff]   ;;  %s7358_s23 = smov 104   ;;  %vm653_vm3 = vcmask 359424  }
  0x1b   : > { %434 = vmatpush1.bf16.msra.mxu0 %v7470_v10  ;;  %505 = vmatpush1.bf16.msra.mxu1 %v7470_v10  ;;  %v6710_v29 = vld [vmem:[%s10164_s1 + $0xa0] ss:$8 sps:$4 sm:$0xff]   ;;  %v6715_v32 = vld [vmem:[%s10164_s1 + $0xc4] ss:$8 sps:$4 sm:$0xff]   ;;  %vm734_vm4 = vcmask 130048   ;;  %s7359_s30 = smov 76  }
  0x1c   : > { %435 = vmatprep.subr.bf16.mxu0 %v7476_v11  ;;  %506 = vmatprep.subr.bf16.mxu1 %v7476_v11  ;;  %v6717_v33 = vld [vmem:[%s10164_s1 + $0xc0] ss:$8 sps:$4 sm:$0xff]   ;;  %v7659_v49 = vld [vmem:[%s10164_s1 + $0x14] ss:$8 sps:$4 sm:$0xff]   ;;  %v7668_v52 = vld [vmem:[%s10164_s1 + $0x10] ss:$8 sps:$4 sm:$0xff]  }
  0x1d   : > { %566 = vrot.lane.b32.xlu0 %v7459_v7, %s7350_s15  ;;  %s7352_s15 = smov 16   ;;  %v6727_v37 = vld [vmem:[%s7444_s9 + $0xc] ss:$28 sps:$4 sm:$0xff]   ;;  %v7694_v58 = vld [vmem:[%s10164_s1 + $0x34] ss:$8 sps:$4 sm:$0xff]   ;;  %vm886_vm5 = vcmask 719872  }
  0x1e   : > { %649 = vrot.lane.b32.xlu1 %v6676_v8, %s7351_s28  ;;  %v6728_v38 = vld [vmem:[%s7444_s9 + $0xc] ss:$28 sps:$4 sm:$0xff]   ;;  %v7705_v62 = vld [vmem:[%s10164_s1 + $0x30] ss:$8 sps:$4 sm:$0xff]   ;;  %vm806_vm6 = vcmask 949248   ;;  %vm967_vm7 = vcmask 490496  }
  0x1f   : > { %436 = vmatpush1.bf16.msra.mxu0 %v7485_v12  ;;  %507 = vmatpush1.bf16.msra.mxu1 %v7485_v12  ;;  %v7640_v39 = vld [vmem:[%s7444_s9 + $0x8] ss:$28 sps:$4 sm:$0xff]   ;;  %vm1048_vm8 = vcmask 261120   ;;  %vm1129_vm9 = vcmask 31744   ;;  %s7365_s7 = smov 36   ;;  %s7366_s17 = smov 8  }
  0x20   : > { %437 = vmatprep.subr.bf16.mxu0 %v7491_v13  ;;  %508 = vmatprep.subr.bf16.mxu1 %v7491_v13  ;;  %v7643_v40 = vld [vmem:[%s7444_s9 + $0xc] ss:$28 sps:$4 sm:$0xff]   ;;  %vm1281_vm10 = vcmask 621568   ;;  %vm1201_vm11 = vcmask 850944   ;;  %vm1362_vm12 = vcmask 392192   ;;  %s7367_s12 = smov 108  }
  0x21   : > { %651 = vrot.lane.b32.xlu0 %v6714_v15, %s7351_s28  ;;  %v7652_v47 = vld [vmem:[%s10164_s1] ss:$8 sps:$4 sm:$0xff]   ;;  %v7675_v53 = vld [vmem:[%s10164_s1 + $0x24] ss:$8 sps:$4 sm:$0xff]   ;;  %v7817_v15 = vld [vmem:[%s10164_s1 + $0xb4] ss:$8 sps:$4 sm:$0xff]  }
  0x22   : > { %647 = vrot.lane.b32.xlu1 %v7459_v7, %s7351_s28  ;;  %v7687_v57 = vld [vmem:[%s10164_s1 + $0x20] ss:$8 sps:$4 sm:$0xff]   ;;  %v7712_v63 = vld [vmem:[%s10164_s1 + $0x44] ss:$8 sps:$4 sm:$0xff]   ;;  %s7368_s13 = smov 80   ;;  %vm1443_vm13 = vcmask 162816  }
  0x23   : > { %438 = vmatpush1.bf16.msra.mxu0 %v7498_v14  ;;  %509 = vmatpush1.bf16.msra.mxu1 %v7498_v14  ;;  %v7779_v9 = vld [vmem:[%s10164_s1 + $0x80] ss:$8 sps:$4 sm:$0xff]   ;;  %vm1595_vm14 = vcmask 752640   ;;  %vm1515_vm15 = vcmask 982016  }
  0x24   : > { %439 = vmatprep.subr.bf16.mxu0 %v7507_v16  ;;  %510 = vmatprep.subr.bf16.mxu1 %v7507_v16 }
  0x25   : > { %730 = vrot.lane.b32.xlu0 %v6676_v8, %s7352_s15  ;;  %v6732_v8 = vld [vmem:[%s7444_s9 + $0x10] ss:$28 sps:$4 sm:$0xff]  }
  0x26   : > { %732 = vrot.lane.b32.xlu1 %v6720_v18, %s7352_s15 }
  0x27   : > { %440 = vmatpush1.bf16.msra.mxu0 %v7513_v17  ;;  %511 = vmatpush1.bf16.msra.mxu1 %v7513_v17 }
  0x28   : > { %441 = vmatprep.subr.bf16.mxu0 %v7523_v19  ;;  %512 = vmatprep.subr.bf16.mxu1 %v7523_v19 }
  0x29   : > { %728 = vrot.lane.b32.xlu0 %v7459_v7, %s7352_s15  ;;  %s7360_s15 = smov 48  }
  0x2a   : > { %802 = vrot.lane.b32.xlu1 %v7532_v21, %s7353_s22 }
  0x2b   : > { %442 = vmatpush1.bf16.msra.mxu0 %v7528_v20  ;;  %513 = vmatpush1.bf16.msra.mxu1 %v7528_v20 }
  0x2c   : > { %443 = vmatprep.subr.bf16.mxu0 %v7537_v22  ;;  %514 = vmatprep.subr.bf16.mxu1 %v7537_v22 }
  0x2d   : > { %804 = vrot.lane.b32.xlu0 %v7543_v23, %s7353_s22  ;;  %s7357_s22 = smov 4  }
  0x2e   : > { %882 = vrot.lane.b32.xlu1 %v7543_v23, %s7354_s27 }
  0x2f   : > { %444 = vmatpush1.bf16.msra.mxu0 %v7548_v24  ;;  %515 = vmatpush1.bf16.msra.mxu1 %v7548_v24 }
  0x30   : > { %445 = vmatprep.subr.bf16.mxu0 %v7554_v25  ;;  %516 = vmatprep.subr.bf16.mxu1 %v7554_v25 }
  0x31   : > { %884 = vrot.lane.b32.xlu0 %v6725_v26, %s7354_s27 }
  0x32   : > { %880 = vrot.lane.b32.xlu1 %v7532_v21, %s7354_s27 }
  0x33   : > { %446 = vmatpush1.bf16.msra.mxu0 %v7565_v27  ;;  %517 = vmatpush1.bf16.msra.mxu1 %v7565_v27 }
  0x34   : > { %447 = vmatprep.subr.bf16.mxu0 %v7571_v28  ;;  %518 = vmatprep.subr.bf16.mxu1 %v7571_v28 }
  0x35   : > { %963 = vrot.lane.b32.xlu0 %v7543_v23, %s7355_s14 }
  0x36   : > { %965 = vrot.lane.b32.xlu1 %v6726_v35, %s7355_s14 }
  0x37   : > { %448 = vmatpush1.bf16.msra.mxu0 %v6710_v29  ;;  %519 = vmatpush1.bf16.msra.mxu1 %v6710_v29 }
  0x38   : > { %449 = vmatprep.subr.bf16.mxu0 %v6711_v30  ;;  %520 = vmatprep.subr.bf16.mxu1 %v6711_v30 }
  0x39   : > { %961 = vrot.lane.b32.xlu0 %v7532_v21, %s7355_s14  ;;  %s7361_s14 = smov 20  }
  0x3a   : > { %1044 = vrot.lane.b32.xlu1 %v7543_v23, %s7356_s21 }
  0x3b   : > { %450 = vmatpush1.bf16.msra.mxu0 %v6713_v31  ;;  %521 = vmatpush1.bf16.msra.mxu1 %v6713_v31 }
  0x3c   : > { %451 = vmatprep.subr.bf16.mxu0 %v6715_v32  ;;  %522 = vmatprep.subr.bf16.mxu1 %v6715_v32 }
  0x3d   : > { %1046 = vrot.lane.b32.xlu0 %v6727_v37, %s7356_s21 }
  0x3e   : > { %1042 = vrot.lane.b32.xlu1 %v7532_v21, %s7356_s21 }
  0x3f   : > { %452 = vmatpush1.bf16.msra.mxu0 %v6717_v33  ;;  %523 = vmatpush1.bf16.msra.mxu1 %v6717_v33 }
  0x40   : > { %453 = vmatprep.subr.bf16.mxu0 %v6718_v34  ;;  %524 = vmatprep.subr.bf16.mxu1 %v6718_v34 }
  0x41   : > { %1125 = vrot.lane.b32.xlu0 %v7543_v23, %s7357_s22 }
  0x42   : > { %1127 = vrot.lane.b32.xlu1 %v6728_v38, %s7357_s22 }
  0x43   : > { %454 = vmatpush1.bf16.msra.mxu0 %v6721_v36  ;;  %525 = vmatpush1.bf16.msra.mxu1 %v6721_v36 }
  0x44   : > { %579 = vmatprep.subr.bf16.mxu0 %v7410_v0  ;;  %660 = vmatprep.subr.bf16.mxu1 %v7410_v0 }
  0x45   : > { %1123 = vrot.lane.b32.xlu0 %v7532_v21, %s7357_s22  ;;  %s7363_s22 = smov 92  }
  0x46   : > { %460 = vmatmul.mubr.bf16.vlgmr.msra.gmra.mrb[0].mxu0 %v7459_v7  ;;  %1197 = vrot.lane.b32.xlu1 %v7640_v39, %s7358_s23  ;;  %v7770_v7 = vld [vmem:[%s10164_s1 + $0x84] ss:$8 sps:$4 sm:$0xff]  }
  0x47   : > { %580 = vmatpush1.bf16.msra.mxu0 %v7415_v1  ;;  %v7727_v1 = vld [vmem:[%s10164_s1 + $0x54] ss:$8 sps:$4 sm:$0xff]  }
  0x48   : > { %581 = vmatprep.subr.bf16.mxu0 %v7421_v2  ;;  %v7734_v2 = vld [vmem:[%s10164_s1 + $0x50] ss:$8 sps:$4 sm:$0xff]  }
  0x49   : > { %1199 = vrot.lane.b32.xlu0 %v7643_v40, %s7358_s23  ;;  %s7364_s23 = smov 64  }
  0x4a   : > { %1277 = vrot.lane.b32.xlu1 %v7643_v40, %s7359_s30 }
  0x4b   : > { %582 = vmatpush1.bf16.msra.mxu0 %v7430_v3  ;;  %v7741_v3 = vld [vmem:[%s10164_s1 + $0x64] ss:$8 sps:$4 sm:$0xff]  }
  0x4c   : > { %583 = vmatprep.subr.bf16.mxu0 %v7437_v4  ;;  %v7748_v4 = vld [vmem:[%s10164_s1 + $0x60] ss:$8 sps:$4 sm:$0xff]  }
  0x4d   : > { %1279 = vrot.lane.b32.xlu0 %v6732_v8, %s7359_s30 }
  0x4e   : > { %1275 = vrot.lane.b32.xlu1 %v7640_v39, %s7359_s30  ;;  %s5737_s30 = sshll.u32 %s10216_s20, 3 }
  0x4f   : > { %584 = vmatpush1.bf16.msra.mxu0 %v7450_v5  ;;  %v7755_v5 = vld [vmem:[%s10164_s1 + $0x74] ss:$8 sps:$4 sm:$0xff]   ;;  %s229_s8 = scalar_lea.vmem %s10168_s5, %s5737_s30 }
  0x50   : > { %585 = vmatprep.subr.bf16.mxu0 %v7455_v6  ;;  %v7763_v6 = vld [vmem:[%s10164_s1 + $0x70] ss:$8 sps:$4 sm:$0xff]  }
  0x51   : > { %1358 = vrot.lane.b32.xlu0 %v7643_v40, %s7360_s15 }
  0x53   : > { %586 = vmatpush1.bf16.msra.mxu0 %v7470_v10  ;;  %v7786_v10 = vld [vmem:[%s10164_s1 + $0x94] ss:$8 sps:$4 sm:$0xff]  }
  0x54   : > { %587 = vmatprep.subr.bf16.mxu0 %v7476_v11  ;;  %v7794_v11 = vld [vmem:[%s10164_s1 + $0x90] ss:$8 sps:$4 sm:$0xff]  }
  0x55   : > { %1356 = vrot.lane.b32.xlu0 %v7640_v39, %s7360_s15 }
  0x57   : > { %588 = vmatpush1.bf16.msra.mxu0 %v7485_v12  ;;  %v6733_v12 = vld [vmem:[%s7444_s9 + $0x10] ss:$28 sps:$4 sm:$0xff]  }
  0x58   : > { %589 = vmatprep.subr.bf16.mxu0 %v7491_v13  ;;  %v7802_v13 = vld [vmem:[%s10164_s1 + $0xa4] ss:$8 sps:$4 sm:$0xff]   ;;  %1360 = vrot.lane.b32.xlu1 %v6733_v12, %s7360_s15  ;;  %s7362_s15 = smov 120   ;;  %v8083_v12 = vld [vmem:[%s10164_s1 + $0x10] ss:$8 sps:$4 sm:$0xff]  }
  0x5b   : > { %590 = vmatpush1.bf16.msra.mxu0 %v7498_v14  ;;  %v7810_v14 = vld [vmem:[%s10164_s1 + $0xa0] ss:$8 sps:$4 sm:$0xff]  }
  0x5c   : > { %591 = vmatprep.subr.bf16.mxu0 %v7507_v16  ;;  %v7824_v16 = vld [vmem:[%s10164_s1 + $0xb0] ss:$8 sps:$4 sm:$0xff]   ;;  %1439 = vrot.lane.b32.xlu1 %v7643_v40, %s7361_s14 }
  0x5f   : > { %592 = vmatpush1.bf16.msra.mxu0 %v7513_v17  ;;  %v7831_v17 = vld [vmem:[%s10164_s1 + $0xc4] ss:$8 sps:$4 sm:$0xff]  }
  0x60   : > { %593 = vmatprep.subr.bf16.mxu0 %v7523_v19  ;;  %v7838_v19 = vld [vmem:[%s10164_s1 + $0xc0] ss:$8 sps:$4 sm:$0xff]   ;;  %1437 = vrot.lane.b32.xlu1 %v7640_v39, %s7361_s14 }
  0x63   : > { %594 = vmatpush1.bf16.msra.mxu0 %v7528_v20  ;;  %v7845_v20 = vld [vmem:[%s10164_s1 + $0xd4] ss:$8 sps:$4 sm:$0xff]  }
  0x64   : > { %595 = vmatprep.subr.bf16.mxu0 %v7537_v22  ;;  %v7854_v22 = vld [vmem:[%s10164_s1 + $0xd0] ss:$8 sps:$4 sm:$0xff]  }
  0x67   : > { %596 = vmatpush1.bf16.msra.mxu0 %v7548_v24  ;;  %v7864_v24 = vld [vmem:[%s10164_s1 + $0x4] ss:$8 sps:$4 sm:$0xff]  }
  0x68   : > { %597 = vmatprep.subr.bf16.mxu0 %v7554_v25 }
  0x6b   : > { %598 = vmatpush1.bf16.msra.mxu0 %v7565_v27 }
  0x6c   : > { %599 = vmatprep.subr.bf16.mxu0 %v7571_v28 }
  0x6f   : > { %600 = vmatpush1.bf16.msra.mxu0 %v6710_v29 }
  0x70   : > { %601 = vmatprep.subr.bf16.mxu0 %v6711_v30  ;;  %v264_v30 = vlaneseq }
  0x73   : > { %602 = vmatpush1.bf16.msra.mxu0 %v6713_v31  ;;  %v6734_v31 = vld [vmem:[%s7444_s9 + $0x10] ss:$28 sps:$4 sm:$0xff]  }
  0x74   : > { %603 = vmatprep.subr.bf16.mxu0 %v6715_v32  ;;  %v7917_v32 = vshrl.u32 %v264_v30, 7  ;;  %1441 = vrot.lane.b32.xlu0 %v6734_v31, %s7361_s14  ;;  %v6741_v30 = vld [vmem:[%s7444_s9 + $0x14] ss:$28 sps:$4 sm:$0xff]   ;;  %v8208_v31 = vld [vmem:[%s10164_s1 + $0xa4] ss:$8 sps:$4 sm:$0xff]  }
  0x76   : > { %v266_v35 = vsub.s32 0, %v7917_v32 }
  0x77   : > { %604 = vmatpush1.bf16.msra.mxu0 %v6717_v33  ;;  %v7925_v33 = vld [vmem:[%s7444_s9 + $0x10] ss:$28 sps:$4 sm:$0xff]  }
  0x78   : > { %605 = vmatprep.subr.bf16.mxu0 %v6718_v34  ;;  %v7928_v34 = vld [vmem:[%s7444_s9 + $0xc] ss:$28 sps:$4 sm:$0xff]   ;;  %1513 = vrot.lane.b32.xlu1 %v7925_v33, %s7362_s15 }
  0x79   : > { %1511 = vrot.lane.b32.xlu0 %v7928_v34, %s7362_s15 }
  0x7b   : > { %606 = vmatpush1.bf16.msra.mxu0 %v6721_v36  ;;  %v270_v36 = vsub.s32 1, %v7917_v32  ;;  %v8216_v32 = vld [vmem:[%s10164_s1 + $0xa0] ss:$8 sps:$4 sm:$0xff]  }
  0x7c   : > { %741 = vmatprep.subr.bf16.mxu0 %v7410_v0  ;;  %v7720_v0 = vld [vmem:[%s10164_s1 + $0x40] ss:$8 sps:$4 sm:$0xff]  }
  0x7d   : > { %1591 = vrot.lane.b32.xlu0 %v7925_v33, %s7363_s22 }
  0x81   : > { %1589 = vrot.lane.b32.xlu0 %v7928_v34, %s7363_s22 }
  0x87   : > { %v489_v41 = vpop.permute.xlu0 %488 }
  0x88   : > { %v569_v42 = vpop.permute.xlu1 %568 }
  0x8b   : > { %v491_v43 = vpop.permute.xlu0 %490 }
  0x8c   : > { %5771 = vmatprep.mubr.msk.bf16.mxu1 %vm423_vm0, %v491_v43  ;;  %v493_v44 = vsel %vm492_vm1, %v489_v41, %v491_v43  ;;  %v571_v45 = vpop.permute.xlu1 %570  ;;  %vm1676_vm1 = vcmask 523264  }
  0x8d   : > { %531 = vmatmul.mubr.bf16.vlgmr.msra.gmra.mrb[0].mxu1 %v493_v44  ;;  %v574_v46 = vsel %vm572_vm2, %v569_v42, %v571_v45 }
  0x8e   : > { %661 = vmatpush1.bf16.msra.mxu1 %v7652_v47  ;;  %5775 = vmatprep.mubr.msk.bf16.mxu0 %vm423_vm0, %v574_v46 }
  0x8f   : > { %v567_v48 = vpop.permute.xlu0 %566  ;;  %662 = vmatprep.subr.bf16.mxu1 %v7659_v49 }
  0x90   : > { %v573_v50 = vsel %vm572_vm2, %v567_v48, %v569_v42  ;;  %v7663_v51 = vpop.permute.xlu1 %649  ;;  %v260_v48 = vld [vmem:[%s10165_s2] sm:$0x3]  ;;  %vm1757_vm2 = vcmask 293888  }
  0x91   : > { %612 = vmatmul.mubr.bf16.vlgmr.msra.gmra.mrb[4].mxu0 %v573_v50  ;;  %v8003_v50 = vrot.slane %v260_v48, %v270_v36 }
  0x92   : > { %663 = vmatpush1.bf16.msra.mxu1 %v7668_v52  ;;  %742 = vmatpush1.bf16.msra.mxu0 %v7652_v47 }
  0x93   : > { %664 = vmatprep.subr.bf16.mxu1 %v7675_v53  ;;  %743 = vmatprep.subr.bf16.mxu0 %v7659_v49  ;;  %v652_v54 = vpop.permute.xlu0 %651 }
  0x94   : > { %v7679_v55 = vpop.permute.xlu1 %647  ;;  %v655_v56 = vsel %vm653_vm3, %v7663_v51, %v652_v54 }
  0x95   : > { %5779 = vmatprep.mubr.msk.bf16.mxu1 %vm423_vm0, %v655_v56  ;;  %v654_v25 = vsel %vm653_vm3, %v7679_v55, %v7663_v51  ;;  %vm1838_vm3 = vcmask 64512  }
  0x96   : > { %665 = vmatpush1.bf16.msra.mxu1 %v7687_v57  ;;  %744 = vmatpush1.bf16.msra.mxu0 %v7668_v52 }
  0x97   : > { %666 = vmatprep.subr.bf16.mxu1 %v7694_v58  ;;  %745 = vmatprep.subr.bf16.mxu0 %v7675_v53  ;;  %v7698_v59 = vpop.permute.xlu0 %730 }
  0x98   : > { %v733_v60 = vpop.permute.xlu1 %732 }
  0x99   : > { %v736_v61 = vsel %vm734_vm4, %v7698_v59, %v733_v60  ;;  %v6739_v60 = vld [vmem:[%s7444_s9 + $0x14] ss:$28 sps:$4 sm:$0xff]  }
  0x9a   : > { %667 = vmatpush1.bf16.msra.mxu1 %v7705_v62  ;;  %746 = vmatpush1.bf16.msra.mxu0 %v7687_v57 }
  0x9b   : > { %668 = vmatprep.subr.bf16.mxu1 %v7712_v63  ;;  %747 = vmatprep.subr.bf16.mxu0 %v7694_v58  ;;  %v729_v18 = vpop.permute.xlu0 %728 }
  0x9c   : > { %5783 = vmatprep.mubr.msk.bf16.mxu0 %vm423_vm0, %v736_v61  ;;  %v7858_v23 = vpop.permute.xlu1 %802  ;;  %v735_v26 = vsel %vm734_vm4, %v729_v18, %v7698_v59  ;;  %v6738_v59 = vld [vmem:[%s7444_s9 + $0x14] ss:$28 sps:$4 sm:$0xff]   ;;  %1674 = vrot.lane.b32.xlu0 %v6739_v60, %s7364_s23  ;;  %v8127_v18 = vld [vmem:[%s10164_s1 + $0x40] ss:$8 sps:$4 sm:$0xff]   ;;  %vm1990_vm4 = vcmask 654336  }
  0x9d   : > { %1593 = vrot.lane.b32.xlu1 %v6738_v59, %s7363_s22  ;;  %v8269_v59 = vld [vmem:[%s10164_s1 + $0xd0] ss:$8 sps:$4 sm:$0xff]  }
  0x9e   : > { %669 = vmatpush1.bf16.msra.mxu1 %v7720_v0  ;;  %748 = vmatpush1.bf16.msra.mxu0 %v7705_v62 }
  0x9f   : > { %670 = vmatprep.subr.bf16.mxu1 %v7727_v1  ;;  %749 = vmatprep.subr.bf16.mxu0 %v7712_v63  ;;  %v7849_v21 = vpop.permute.xlu0 %804 }
  0xa0   : > { %v7876_v28 = vpop.permute.xlu1 %882  ;;  %v807_v39 = vsel %vm806_vm6, %v7858_v23, %v7849_v21  ;;  %v8162_v23 = vld [vmem:[%s10164_s1 + $0x74] ss:$8 sps:$4 sm:$0xff]   ;;  %1753 = vrot.lane.b32.xlu0 %v7925_v33, %s7365_s7 }
  0xa1   : > { %1672 = vrot.lane.b32.xlu1 %v7925_v33, %s7364_s23 }
  0xa2   : > { %671 = vmatpush1.bf16.msra.mxu1 %v7734_v2  ;;  %750 = vmatpush1.bf16.msra.mxu0 %v7720_v0 }
  0xa3   : > { %672 = vmatprep.subr.bf16.mxu1 %v7741_v3  ;;  %751 = vmatprep.subr.bf16.mxu0 %v7727_v1  ;;  %v885_v27 = vpop.permute.xlu0 %884 }
  0xa4   : > { %v888_v29 = vsel %vm886_vm5, %v7876_v28, %v885_v27  ;;  %v881_v38 = vpop.permute.xlu1 %880  ;;  %v8185_v27 = vld [vmem:[%s10164_s1 + $0x80] ss:$8 sps:$4 sm:$0xff]   ;;  %1751 = vrot.lane.b32.xlu0 %v7928_v34, %s7365_s7 }
  0xa5   : > { %v887_v43 = vsel %vm886_vm5, %v881_v38, %v7876_v28  ;;  %1670 = vrot.lane.b32.xlu1 %v7928_v34, %s7364_s23  ;;  %v8192_v28 = vld [vmem:[%s10164_s1 + $0x94] ss:$8 sps:$4 sm:$0xff]   ;;  %vm5646_vm5 = vcmask 80896  }
  0xa6   : > { %673 = vmatpush1.bf16.msra.mxu1 %v7748_v4  ;;  %752 = vmatpush1.bf16.msra.mxu0 %v7734_v2 }
  0xa7   : > { %674 = vmatprep.subr.bf16.mxu1 %v7755_v5  ;;  %753 = vmatprep.subr.bf16.mxu0 %v7741_v3  ;;  %v7942_v37 = vpop.permute.xlu0 %963 }
  0xa8   : > { %v966_v40 = vpop.permute.xlu1 %965  ;;  %1836 = vrot.lane.b32.xlu0 %v6741_v30, %s7366_s17 }
  0xa9   : > { %v969_v42 = vsel %vm967_vm7, %v7942_v37, %v966_v40  ;;  %v8233_v40 = vld [vmem:[%s10164_s1 + $0xb0] ss:$8 sps:$4 sm:$0xff]  }
  0xaa   : > { %675 = vmatpush1.bf16.msra.mxu1 %v7763_v6  ;;  %754 = vmatpush1.bf16.msra.mxu0 %v7748_v4 }
  0xab   : > { %676 = vmatprep.subr.bf16.mxu1 %v7770_v7  ;;  %755 = vmatprep.subr.bf16.mxu0 %v7755_v5  ;;  %v7953_v41 = vpop.permute.xlu0 %961 }
  0xac   : > { %v7966_v45 = vpop.permute.xlu1 %1044 }
  0xae   : > { %677 = vmatpush1.bf16.msra.mxu1 %v7779_v9  ;;  %756 = vmatpush1.bf16.msra.mxu0 %v7763_v6 }
  0xaf   : > { %678 = vmatprep.subr.bf16.mxu1 %v7786_v10  ;;  %757 = vmatprep.subr.bf16.mxu0 %v7770_v7  ;;  %v1047_v44 = vpop.permute.xlu0 %1046 }
  0xb0   : > { %v1050_v46 = vsel %vm1048_vm8, %v7966_v45, %v1047_v44 }
  0xb2   : > { %679 = vmatpush1.bf16.msra.mxu1 %v7794_v11  ;;  %758 = vmatpush1.bf16.msra.mxu0 %v7779_v9 }
  0xb3   : > { %680 = vmatprep.subr.bf16.mxu1 %v7802_v13  ;;  %759 = vmatprep.subr.bf16.mxu0 %v7786_v10 }
  0xb6   : > { %681 = vmatpush1.bf16.msra.mxu1 %v7810_v14  ;;  %760 = vmatpush1.bf16.msra.mxu0 %v7794_v11 }
  0xb7   : > { %682 = vmatprep.subr.bf16.mxu1 %v7817_v15  ;;  %761 = vmatprep.subr.bf16.mxu0 %v7802_v13 }
  0xba   : > { %683 = vmatpush1.bf16.msra.mxu1 %v7824_v16  ;;  %762 = vmatpush1.bf16.msra.mxu0 %v7810_v14 }
  0xbb   : > { %684 = vmatprep.subr.bf16.mxu1 %v7831_v17  ;;  %763 = vmatprep.subr.bf16.mxu0 %v7817_v15 }
  0xbe   : > { %685 = vmatpush1.bf16.msra.mxu1 %v7838_v19  ;;  %764 = vmatpush1.bf16.msra.mxu0 %v7824_v16 }
  0xbf   : > { %686 = vmatprep.subr.bf16.mxu1 %v7845_v20  ;;  %765 = vmatprep.subr.bf16.mxu0 %v7831_v17 }
  0xc2   : > { %687 = vmatpush1.bf16.msra.mxu1 %v7854_v22  ;;  %766 = vmatpush1.bf16.msra.mxu0 %v7838_v19 }
  0xc3   : > { %767 = vmatprep.subr.bf16.mxu0 %v7845_v20  ;;  %812 = vmatprep.subr.bf16.mxu1 %v7864_v24 }
  0xc5   : > { %693 = vmatmul.mubr.bf16.vlgmr.msra.gmra.mrb[4].mxu1 %v654_v25  ;;  %v8176_v25 = vld [vmem:[%s10164_s1 + $0x84] ss:$8 sps:$4 sm:$0xff]  }
  0xc6   : > { %768 = vmatpush1.bf16.msra.mxu0 %v7854_v22  ;;  %813 = vmatpush1.bf16.msra.mxu1 %v7652_v47 }
  0xc7   : > { %814 = vmatprep.subr.bf16.mxu1 %v7659_v49  ;;  %893 = vmatprep.subr.bf16.mxu0 %v7864_v24 }
  0xc8   : > { %5786 = vmatprep.mubr.msk.bf16.mxu1 %vm423_vm0, %v7849_v21  ;;  %v8148_v21 = vld [vmem:[%s10164_s1 + $0x64] ss:$8 sps:$4 sm:$0xff]  }
  0xc9   : > { %774 = vmatmul.mubr.bf16.vlgmr.msra.gmra.mrb[8].mxu0 %v735_v26  ;;  %v6740_v26 = vld [vmem:[%s7444_s9 + $0x14] ss:$28 sps:$4 sm:$0xff]  }
  0xca   : > { %815 = vmatpush1.bf16.msra.mxu1 %v7668_v52  ;;  %894 = vmatpush1.bf16.msra.mxu0 %v7652_v47 }
  0xcb   : > { %816 = vmatprep.subr.bf16.mxu1 %v7675_v53  ;;  %895 = vmatprep.subr.bf16.mxu0 %v7659_v49 }
  0xcc   : > { %5790 = vmatprep.mubr.msk.bf16.mxu0 %vm423_vm0, %v888_v29  ;;  %1755 = vrot.lane.b32.xlu1 %v6740_v26, %s7365_s7  ;;  %v8200_v29 = vld [vmem:[%s10164_s1 + $0x90] ss:$8 sps:$4 sm:$0xff]  }
  0xce   : > { %817 = vmatpush1.bf16.msra.mxu1 %v7687_v57  ;;  %896 = vmatpush1.bf16.msra.mxu0 %v7668_v52 }
  0xcf   : > { %818 = vmatprep.subr.bf16.mxu1 %v7694_v58  ;;  %897 = vmatprep.subr.bf16.mxu0 %v7675_v53 }
  0xd0   : > { %1834 = vrot.lane.b32.xlu1 %v7925_v33, %s7366_s17 }
  0xd2   : > { %819 = vmatpush1.bf16.msra.mxu1 %v7705_v62  ;;  %898 = vmatpush1.bf16.msra.mxu0 %v7687_v57 }
  0xd3   : > { %820 = vmatprep.subr.bf16.mxu1 %v7712_v63  ;;  %899 = vmatprep.subr.bf16.mxu0 %v7694_v58 }
  0xd4   : > { %1832 = vrot.lane.b32.xlu1 %v7928_v34, %s7366_s17  ;;  %v8241_v34 = vld [vmem:[%s10164_s1 + $0xc4] ss:$8 sps:$4 sm:$0xff]  }
  0xd6   : > { %821 = vmatpush1.bf16.msra.mxu1 %v7720_v0  ;;  %900 = vmatpush1.bf16.msra.mxu0 %v7705_v62 }
  0xd7   : > { %822 = vmatprep.subr.bf16.mxu1 %v7727_v1  ;;  %901 = vmatprep.subr.bf16.mxu0 %v7712_v63 }
  0xda   : > { %823 = vmatpush1.bf16.msra.mxu1 %v7734_v2  ;;  %902 = vmatpush1.bf16.msra.mxu0 %v7720_v0 }
  0xdb   : > { %824 = vmatprep.subr.bf16.mxu1 %v7741_v3  ;;  %903 = vmatprep.subr.bf16.mxu0 %v7727_v1 }
  0xde   : > { %825 = vmatpush1.bf16.msra.mxu1 %v7748_v4  ;;  %904 = vmatpush1.bf16.msra.mxu0 %v7734_v2 }
  0xdf   : > { %826 = vmatprep.subr.bf16.mxu1 %v7755_v5  ;;  %905 = vmatprep.subr.bf16.mxu0 %v7741_v3 }
  0xe2   : > { %827 = vmatpush1.bf16.msra.mxu1 %v7763_v6  ;;  %906 = vmatpush1.bf16.msra.mxu0 %v7748_v4 }
  0xe3   : > { %828 = vmatprep.subr.bf16.mxu1 %v7770_v7  ;;  %907 = vmatprep.subr.bf16.mxu0 %v7755_v5 }
  0xe6   : > { %829 = vmatpush1.bf16.msra.mxu1 %v7779_v9  ;;  %908 = vmatpush1.bf16.msra.mxu0 %v7763_v6 }
  0xe7   : > { %830 = vmatprep.subr.bf16.mxu1 %v7786_v10  ;;  %909 = vmatprep.subr.bf16.mxu0 %v7770_v7 }
  0xea   : > { %831 = vmatpush1.bf16.msra.mxu1 %v7794_v11  ;;  %910 = vmatpush1.bf16.msra.mxu0 %v7779_v9 }
  0xeb   : > { %832 = vmatprep.subr.bf16.mxu1 %v7802_v13  ;;  %911 = vmatprep.subr.bf16.mxu0 %v7786_v10 }
  0xee   : > { %833 = vmatpush1.bf16.msra.mxu1 %v7810_v14  ;;  %912 = vmatpush1.bf16.msra.mxu0 %v7794_v11 }
  0xef   : > { %834 = vmatprep.subr.bf16.mxu1 %v7817_v15  ;;  %913 = vmatprep.subr.bf16.mxu0 %v7802_v13 }
  0xf2   : > { %835 = vmatpush1.bf16.msra.mxu1 %v7824_v16  ;;  %914 = vmatpush1.bf16.msra.mxu0 %v7810_v14 }
  0xf3   : > { %836 = vmatprep.subr.bf16.mxu1 %v7831_v17  ;;  %915 = vmatprep.subr.bf16.mxu0 %v7817_v15 }
  0xf6   : > { %837 = vmatpush1.bf16.msra.mxu1 %v7838_v19  ;;  %916 = vmatpush1.bf16.msra.mxu0 %v7824_v16 }
  0xf7   : > { %838 = vmatprep.subr.bf16.mxu1 %v7845_v20  ;;  %917 = vmatprep.subr.bf16.mxu0 %v7831_v17 }
  0xfa   : > { %839 = vmatpush1.bf16.msra.mxu1 %v7854_v22  ;;  %918 = vmatpush1.bf16.msra.mxu0 %v7838_v19 }
  0xfb   : > { %919 = vmatprep.subr.bf16.mxu0 %v7845_v20  ;;  %974 = vmatprep.subr.bf16.mxu1 %v7864_v24 }
  0xfd   : > { %845 = vmatmul.mubr.bf16.vlgmr.msra.gmra.mrb[8].mxu1 %v807_v39 }
  0xfe   : > { %920 = vmatpush1.bf16.msra.mxu0 %v7854_v22  ;;  %975 = vmatpush1.bf16.msra.mxu1 %v7652_v47  ;;  %v7974_v47 = vld [vmem:[%s10164_s1] ss:$8 sps:$4 sm:$0xff]  }
  0xff   : > { %976 = vmatprep.subr.bf16.mxu1 %v7659_v49  ;;  %1055 = vmatprep.subr.bf16.mxu0 %v7864_v24 }
 0x100   : > { %5794 = vmatprep.mubr.msk.bf16.mxu1 %vm423_vm0, %v969_v42 }
 0x101   : > { %926 = vmatmul.mubr.bf16.vlgmr.msra.gmra.mrb[12].mxu0 %v887_v43 }
 0x102   : > { %977 = vmatpush1.bf16.msra.mxu1 %v7668_v52  ;;  %1056 = vmatpush1.bf16.msra.mxu0 %v7974_v47 }
 0x103   : > { %978 = vmatprep.subr.bf16.mxu1 %v7675_v53  ;;  %1057 = vmatprep.subr.bf16.mxu0 %v7659_v49  ;;  %v7999_v49 = vrot.slane %v260_v48, %v266_v35  ;;  %v8223_v35 = vld [vmem:[%s10164_s1 + $0xb4] ss:$8 sps:$4 sm:$0xff]  }
 0x104   : > { %5798 = vmatprep.mubr.msk.bf16.mxu0 %vm423_vm0, %v1050_v46 }
 0x106   : > { %979 = vmatpush1.bf16.msra.mxu1 %v7687_v57  ;;  %1058 = vmatpush1.bf16.msra.mxu0 %v7668_v52 }
 0x107   : > { %980 = vmatprep.subr.bf16.mxu1 %v7694_v58  ;;  %1059 = vmatprep.subr.bf16.mxu0 %v7675_v53 }
 0x10a   : > { %981 = vmatpush1.bf16.msra.mxu1 %v7705_v62  ;;  %1060 = vmatpush1.bf16.msra.mxu0 %v7687_v57 }
 0x10b   : > { %982 = vmatprep.subr.bf16.mxu1 %v7712_v63  ;;  %1061 = vmatprep.subr.bf16.mxu0 %v7694_v58 }
 0x10e   : > { %983 = vmatpush1.bf16.msra.mxu1 %v7720_v0  ;;  %1062 = vmatpush1.bf16.msra.mxu0 %v7705_v62 }
 0x10f   : > { %984 = vmatprep.subr.bf16.mxu1 %v7727_v1  ;;  %1063 = vmatprep.subr.bf16.mxu0 %v7712_v63 }
 0x112   : > { %985 = vmatpush1.bf16.msra.mxu1 %v7734_v2  ;;  %1064 = vmatpush1.bf16.msra.mxu0 %v7720_v0 }
 0x113   : > { %986 = vmatprep.subr.bf16.mxu1 %v7741_v3  ;;  %1065 = vmatprep.subr.bf16.mxu0 %v7727_v1 }
 0x116   : > { %987 = vmatpush1.bf16.msra.mxu1 %v7748_v4  ;;  %1066 = vmatpush1.bf16.msra.mxu0 %v7734_v2 }
 0x117   : > { %988 = vmatprep.subr.bf16.mxu1 %v7755_v5  ;;  %1067 = vmatprep.subr.bf16.mxu0 %v7741_v3  ;;  %v1043_v3 = vpop.permute.xlu1 %1042 }
 0x119   : > { %v461_v51 = vpop.f32.mrb[0].mxu0 }
 0x11a   : > { %v462_v52 = vadd.f32 %v461_v51, %v7999_v49  ;;  %v463_v53 = vpop.f32.mrb[1].mxu0  ;;  %989 = vmatpush1.bf16.msra.mxu1 %v7763_v6  ;;  %1068 = vmatpush1.bf16.msra.mxu0 %v7748_v4  ;;  %v8053_v4 = vpop.permute.xlu0 %1125 }
 0x11b   : > { %v464_v54 = vadd.f32 %v463_v53, %v8003_v50  ;;  %v465_v55 = vpop.f32.mrb[2].mxu0  ;;  %990 = vmatprep.subr.bf16.mxu1 %v7770_v7  ;;  %1069 = vmatprep.subr.bf16.mxu0 %v7755_v5  ;;  %v1128_v5 = vpop.permute.xlu1 %1127 }
 0x11c   : > { %7082 = vtanh.f32 %v462_v52  ;;  %v466_v56 = vadd.f32 %v465_v55, %v7999_v49  ;;  %v467_v57 = vpop.f32.mrb[3].mxu0  ;;  %v8252_v52 = vld [vmem:[%s10164_s1 + $0xc0] ss:$8 sps:$4 sm:$0xff]   ;;  %v8260_v55 = vld [vmem:[%s10164_s1 + $0xd4] ss:$8 sps:$4 sm:$0xff]  }
 0x11d   : > { %7084 = vtanh.f32 %v464_v54  ;;  %v468_v58 = vadd.f32 %v467_v57, %v8003_v50 }
 0x11e   : > { %7086 = vtanh.f32 %v466_v56  ;;  %991 = vmatpush1.bf16.msra.mxu1 %v7779_v9  ;;  %1070 = vmatpush1.bf16.msra.mxu0 %v7763_v6  ;;  %v968_v6 = vsel %vm967_vm7, %v7953_v41, %v7942_v37  ;;  %v8064_v8 = vpop.permute.xlu0 %1123 }
 0x11f   : > { %7088 = vtanh.f32 %v468_v58  ;;  %992 = vmatprep.subr.bf16.mxu1 %v7786_v10  ;;  %1071 = vmatprep.subr.bf16.mxu0 %v7770_v7  ;;  %v1131_v7 = vsel %vm1129_vm9, %v8053_v4, %v1128_v5  ;;  %v1198_v36 = vpop.permute.xlu1 %1197  ;;  %v8279_v5 = vld [vmem:[%s10164_s1 + $0x4] ss:$8 sps:$4 sm:$0xff]  }
 0x122   : > { %993 = vmatpush1.bf16.msra.mxu1 %v7794_v11  ;;  %1072 = vmatpush1.bf16.msra.mxu0 %v7779_v9  ;;  %v1049_v9 = vsel %vm1048_vm8, %v1043_v3, %v7966_v45 }
 0x123   : > { %994 = vmatprep.subr.bf16.mxu1 %v7802_v13  ;;  %1073 = vmatprep.subr.bf16.mxu0 %v7786_v10  ;;  %v8073_v10 = vld [vmem:[%s10164_s1 + $0x14] ss:$8 sps:$4 sm:$0xff]   ;;  %v8246_v46 = vpop.permute.xlu1 %1277 }
 0x126   : > { %v8028_v61 = vpop.eup %7082  ;;  %995 = vmatpush1.bf16.msra.mxu1 %v7810_v14  ;;  %1074 = vmatpush1.bf16.msra.mxu0 %v7794_v11  ;;  %v8078_v11 = vpop.permute.xlu0 %1199 }
 0x127   : > { %v8030_v62 = vpop.eup %7084  ;;  %996 = vmatprep.subr.bf16.mxu1 %v7817_v15  ;;  %1075 = vmatprep.subr.bf16.mxu0 %v7802_v13  ;;  %v8090_v13 = vld [vmem:[%s10164_s1 + $0x24] ss:$8 sps:$4 sm:$0xff]   ;;  %v8273_v60 = vpop.permute.xlu1 %1275  ;;  %v1202_v30 = vsel %vm1201_vm11, %v1198_v36, %v8078_v11 }
 0x128   : > { %v8034_v63 = vpop.eup %7086 }
 0x129   : > { %v8038_v0 = vpop.eup %7088 }
 0x12a   : > { %997 = vmatpush1.bf16.msra.mxu1 %v7824_v16  ;;  %1076 = vmatpush1.bf16.msra.mxu0 %v7810_v14  ;;  %v8099_v14 = vld [vmem:[%s10164_s1 + $0x20] ss:$8 sps:$4 sm:$0xff]   ;;  %v1280_v3 = vpop.permute.xlu0 %1279 }
 0x12b   : > { %998 = vmatprep.subr.bf16.mxu1 %v7831_v17  ;;  %1077 = vmatprep.subr.bf16.mxu0 %v7817_v15  ;;  %v8106_v15 = vld [vmem:[%s10164_s1 + $0x34] ss:$8 sps:$4 sm:$0xff]  }
 0x12e   : > { %999 = vmatpush1.bf16.msra.mxu1 %v7838_v19  ;;  %1078 = vmatpush1.bf16.msra.mxu0 %v7824_v16  ;;  %v8113_v16 = vld [vmem:[%s10164_s1 + $0x30] ss:$8 sps:$4 sm:$0xff]  }
 0x12f   : > { %1000 = vmatprep.subr.bf16.mxu1 %v7845_v20  ;;  %1079 = vmatprep.subr.bf16.mxu0 %v7831_v17  ;;  %v8120_v17 = vld [vmem:[%s10164_s1 + $0x44] ss:$8 sps:$4 sm:$0xff]  }
 0x132   : > { %1001 = vmatpush1.bf16.msra.mxu1 %v7854_v22  ;;  %1080 = vmatpush1.bf16.msra.mxu0 %v7838_v19  ;;  %v8134_v19 = vld [vmem:[%s10164_s1 + $0x54] ss:$8 sps:$4 sm:$0xff]  }
 0x133   : > { %1081 = vmatprep.subr.bf16.mxu0 %v7845_v20  ;;  %1136 = vmatprep.subr.bf16.mxu1 %v7864_v24  ;;  %v8141_v20 = vld [vmem:[%s10164_s1 + $0x50] ss:$8 sps:$4 sm:$0xff]  }
 0x135   : > { %1007 = vmatmul.mubr.bf16.vlgmr.msra.gmra.mrb[12].mxu1 %v968_v6  ;;  %v1130_v6 = vsel %vm1129_vm9, %v8064_v8, %v8053_v4  ;;  %v8301_v8 = vpop.permute.xlu0 %1358 }
 0x136   : > { %1082 = vmatpush1.bf16.msra.mxu0 %v7854_v22  ;;  %1137 = vmatpush1.bf16.msra.mxu1 %v7974_v47  ;;  %v8155_v22 = vld [vmem:[%s10164_s1 + $0x60] ss:$8 sps:$4 sm:$0xff]  }
 0x137   : > { %1138 = vmatprep.subr.bf16.mxu1 %v8073_v10  ;;  %1207 = vmatprep.subr.bf16.mxu0 %v7864_v24  ;;  %v8169_v24 = vld [vmem:[%s10164_s1 + $0x70] ss:$8 sps:$4 sm:$0xff]  }
 0x138   : > { %5802 = vmatprep.mubr.msk.bf16.mxu1 %vm423_vm0, %v1131_v7 }
 0x139   : > { %1088 = vmatmul.mubr.bf16.vlgmr.msra.gmra.mrb[16].mxu0 %v1049_v9  ;;  %v1283_v9 = vsel %vm1281_vm10, %v8246_v46, %v1280_v3 }
 0x13a   : > { %1139 = vmatpush1.bf16.msra.mxu1 %v8083_v12  ;;  %1208 = vmatpush1.bf16.msra.mxu0 %v7974_v47 }
 0x13b   : > { %1140 = vmatprep.subr.bf16.mxu1 %v8090_v13  ;;  %1209 = vmatprep.subr.bf16.mxu0 %v8073_v10 }
 0x13c   : > { %5805 = vmatprep.mubr.msk.bf16.mxu0 %vm423_vm0, %v8078_v11 }
 0x13e   : > { %1141 = vmatpush1.bf16.msra.mxu1 %v8099_v14  ;;  %1210 = vmatpush1.bf16.msra.mxu0 %v8083_v12 }
 0x13f   : > { %1142 = vmatprep.subr.bf16.mxu1 %v8106_v15  ;;  %1211 = vmatprep.subr.bf16.mxu0 %v8090_v13 }
 0x142   : > { %1143 = vmatpush1.bf16.msra.mxu1 %v8113_v16  ;;  %1212 = vmatpush1.bf16.msra.mxu0 %v8099_v14 }
 0x143   : > { %1144 = vmatprep.subr.bf16.mxu1 %v8120_v17  ;;  %1213 = vmatprep.subr.bf16.mxu0 %v8106_v15 }
 0x146   : > { %1145 = vmatpush1.bf16.msra.mxu1 %v8127_v18  ;;  %1214 = vmatpush1.bf16.msra.mxu0 %v8113_v16 }
 0x147   : > { %1146 = vmatprep.subr.bf16.mxu1 %v8134_v19  ;;  %1215 = vmatprep.subr.bf16.mxu0 %v8120_v17 }
 0x14a   : > { %1147 = vmatpush1.bf16.msra.mxu1 %v8141_v20  ;;  %1216 = vmatpush1.bf16.msra.mxu0 %v8127_v18 }
 0x14b   : > { %1148 = vmatprep.subr.bf16.mxu1 %v8148_v21  ;;  %1217 = vmatprep.subr.bf16.mxu0 %v8134_v19 }
 0x14e   : > { %1149 = vmatpush1.bf16.msra.mxu1 %v8155_v22  ;;  %1218 = vmatpush1.bf16.msra.mxu0 %v8141_v20 }
 0x14f   : > { %1150 = vmatprep.subr.bf16.mxu1 %v8162_v23  ;;  %1219 = vmatprep.subr.bf16.mxu0 %v8148_v21 }
 0x152   : > { %1151 = vmatpush1.bf16.msra.mxu1 %v8169_v24  ;;  %1220 = vmatpush1.bf16.msra.mxu0 %v8155_v22 }
 0x153   : > { %1152 = vmatprep.subr.bf16.mxu1 %v8176_v25  ;;  %1221 = vmatprep.subr.bf16.mxu0 %v8162_v23 }
 0x156   : > { %1153 = vmatpush1.bf16.msra.mxu1 %v8185_v27  ;;  %1222 = vmatpush1.bf16.msra.mxu0 %v8169_v24 }
 0x157   : > { %1154 = vmatprep.subr.bf16.mxu1 %v8192_v28  ;;  %1223 = vmatprep.subr.bf16.mxu0 %v8176_v25 }
 0x15a   : > { %1155 = vmatpush1.bf16.msra.mxu1 %v8200_v29  ;;  %1224 = vmatpush1.bf16.msra.mxu0 %v8185_v27 }
 0x15b   : > { %1156 = vmatprep.subr.bf16.mxu1 %v8208_v31  ;;  %1225 = vmatprep.subr.bf16.mxu0 %v8192_v28 }
 0x15e   : > { %1157 = vmatpush1.bf16.msra.mxu1 %v8216_v32  ;;  %1226 = vmatpush1.bf16.msra.mxu0 %v8200_v29 }
 0x15f   : > { %1158 = vmatprep.subr.bf16.mxu1 %v8223_v35  ;;  %1227 = vmatprep.subr.bf16.mxu0 %v8208_v31 }
 0x160   : > { %v532_v33 = vpop.f32.mrb[0].mxu1 }
 0x161   : > { %v533_v37 = vadd.f32 %v532_v33, %v7999_v49  ;;  %v534_v38 = vpop.f32.mrb[1].mxu1  ;;  %v1361_v33 = vpop.permute.xlu1 %1360 }
 0x162   : > { %v535_v39 = vadd.f32 %v534_v38, %v8003_v50  ;;  %1159 = vmatpush1.bf16.msra.mxu1 %v8233_v40  ;;  %1228 = vmatpush1.bf16.msra.mxu0 %v8216_v32  ;;  %v536_v41 = vpop.f32.mrb[2].mxu1  ;;  %v1364_v11 = vsel %vm1362_vm12, %v8301_v8, %v1361_v33 }
 0x163   : > { %7090 = vtanh.f32 %v533_v37  ;;  %v537_v42 = vadd.f32 %v536_v41, %v7999_v49  ;;  %v538_v43 = vpop.f32.mrb[3].mxu1  ;;  %1160 = vmatprep.subr.bf16.mxu1 %v8241_v34  ;;  %1229 = vmatprep.subr.bf16.mxu0 %v8223_v35 }
 0x164   : > { %7092 = vtanh.f32 %v535_v39  ;;  %v539_v44 = vadd.f32 %v538_v43, %v8003_v50  ;;  %v613_v45 = vpop.f32.mrb[4].mxu0 }
 0x165   : > { %7094 = vtanh.f32 %v537_v42  ;;  %v614_v48 = vadd.f32 %v613_v45, %v7999_v49  ;;  %v615_v51 = vpop.f32.mrb[5].mxu0 }
 0x166   : > { %7096 = vtanh.f32 %v539_v44  ;;  %1161 = vmatpush1.bf16.msra.mxu1 %v8252_v52  ;;  %1230 = vmatpush1.bf16.msra.mxu0 %v8233_v40  ;;  %v616_v53 = vadd.f32 %v615_v51, %v8003_v50  ;;  %v617_v54 = vpop.f32.mrb[6].mxu0  ;;  %v6744_v51 = vld [vmem:[%s7444_s9 + $0x14] ss:$28 sps:$4 sm:$0xff]  }
 0x167   : > { %1162 = vmatprep.subr.bf16.mxu1 %v8260_v55  ;;  %1231 = vmatprep.subr.bf16.mxu0 %v8241_v34  ;;  %7098 = vtanh.f32 %v614_v48  ;;  %v618_v56 = vadd.f32 %v617_v54, %v7999_v49  ;;  %v619_v57 = vpop.f32.mrb[7].mxu0  ;;  %v6742_v48 = vld [vmem:[%s7444_s9 + $0x10] ss:$28 sps:$4 sm:$0xff]  }
 0x168   : > { %7100 = vtanh.f32 %v616_v53  ;;  %v620_v58 = vadd.f32 %v619_v57, %v8003_v50  ;;  %1906 = vrot.lane.b32.xlu0 %v6742_v48, %s7367_s12  ;;  %1908 = vrot.lane.b32.xlu1 %v6744_v51, %s7367_s12  ;;  %v6745_v53 = vld [vmem:[%s7444_s9 + $0x18] ss:$28 sps:$4 sm:$0xff]  }
 0x169   : > { %7102 = vtanh.f32 %v618_v56 }
 0x16a   : > { %1163 = vmatpush1.bf16.msra.mxu1 %v8269_v59  ;;  %1232 = vmatpush1.bf16.msra.mxu0 %v8252_v52  ;;  %7104 = vtanh.f32 %v620_v58 }
 0x16b   : > { %1233 = vmatprep.subr.bf16.mxu0 %v8260_v55  ;;  %1288 = vmatprep.subr.bf16.mxu1 %v8279_v5 }
 0x16c   : > { %1986 = vrot.lane.b32.xlu0 %v6744_v51, %s7368_s13  ;;  %1988 = vrot.lane.b32.xlu1 %v6745_v53, %s7368_s13  ;;  %v1357_v51 = vpop.permute.xlu0 %1356 }
 0x16d   : > { %v8285_v7 = vpop.eup %7090  ;;  %1169 = vmatmul.mubr.bf16.vlgmr.msra.gmra.mrb[16].mxu1 %v1130_v6 }
 0x16e   : > { %v8289_v26 = vpop.eup %7092  ;;  %1234 = vmatpush1.bf16.msra.mxu0 %v8269_v59  ;;  %1289 = vmatpush1.bf16.msra.mxu1 %v7974_v47 }
 0x16f   : > { %v8294_v37 = vpop.eup %7094  ;;  %1290 = vmatprep.subr.bf16.mxu1 %v8073_v10  ;;  %1369 = vmatprep.subr.bf16.mxu0 %v8279_v5 }
 0x170   : > { %v8298_v4 = vpop.eup %7096  ;;  %5809 = vmatprep.mubr.msk.bf16.mxu1 %vm423_vm0, %v1283_v9  ;;  %1984 = vrot.lane.b32.xlu0 %v6742_v48, %s7368_s13 }
 0x171   : > { %v8305_v39 = vpop.eup %7098  ;;  %1240 = vmatmul.mubr.bf16.vlgmr.msra.gmra.mrb[20].mxu0 %v1202_v30 }
 0x172   : > { %v8311_v41 = vpop.eup %7100  ;;  %1291 = vmatpush1.bf16.msra.mxu1 %v8083_v12  ;;  %1370 = vmatpush1.bf16.msra.mxu0 %v7974_v47 }
 0x173   : > { %v8315_v42 = vpop.eup %7102  ;;  %1292 = vmatprep.subr.bf16.mxu1 %v8090_v13  ;;  %1371 = vmatprep.subr.bf16.mxu0 %v8073_v10 }
 0x174   : > { %v8319_v43 = vpop.eup %7104  ;;  %5813 = vmatprep.mubr.msk.bf16.mxu0 %vm423_vm0, %v1364_v11 }
 0x176   : > { %1293 = vmatpush1.bf16.msra.mxu1 %v8099_v14  ;;  %1372 = vmatpush1.bf16.msra.mxu0 %v8083_v12 }
 0x177   : > { %1294 = vmatprep.subr.bf16.mxu1 %v8106_v15  ;;  %1373 = vmatprep.subr.bf16.mxu0 %v8090_v13 }
 0x17a   : > { %1295 = vmatpush1.bf16.msra.mxu1 %v8113_v16  ;;  %1374 = vmatpush1.bf16.msra.mxu0 %v8099_v14 }
 0x17b   : > { %1296 = vmatprep.subr.bf16.mxu1 %v8120_v17  ;;  %1375 = vmatprep.subr.bf16.mxu0 %v8106_v15 }
 0x17e   : > { %1297 = vmatpush1.bf16.msra.mxu1 %v8127_v18  ;;  %1376 = vmatpush1.bf16.msra.mxu0 %v8113_v16 }
 0x17f   : > { %1298 = vmatprep.subr.bf16.mxu1 %v8134_v19  ;;  %1377 = vmatprep.subr.bf16.mxu0 %v8120_v17 }
 0x182   : > { %1299 = vmatpush1.bf16.msra.mxu1 %v8141_v20  ;;  %1378 = vmatpush1.bf16.msra.mxu0 %v8127_v18 }
 0x183   : > { %1300 = vmatprep.subr.bf16.mxu1 %v8148_v21  ;;  %1379 = vmatprep.subr.bf16.mxu0 %v8134_v19 }
 0x186   : > { %1301 = vmatpush1.bf16.msra.mxu1 %v8155_v22  ;;  %1380 = vmatpush1.bf16.msra.mxu0 %v8141_v20 }
 0x187   : > { %1302 = vmatprep.subr.bf16.mxu1 %v8162_v23  ;;  %1381 = vmatprep.subr.bf16.mxu0 %v8148_v21 }
 0x18a   : > { %1303 = vmatpush1.bf16.msra.mxu1 %v8169_v24  ;;  %1382 = vmatpush1.bf16.msra.mxu0 %v8155_v22 }
 0x18b   : > { %1304 = vmatprep.subr.bf16.mxu1 %v8176_v25  ;;  %1383 = vmatprep.subr.bf16.mxu0 %v8162_v23 }
 0x18e   : > { %1305 = vmatpush1.bf16.msra.mxu1 %v8185_v27  ;;  %1384 = vmatpush1.bf16.msra.mxu0 %v8169_v24 }
 0x18f   : > { %1306 = vmatprep.subr.bf16.mxu1 %v8192_v28  ;;  %1385 = vmatprep.subr.bf16.mxu0 %v8176_v25 }
 0x192   : > { %1307 = vmatpush1.bf16.msra.mxu1 %v8200_v29  ;;  %1386 = vmatpush1.bf16.msra.mxu0 %v8185_v27 }
 0x193   : > { %1308 = vmatprep.subr.bf16.mxu1 %v8208_v31  ;;  %1387 = vmatprep.subr.bf16.mxu0 %v8192_v28 }
 0x196   : > { %1309 = vmatpush1.bf16.msra.mxu1 %v8216_v32  ;;  %1388 = vmatpush1.bf16.msra.mxu0 %v8200_v29 }
 0x197   : > { %1310 = vmatprep.subr.bf16.mxu1 %v8223_v35  ;;  %1389 = vmatprep.subr.bf16.mxu0 %v8208_v31 }
 0x198   : > { %v694_v54 = vpop.f32.mrb[4].mxu1 }
 0x199   : > { %v695_v56 = vadd.f32 %v694_v54, %v7999_v49  ;;  %v696_v57 = vpop.f32.mrb[5].mxu1 }
 0x19a   : > { %v697_v58 = vadd.f32 %v696_v57, %v8003_v50  ;;  %v698_v3 = vpop.f32.mrb[6].mxu1  ;;  %1311 = vmatpush1.bf16.msra.mxu1 %v8233_v40  ;;  %1390 = vmatpush1.bf16.msra.mxu0 %v8216_v32 }
 0x19b   : > { %7106 = vtanh.f32 %v695_v56  ;;  %v699_v6 = vadd.f32 %v698_v3, %v7999_v49  ;;  %v700_v9 = vpop.f32.mrb[7].mxu1  ;;  %1312 = vmatprep.subr.bf16.mxu1 %v8241_v34  ;;  %1391 = vmatprep.subr.bf16.mxu0 %v8223_v35 }
 0x19c   : > { %7108 = vtanh.f32 %v697_v58  ;;  %v701_v30 = vadd.f32 %v700_v9, %v8003_v50  ;;  %v775_v33 = vpop.f32.mrb[8].mxu0  ;;  %v8380_v58 = vpop.permute.xlu1 %1439  ;;  %v1282_v9 = vsel %vm1281_vm10, %v8273_v60, %v8246_v46 }
 0x19d   : > { %7110 = vtanh.f32 %v699_v6  ;;  %v776_v11 = vadd.f32 %v775_v33, %v7999_v49  ;;  %v777_v48 = vpop.f32.mrb[9].mxu0  ;;  %v1442_v6 = vpop.permute.xlu0 %1441 }
 0x19e   : > { %7112 = vtanh.f32 %v701_v30  ;;  %1313 = vmatpush1.bf16.msra.mxu1 %v8252_v52  ;;  %1392 = vmatpush1.bf16.msra.mxu0 %v8233_v40  ;;  %v778_v53 = vadd.f32 %v777_v48, %v8003_v50  ;;  %v779_v54 = vpop.f32.mrb[10].mxu0 }
 0x19f   : > { %1314 = vmatprep.subr.bf16.mxu1 %v8260_v55  ;;  %1393 = vmatprep.subr.bf16.mxu0 %v8241_v34  ;;  %7114 = vtanh.f32 %v776_v11  ;;  %v780_v56 = vadd.f32 %v779_v54, %v7999_v49  ;;  %v781_v57 = vpop.f32.mrb[11].mxu0  ;;  %v1445_v11 = vsel %vm1443_vm13, %v8380_v58, %v1442_v6 }
 0x1a0   : > { %7116 = vtanh.f32 %v778_v53  ;;  %v782_v3 = vadd.f32 %v781_v57, %v8003_v50  ;;  %v8392_v33 = vpop.permute.xlu1 %1437  ;;  %v1363_v53 = vsel %vm1362_vm12, %v1357_v51, %v8301_v8 }
 0x1a1   : > { %7118 = vtanh.f32 %v780_v56  ;;  %v1512_v60 = vpop.permute.xlu0 %1511 }
 0x1a2   : > { %1315 = vmatpush1.bf16.msra.mxu1 %v8269_v59  ;;  %1394 = vmatpush1.bf16.msra.mxu0 %v8252_v52  ;;  %7120 = vtanh.f32 %v782_v3 }
 0x1a3   : > { %1395 = vmatprep.subr.bf16.mxu0 %v8260_v55  ;;  %1450 = vmatprep.subr.bf16.mxu1 %v8279_v5 }
 0x1a4   : > { %v8413_v57 = vpop.permute.xlu1 %1513 }
 0x1a5   : > { %v8390_v30 = vpop.eup %7106  ;;  %1321 = vmatmul.mubr.bf16.vlgmr.msra.gmra.mrb[20].mxu1 %v1282_v9  ;;  %v8477_v45 = vpop.permute.xlu0 %1591 }
 0x1a6   : > { %10178 = vst [vmem:[#allocation3_spill] sm:$0xff] %v8390_v30  ;;  %v8396_v48 = vpop.eup %7108  ;;  %1396 = vmatpush1.bf16.msra.mxu0 %v8269_v59  ;;  %1451 = vmatpush1.bf16.msra.mxu1 %v7974_v47 }
 0x1a7   : > { %v8402_v54 = vpop.eup %7110  ;;  %1452 = vmatprep.subr.bf16.mxu1 %v8073_v10  ;;  %1521 = vmatprep.subr.bf16.mxu0 %v8279_v5 }
 0x1a8   : > { %10179 = vst [vmem:[#allocation4_spill] sm:$0xff] %v8402_v54  ;;  %v8406_v46 = vpop.eup %7112  ;;  %5817 = vmatprep.mubr.msk.bf16.mxu1 %vm423_vm0, %v1445_v11 }
 0x1a9   : > { %v8411_v56 = vpop.eup %7114  ;;  %1402 = vmatmul.mubr.bf16.vlgmr.msra.gmra.mrb[24].mxu0 %v1363_v53 }
 0x1aa   : > { %v8417_v51 = vpop.eup %7116  ;;  %1453 = vmatpush1.bf16.msra.mxu1 %v8083_v12  ;;  %1522 = vmatpush1.bf16.msra.mxu0 %v7974_v47 }
 0x1ab   : > { %v8421_v3 = vpop.eup %7118  ;;  %1454 = vmatprep.subr.bf16.mxu1 %v8090_v13  ;;  %1523 = vmatprep.subr.bf16.mxu0 %v8073_v10 }
 0x1ac   : > { %v8425_v6 = vpop.eup %7120  ;;  %5820 = vmatprep.mubr.msk.bf16.mxu0 %vm423_vm0, %v8413_v57 }
 0x1ae   : > { %1455 = vmatpush1.bf16.msra.mxu1 %v8099_v14  ;;  %1524 = vmatpush1.bf16.msra.mxu0 %v8083_v12 }
 0x1af   : > { %1456 = vmatprep.subr.bf16.mxu1 %v8106_v15  ;;  %1525 = vmatprep.subr.bf16.mxu0 %v8090_v13 }
 0x1b2   : > { %1457 = vmatpush1.bf16.msra.mxu1 %v8113_v16  ;;  %1526 = vmatpush1.bf16.msra.mxu0 %v8099_v14 }
 0x1b3   : > { %1458 = vmatprep.subr.bf16.mxu1 %v8120_v17  ;;  %1527 = vmatprep.subr.bf16.mxu0 %v8106_v15 }
 0x1b6   : > { %1459 = vmatpush1.bf16.msra.mxu1 %v8127_v18  ;;  %1528 = vmatpush1.bf16.msra.mxu0 %v8113_v16 }
 0x1b7   : > { %1460 = vmatprep.subr.bf16.mxu1 %v8134_v19  ;;  %1529 = vmatprep.subr.bf16.mxu0 %v8120_v17 }
 0x1ba   : > { %1461 = vmatpush1.bf16.msra.mxu1 %v8141_v20  ;;  %1530 = vmatpush1.bf16.msra.mxu0 %v8127_v18 }
 0x1bb   : > { %1462 = vmatprep.subr.bf16.mxu1 %v8148_v21  ;;  %1531 = vmatprep.subr.bf16.mxu0 %v8134_v19 }
 0x1be   : > { %1463 = vmatpush1.bf16.msra.mxu1 %v8155_v22  ;;  %1532 = vmatpush1.bf16.msra.mxu0 %v8141_v20 }
 0x1bf   : > { %1464 = vmatprep.subr.bf16.mxu1 %v8162_v23  ;;  %1533 = vmatprep.subr.bf16.mxu0 %v8148_v21 }
 0x1c2   : > { %1465 = vmatpush1.bf16.msra.mxu1 %v8169_v24  ;;  %1534 = vmatpush1.bf16.msra.mxu0 %v8155_v22 }
 0x1c3   : > { %1466 = vmatprep.subr.bf16.mxu1 %v8176_v25  ;;  %1535 = vmatprep.subr.bf16.mxu0 %v8162_v23 }
 0x1c6   : > { %1467 = vmatpush1.bf16.msra.mxu1 %v8185_v27  ;;  %1536 = vmatpush1.bf16.msra.mxu0 %v8169_v24 }
 0x1c7   : > { %1468 = vmatprep.subr.bf16.mxu1 %v8192_v28  ;;  %1537 = vmatprep.subr.bf16.mxu0 %v8176_v25 }
 0x1ca   : > { %1469 = vmatpush1.bf16.msra.mxu1 %v8200_v29  ;;  %1538 = vmatpush1.bf16.msra.mxu0 %v8185_v27 }
 0x1cb   : > { %1470 = vmatprep.subr.bf16.mxu1 %v8208_v31  ;;  %1539 = vmatprep.subr.bf16.mxu0 %v8192_v28 }
 0x1ce   : > { %1471 = vmatpush1.bf16.msra.mxu1 %v8216_v32  ;;  %1540 = vmatpush1.bf16.msra.mxu0 %v8200_v29 }
 0x1cf   : > { %1472 = vmatprep.subr.bf16.mxu1 %v8223_v35  ;;  %1541 = vmatprep.subr.bf16.mxu0 %v8208_v31 }
 0x1d0   : > { %v846_v53 = vpop.f32.mrb[8].mxu1 }
 0x1d1   : > { %v847_v9 = vadd.f32 %v846_v53, %v7999_v49  ;;  %v848_v8 = vpop.f32.mrb[9].mxu1 }
 0x1d2   : > { %v849_v38 = vadd.f32 %v848_v8, %v8003_v50  ;;  %v850_v11 = vpop.f32.mrb[10].mxu1  ;;  %1473 = vmatpush1.bf16.msra.mxu1 %v8233_v40  ;;  %1542 = vmatpush1.bf16.msra.mxu0 %v8216_v32 }
 0x1d3   : > { %7122 = vtanh.f32 %v847_v9  ;;  %v851_v44 = vadd.f32 %v850_v11, %v7999_v49  ;;  %v852_v36 = vpop.f32.mrb[11].mxu1  ;;  %1474 = vmatprep.subr.bf16.mxu1 %v8241_v34  ;;  %1543 = vmatprep.subr.bf16.mxu0 %v8223_v35 }
 0x1d4   : > { %7124 = vtanh.f32 %v849_v38  ;;  %v853_v1 = vadd.f32 %v852_v36, %v8003_v50  ;;  %v927_v53 = vpop.f32.mrb[12].mxu0 }
 0x1d5   : > { %7126 = vtanh.f32 %v851_v44  ;;  %v928_v8 = vadd.f32 %v927_v53, %v7999_v49  ;;  %v929_v2 = vpop.f32.mrb[13].mxu0  ;;  %v1444_v53 = vsel %vm1443_vm13, %v8392_v33, %v8380_v58 }
 0x1d6   : > { %7128 = vtanh.f32 %v853_v1  ;;  %1475 = vmatpush1.bf16.msra.mxu1 %v8252_v52  ;;  %1544 = vmatpush1.bf16.msra.mxu0 %v8233_v40  ;;  %v930_v9 = vadd.f32 %v929_v2, %v8003_v50  ;;  %v931_v11 = vpop.f32.mrb[14].mxu0  ;;  %v1594_v1 = vpop.permute.xlu1 %1593 }
 0x1d7   : > { %1476 = vmatprep.subr.bf16.mxu1 %v8260_v55  ;;  %1545 = vmatprep.subr.bf16.mxu0 %v8241_v34  ;;  %7130 = vtanh.f32 %v928_v8  ;;  %v932_v38 = vadd.f32 %v931_v11, %v7999_v49  ;;  %v933_v36 = vpop.f32.mrb[15].mxu0  ;;  %v8489_v2 = vpop.permute.xlu0 %1589 }
 0x1d8   : > { %7132 = vtanh.f32 %v930_v9  ;;  %v934_v44 = vadd.f32 %v933_v36, %v8003_v50  ;;  %v1597_v9 = vsel %vm1595_vm14, %v8477_v45, %v1594_v1 }
 0x1d9   : > { %7134 = vtanh.f32 %v932_v38  ;;  %v1516_v38 = vsel %vm1515_vm15, %v1512_v60, %v8413_v57 }
 0x1da   : > { %1477 = vmatpush1.bf16.msra.mxu1 %v8269_v59  ;;  %1546 = vmatpush1.bf16.msra.mxu0 %v8252_v52  ;;  %7136 = vtanh.f32 %v934_v44  ;;  %v8512_v33 = vpop.permute.xlu1 %1672 }
 0x1db   : > { %1547 = vmatprep.subr.bf16.mxu0 %v8260_v55  ;;  %1602 = vmatprep.subr.bf16.mxu1 %v8279_v5  ;;  %v1675_v36 = vpop.permute.xlu0 %1674 }
 0x1dc   : > { %v1678_v60 = vsel %vm1676_vm1, %v8512_v33, %v1675_v36 }
 0x1dd   : > { %v8496_v8 = vpop.eup %7122  ;;  %1483 = vmatmul.mubr.bf16.vlgmr.msra.gmra.mrb[24].mxu1 %v1444_v53 }
 0x1de   : > { %10180 = vst [vmem:[#allocation5_spill] sm:$0xff] %v8496_v8  ;;  %v8500_v11 = vpop.eup %7124  ;;  %1548 = vmatpush1.bf16.msra.mxu0 %v8269_v59  ;;  %1603 = vmatpush1.bf16.msra.mxu1 %v7974_v47 }
 0x1df   : > { %10181 = vst [vmem:[#allocation6_spill] sm:$0xff] %v8500_v11  ;;  %v8505_v44 = vpop.eup %7126  ;;  %1604 = vmatprep.subr.bf16.mxu1 %v8073_v10  ;;  %1683 = vmatprep.subr.bf16.mxu0 %v8279_v5 }
 0x1e0   : > { %10182 = vst [vmem:[#allocation7_spill] sm:$0xff] %v8505_v44  ;;  %v8509_v58 = vpop.eup %7128  ;;  %5824 = vmatprep.mubr.msk.bf16.mxu1 %vm423_vm0, %v1597_v9 }
 0x1e1   : > { %10183 = vst [vmem:[#allocation8_spill] sm:$0xff] %v8509_v58  ;;  %v8516_v53 = vpop.eup %7130  ;;  %1554 = vmatmul.mubr.bf16.vlgmr.msra.gmra.mrb[28].mxu0 %v1516_v38 }
 0x1e2   : > { %10184 = vst [vmem:[#allocation9_spill] sm:$0xff] %v8516_v53  ;;  %v8522_v30 = vpop.eup %7132  ;;  %1605 = vmatpush1.bf16.msra.mxu1 %v8083_v12  ;;  %1684 = vmatpush1.bf16.msra.mxu0 %v7974_v47 }
 0x1e3   : > { %10185 = vst [vmem:[#allocation10_spill] sm:$0xff] %v8522_v30  ;;  %v8526_v9 = vpop.eup %7134  ;;  %1606 = vmatprep.subr.bf16.mxu1 %v8090_v13  ;;  %1685 = vmatprep.subr.bf16.mxu0 %v8073_v10 }
 0x1e4   : > { %10186 = vst [vmem:[#allocation11_spill] sm:$0xff] %v8526_v9  ;;  %v8530_v1 = vpop.eup %7136  ;;  %5828 = vmatprep.mubr.msk.bf16.mxu0 %vm423_vm0, %v1678_v60  ;;  %v8581_v9 = vpop.permute.xlu0 %1753 }
 0x1e6   : > { %1607 = vmatpush1.bf16.msra.mxu1 %v8099_v14  ;;  %1686 = vmatpush1.bf16.msra.mxu0 %v8083_v12 }
 0x1e7   : > { %1608 = vmatprep.subr.bf16.mxu1 %v8106_v15  ;;  %1687 = vmatprep.subr.bf16.mxu0 %v8090_v13 }
 0x1ea   : > { %1609 = vmatpush1.bf16.msra.mxu1 %v8113_v16  ;;  %1688 = vmatpush1.bf16.msra.mxu0 %v8099_v14 }
 0x1eb   : > { %1610 = vmatprep.subr.bf16.mxu1 %v8120_v17  ;;  %1689 = vmatprep.subr.bf16.mxu0 %v8106_v15 }
 0x1ee   : > { %1611 = vmatpush1.bf16.msra.mxu1 %v8127_v18  ;;  %1690 = vmatpush1.bf16.msra.mxu0 %v8113_v16 }
 0x1ef   : > { %1612 = vmatprep.subr.bf16.mxu1 %v8134_v19  ;;  %1691 = vmatprep.subr.bf16.mxu0 %v8120_v17 }
 0x1f2   : > { %1613 = vmatpush1.bf16.msra.mxu1 %v8141_v20  ;;  %1692 = vmatpush1.bf16.msra.mxu0 %v8127_v18 }
 0x1f3   : > { %1614 = vmatprep.subr.bf16.mxu1 %v8148_v21  ;;  %1693 = vmatprep.subr.bf16.mxu0 %v8134_v19 }
 0x1f6   : > { %1615 = vmatpush1.bf16.msra.mxu1 %v8155_v22  ;;  %1694 = vmatpush1.bf16.msra.mxu0 %v8141_v20 }
 0x1f7   : > { %1616 = vmatprep.subr.bf16.mxu1 %v8162_v23  ;;  %1695 = vmatprep.subr.bf16.mxu0 %v8148_v21 }
 0x1fa   : > { %1617 = vmatpush1.bf16.msra.mxu1 %v8169_v24  ;;  %1696 = vmatpush1.bf16.msra.mxu0 %v8155_v22 }
 0x1fb   : > { %1618 = vmatprep.subr.bf16.mxu1 %v8176_v25  ;;  %1697 = vmatprep.subr.bf16.mxu0 %v8162_v23 }
 0x1fe   : > { %1619 = vmatpush1.bf16.msra.mxu1 %v8185_v27  ;;  %1698 = vmatpush1.bf16.msra.mxu0 %v8169_v24 }
 0x1ff   : > { %1620 = vmatprep.subr.bf16.mxu1 %v8192_v28  ;;  %1699 = vmatprep.subr.bf16.mxu0 %v8176_v25 }
 0x202   : > { %1621 = vmatpush1.bf16.msra.mxu1 %v8200_v29  ;;  %1700 = vmatpush1.bf16.msra.mxu0 %v8185_v27 }
 0x203   : > { %1622 = vmatprep.subr.bf16.mxu1 %v8208_v31  ;;  %1701 = vmatprep.subr.bf16.mxu0 %v8192_v28 }
 0x206   : > { %1623 = vmatpush1.bf16.msra.mxu1 %v8216_v32  ;;  %1702 = vmatpush1.bf16.msra.mxu0 %v8200_v29 }
 0x207   : > { %1624 = vmatprep.subr.bf16.mxu1 %v8223_v35  ;;  %1703 = vmatprep.subr.bf16.mxu0 %v8208_v31 }
 0x208   : > { %v1008_v47 = vpop.f32.mrb[12].mxu1 }
 0x209   : > { %v1009_v60 = vadd.f32 %v1008_v47, %v7999_v49  ;;  %v1010_v38 = vpop.f32.mrb[13].mxu1 }
 0x20a   : > { %v1011_v57 = vadd.f32 %v1010_v38, %v8003_v50  ;;  %v1012_v36 = vpop.f32.mrb[14].mxu1  ;;  %1625 = vmatpush1.bf16.msra.mxu1 %v8233_v40  ;;  %1704 = vmatpush1.bf16.msra.mxu0 %v8216_v32 }
 0x20b   : > { %7138 = vtanh.f32 %v1009_v60  ;;  %v1013_v8 = vadd.f32 %v1012_v36, %v7999_v49  ;;  %v1014_v44 = vpop.f32.mrb[15].mxu1  ;;  %1626 = vmatprep.subr.bf16.mxu1 %v8241_v34  ;;  %1705 = vmatprep.subr.bf16.mxu0 %v8223_v35  ;;  %v1671_v36 = vpop.permute.xlu1 %1670 }
 0x20c   : > { %7140 = vtanh.f32 %v1011_v57  ;;  %v1015_v53 = vadd.f32 %v1014_v44, %v8003_v50  ;;  %v1089_v47 = vpop.f32.mrb[16].mxu0 }
 0x20d   : > { %7142 = vtanh.f32 %v1013_v8  ;;  %v1090_v38 = vadd.f32 %v1089_v47, %v7999_v49  ;;  %v1091_v11 = vpop.f32.mrb[17].mxu0 }
 0x20e   : > { %7144 = vtanh.f32 %v1015_v53  ;;  %1627 = vmatpush1.bf16.msra.mxu1 %v8252_v52  ;;  %1706 = vmatpush1.bf16.msra.mxu0 %v8233_v40  ;;  %v1092_v60 = vadd.f32 %v1091_v11, %v8003_v50  ;;  %v1093_v58 = vpop.f32.mrb[18].mxu0  ;;  %v8593_v53 = vpop.permute.xlu0 %1751 }
 0x20f   : > { %1628 = vmatprep.subr.bf16.mxu1 %v8260_v55  ;;  %1707 = vmatprep.subr.bf16.mxu0 %v8241_v34  ;;  %7146 = vtanh.f32 %v1090_v38  ;;  %v1094_v44 = vadd.f32 %v1093_v58, %v7999_v49  ;;  %v1095_v8 = vpop.f32.mrb[19].mxu0  ;;  %v1756_v11 = vpop.permute.xlu1 %1755  ;;  %v1596_v58 = vsel %vm1595_vm14, %v8489_v2, %v8477_v45  ;;  %v1677_v45 = vsel %vm1676_vm1, %v1671_v36, %v8512_v33 }
 0x210   : > { %7148 = vtanh.f32 %v1092_v60  ;;  %v1096_v57 = vadd.f32 %v1095_v8, %v8003_v50  ;;  %v1759_v38 = vsel %vm1757_vm2, %v8581_v9, %v1756_v11 }
 0x211   : > { %7150 = vtanh.f32 %v1094_v44  ;;  %v8610_v44 = vld [vmem:[%s10164_s1] ss:$8 sps:$4 sm:$0xff]  }
 0x212   : > { %1629 = vmatpush1.bf16.msra.mxu1 %v8269_v59  ;;  %1708 = vmatpush1.bf16.msra.mxu0 %v8252_v52  ;;  %7152 = vtanh.f32 %v1096_v57  ;;  %v1837_v2 = vpop.permute.xlu0 %1836 }
 0x213   : > { %1709 = vmatprep.subr.bf16.mxu0 %v8260_v55  ;;  %1764 = vmatprep.subr.bf16.mxu1 %v8279_v5  ;;  %v8622_v11 = vpop.permute.xlu1 %1834 }
 0x214   : > { %v1840_v33 = vsel %vm1838_vm3, %v8622_v11, %v1837_v2 }
 0x215   : > { %v8600_v47 = vpop.eup %7138  ;;  %1635 = vmatmul.mubr.bf16.vlgmr.msra.gmra.mrb[28].mxu1 %v1596_v58 }
 0x216   : > { %v8604_v60 = vpop.eup %7140  ;;  %1710 = vmatpush1.bf16.msra.mxu0 %v8269_v59  ;;  %1765 = vmatpush1.bf16.msra.mxu1 %v8610_v44 }
 0x217   : > { %v8615_v8 = vpop.eup %7142  ;;  %1766 = vmatprep.subr.bf16.mxu1 %v8073_v10  ;;  %1845 = vmatprep.subr.bf16.mxu0 %v8279_v5 }
 0x218   : > { %v8619_v57 = vpop.eup %7144  ;;  %5832 = vmatprep.mubr.msk.bf16.mxu1 %vm423_vm0, %v1759_v38 }
 0x219   : > { %v8626_v54 = vpop.eup %7146  ;;  %1716 = vmatmul.mubr.bf16.vlgmr.msra.gmra.mrb[32].mxu0 %v1677_v45  ;;  %v1022_v36 = vpack.c.bf16 %v8619_v57, %v8604_v60  ;;  %v6881_v60 = vld [vmem:[%s10166_s3 + $0x548] sm:$0xff]   ;;  %v6882_v57 = vld [vmem:[%s10166_s3 + $0x390] sm:$0xff]  }
 0x21a   : > { %v8632_v30 = vpop.eup %7148  ;;  %1767 = vmatpush1.bf16.msra.mxu1 %v8083_v12  ;;  %1846 = vmatpush1.bf16.msra.mxu0 %v8610_v44 }
 0x21b   : > { %v8636_v38 = vpop.eup %7150  ;;  %1768 = vmatprep.subr.bf16.mxu1 %v8090_v13  ;;  %1847 = vmatprep.subr.bf16.mxu0 %v8073_v10 }
 0x21c   : > { %v8640_v58 = vpop.eup %7152  ;;  %5836 = vmatprep.mubr.msk.bf16.mxu0 %vm423_vm0, %v1840_v33  ;;  %v1102_v45 = vpack.c.bf16 %v8636_v38, %v8626_v54  ;;  %v6885_v54 = vld [vmem:[%s10166_s3 + $0x550] sm:$0xff]   ;;  %v6886_v38 = vld [vmem:[%s10166_s3 + $0x398] sm:$0xff]  }
 0x21d   : > { %v1103_v2 = vpack.c.bf16 %v8640_v58, %v8632_v30 }
 0x21e   : > { %1769 = vmatpush1.bf16.msra.mxu1 %v8099_v14  ;;  %1848 = vmatpush1.bf16.msra.mxu0 %v8083_v12 }
 0x21f   : > { %1770 = vmatprep.subr.bf16.mxu1 %v8106_v15  ;;  %1849 = vmatprep.subr.bf16.mxu0 %v8090_v13 }
 0x222   : > { %1771 = vmatpush1.bf16.msra.mxu1 %v8113_v16  ;;  %1850 = vmatpush1.bf16.msra.mxu0 %v8099_v14 }
 0x223   : > { %1772 = vmatprep.subr.bf16.mxu1 %v8120_v17  ;;  %1851 = vmatprep.subr.bf16.mxu0 %v8106_v15 }
 0x226   : > { %1773 = vmatpush1.bf16.msra.mxu1 %v8127_v18  ;;  %1852 = vmatpush1.bf16.msra.mxu0 %v8113_v16 }
 0x227   : > { %1774 = vmatprep.subr.bf16.mxu1 %v8134_v19  ;;  %1853 = vmatprep.subr.bf16.mxu0 %v8120_v17 }
 0x22a   : > { %1775 = vmatpush1.bf16.msra.mxu1 %v8141_v20  ;;  %1854 = vmatpush1.bf16.msra.mxu0 %v8127_v18 }
 0x22b   : > { %1776 = vmatprep.subr.bf16.mxu1 %v8148_v21  ;;  %1855 = vmatprep.subr.bf16.mxu0 %v8134_v19  ;;  %v1833_v19 = vpop.permute.xlu1 %1832 }
 0x22e   : > { %1777 = vmatpush1.bf16.msra.mxu1 %v8155_v22  ;;  %1856 = vmatpush1.bf16.msra.mxu0 %v8141_v20 }
 0x22f   : > { %1778 = vmatprep.subr.bf16.mxu1 %v8162_v23  ;;  %1857 = vmatprep.subr.bf16.mxu0 %v8148_v21 }
 0x232   : > { %1779 = vmatpush1.bf16.msra.mxu1 %v8169_v24  ;;  %1858 = vmatpush1.bf16.msra.mxu0 %v8155_v22 }
 0x233   : > { %1780 = vmatprep.subr.bf16.mxu1 %v8176_v25  ;;  %1859 = vmatprep.subr.bf16.mxu0 %v8162_v23 }
 0x236   : > { %1781 = vmatpush1.bf16.msra.mxu1 %v8185_v27  ;;  %1860 = vmatpush1.bf16.msra.mxu0 %v8169_v24 }
 0x237   : > { %1782 = vmatprep.subr.bf16.mxu1 %v8192_v28  ;;  %1861 = vmatprep.subr.bf16.mxu0 %v8176_v25 }
 0x23a   : > { %1783 = vmatpush1.bf16.msra.mxu1 %v8200_v29  ;;  %1862 = vmatpush1.bf16.msra.mxu0 %v8185_v27 }
 0x23b   : > { %1784 = vmatprep.subr.bf16.mxu1 %v8208_v31  ;;  %1863 = vmatprep.subr.bf16.mxu0 %v8192_v28 }
 0x23e   : > { %1785 = vmatpush1.bf16.msra.mxu1 %v8216_v32  ;;  %1864 = vmatpush1.bf16.msra.mxu0 %v8200_v29  ;;  %v8699_v29 = vpop.permute.xlu1 %1908 }
 0x23f   : > { %1786 = vmatprep.subr.bf16.mxu1 %v8223_v35  ;;  %1865 = vmatprep.subr.bf16.mxu0 %v8208_v31  ;;  %v8703_v31 = vpop.permute.xlu0 %1906 }
 0x240   : > { %v1170_v10 = vpop.f32.mrb[16].mxu1 }
 0x241   : > { %v1171_v12 = vadd.f32 %v1170_v10, %v7999_v49  ;;  %v1172_v13 = vpop.f32.mrb[17].mxu1 }
 0x242   : > { %v1173_v14 = vadd.f32 %v1172_v13, %v8003_v50  ;;  %v1174_v15 = vpop.f32.mrb[18].mxu1  ;;  %1787 = vmatpush1.bf16.msra.mxu1 %v8233_v40  ;;  %1866 = vmatpush1.bf16.msra.mxu0 %v8216_v32  ;;  %v1758_v32 = vsel %vm1757_vm2, %v8593_v53, %v8581_v9  ;;  %v7315_v9 = vld [vmem:[%s10164_s1 + $0x14] ss:$8 sps:$4 sm:$0xff]   ;;  %v7316_v13 = vld [vmem:[%s10164_s1 + $0x10] ss:$8 sps:$4 sm:$0xff]  }
 0x243   : > { %7154 = vtanh.f32 %v1171_v12  ;;  %v1175_v16 = vadd.f32 %v1174_v15, %v7999_v49  ;;  %v1176_v17 = vpop.f32.mrb[19].mxu1  ;;  %1788 = vmatprep.subr.bf16.mxu1 %v8241_v34  ;;  %1867 = vmatprep.subr.bf16.mxu0 %v8223_v35  ;;  %v8726_v33 = vpop.permute.xlu0 %1986  ;;  %v7317_v15 = vld [vmem:[%s10164_s1 + $0x24] ss:$8 sps:$4 sm:$0xff]  }
 0x244   : > { %7156 = vtanh.f32 %v1173_v14  ;;  %v1177_v18 = vadd.f32 %v1176_v17, %v8003_v50  ;;  %v1241_v20 = vpop.f32.mrb[20].mxu0 }
 0x245   : > { %7158 = vtanh.f32 %v1175_v16  ;;  %v1242_v21 = vadd.f32 %v1241_v20, %v7999_v49  ;;  %v1243_v22 = vpop.f32.mrb[21].mxu0  ;;  %v7320_v20 = vld [vmem:[%s10164_s1 + $0x30] ss:$8 sps:$4 sm:$0xff]  }
 0x246   : > { %7160 = vtanh.f32 %v1177_v18  ;;  %1789 = vmatpush1.bf16.msra.mxu1 %v8252_v52  ;;  %1868 = vmatpush1.bf16.msra.mxu0 %v8233_v40  ;;  %v1244_v23 = vadd.f32 %v1243_v22, %v8003_v50  ;;  %v1245_v24 = vpop.f32.mrb[22].mxu0  ;;  %v7322_v22 = vld [vmem:[%s10164_s1 + $0x40] ss:$8 sps:$4 sm:$0xff]  }
 0x247   : > { %1790 = vmatprep.subr.bf16.mxu1 %v8260_v55  ;;  %1869 = vmatprep.subr.bf16.mxu0 %v8241_v34  ;;  %7162 = vtanh.f32 %v1242_v21  ;;  %v1246_v25 = vadd.f32 %v1245_v24, %v7999_v49  ;;  %v1247_v27 = vpop.f32.mrb[23].mxu0  ;;  %v1839_v34 = vsel %vm1838_vm3, %v1833_v19, %v8622_v11  ;;  %v7319_v19 = vld [vmem:[%s10164_s1 + $0x34] ss:$8 sps:$4 sm:$0xff]   ;;  %v7321_v21 = vld [vmem:[%s10164_s1 + $0x44] ss:$8 sps:$4 sm:$0xff]  }
 0x248   : > { %7164 = vtanh.f32 %v1244_v23  ;;  %v1248_v28 = vadd.f32 %v1247_v27, %v8003_v50  ;;  %v7323_v23 = vld [vmem:[%s10164_s1 + $0x54] ss:$8 sps:$4 sm:$0xff]   ;;  %v7324_v24 = vld [vmem:[%s10164_s1 + $0x50] ss:$8 sps:$4 sm:$0xff]   ;;  %v7326_v27 = vld [vmem:[%s10164_s1 + $0x60] ss:$8 sps:$4 sm:$0xff]  }
 0x249   : > { %7166 = vtanh.f32 %v1246_v25  ;;  %v7325_v25 = vld [vmem:[%s10164_s1 + $0x64] ss:$8 sps:$4 sm:$0xff]  }
 0x24a   : > { %1791 = vmatpush1.bf16.msra.mxu1 %v8269_v59  ;;  %1870 = vmatpush1.bf16.msra.mxu0 %v8252_v52  ;;  %7168 = vtanh.f32 %v1248_v28  ;;  %v1989_v52 = vpop.permute.xlu1 %1988  ;;  %v7327_v28 = vld [vmem:[%s10164_s1 + $0x74] ss:$8 sps:$4 sm:$0xff]  }
 0x24b   : > { %1871 = vmatprep.subr.bf16.mxu0 %v8260_v55  ;;  %1916 = vmatprep.subr.bf16.mxu1 %v8279_v5  ;;  %v1992_v10 = vsel %vm1990_vm4, %v8726_v33, %v1989_v52  ;;  %v7330_v52 = vld [vmem:[%s10164_s1 + $0x80] ss:$8 sps:$4 sm:$0xff]  }
 0x24d   : > { %v8710_v35 = vpop.eup %7154  ;;  %1797 = vmatmul.mubr.bf16.vlgmr.msra.gmra.mrb[32].mxu1 %v1758_v32  ;;  %v7328_v32 = vld [vmem:[%s10164_s1 + $0x70] ss:$8 sps:$4 sm:$0xff]  }
 0x24e   : > { %v8712_v40 = vpop.eup %7156  ;;  %1872 = vmatpush1.bf16.msra.mxu0 %v8269_v59  ;;  %1917 = vmatpush1.bf16.msra.mxu1 %v8610_v44 }
 0x24f   : > { %v8718_v55 = vpop.eup %7158  ;;  %1918 = vmatprep.subr.bf16.mxu1 %v7315_v9  ;;  %1997 = vmatprep.subr.bf16.mxu0 %v8279_v5 }
 0x250   : > { %v8724_v53 = vpop.eup %7160  ;;  %5839 = vmatprep.mubr.msk.bf16.mxu1 %vm423_vm0, %v8699_v29  ;;  %v1183_v59 = vpack.c.bf16 %v8718_v55, %v8710_v35  ;;  %v6944_v35 = vld [vmem:[%s10166_s3 + $0x5d0] sm:$0xff]   ;;  %v6945_v55 = vld [vmem:[%s10166_s3 + $0x748] sm:$0xff]  }
 0x251   : > { %v8732_v11 = vpop.eup %7162  ;;  %1878 = vmatmul.mubr.bf16.vlgmr.msra.gmra.mrb[36].mxu0 %v1839_v34  ;;  %v1184_v12 = vpack.c.bf16 %v8724_v53, %v8712_v40  ;;  %v7329_v34 = vld [vmem:[%s10164_s1 + $0x84] ss:$8 sps:$4 sm:$0xff]   ;;  %v6912_v40 = vld [vmem:[%s10166_s3 + $0x4d0] sm:$0xff]  }
 0x252   : > { %v8738_v5 = vpop.eup %7164  ;;  %1919 = vmatpush1.bf16.msra.mxu1 %v7316_v13  ;;  %1998 = vmatpush1.bf16.msra.mxu0 %v8610_v44  ;;  %v7318_v44 = vld [vmem:[%s10164_s1 + $0x20] ss:$8 sps:$4 sm:$0xff]  }
 0x253   : > { %v8744_v14 = vpop.eup %7166  ;;  %1920 = vmatprep.subr.bf16.mxu1 %v7317_v15  ;;  %1999 = vmatprep.subr.bf16.mxu0 %v7315_v9  ;;  %v7331_v9 = vld [vmem:[%s10164_s1 + $0x94] ss:$8 sps:$4 sm:$0xff]   ;;  %v6913_v53 = vld [vmem:[%s10166_s3 + $0x648] sm:$0xff]  }
 0x254   : > { %v8749_v16 = vpop.eup %7168  ;;  %5843 = vmatprep.mubr.msk.bf16.mxu0 %vm423_vm0, %v1992_v10  ;;  %v1254_v17 = vpack.c.bf16 %v8744_v14, %v8732_v11  ;;  %v7332_v10 = vld [vmem:[%s10164_s1 + $0x90] ss:$8 sps:$4 sm:$0xff]   ;;  %vm1910_vm0 = vcmask 883712  }
 0x255   : > { %v1255_v18 = vpack.c.bf16 %v8749_v16, %v8738_v5  ;;  %v6888_v5 = vld [vmem:[%s10166_s3 + $0x3e0] sm:$0xff]   ;;  %v6889_v16 = vld [vmem:[%s10166_s3 + $0x558] sm:$0xff]   ;;  %v6917_v14 = vld [vmem:[%s10166_s3 + $0x650] sm:$0xff]  }
 0x256   : > { %1921 = vmatpush1.bf16.msra.mxu1 %v7318_v44  ;;  %2000 = vmatpush1.bf16.msra.mxu0 %v7316_v13  ;;  %v7333_v13 = vld [vmem:[%s10164_s1 + $0xa4] ss:$8 sps:$4 sm:$0xff]   ;;  %v6916_v11 = vld [vmem:[%s10166_s3 + $0x4d8] sm:$0xff]  }
 0x257   : > { %1922 = vmatprep.subr.bf16.mxu1 %v7319_v19  ;;  %2001 = vmatprep.subr.bf16.mxu0 %v7317_v15  ;;  %v7334_v15 = vld [vmem:[%s10164_s1 + $0xa0] ss:$8 sps:$4 sm:$0xff]  }
 0x25a   : > { %1923 = vmatpush1.bf16.msra.mxu1 %v7320_v20  ;;  %2002 = vmatpush1.bf16.msra.mxu0 %v7318_v44  ;;  %v7335_v44 = vld [vmem:[%s10164_s1 + $0xb4] ss:$8 sps:$4 sm:$0xff]  }
 0x25b   : > { %1924 = vmatprep.subr.bf16.mxu1 %v7321_v21  ;;  %2003 = vmatprep.subr.bf16.mxu0 %v7319_v19 }
 0x25e   : > { %1925 = vmatpush1.bf16.msra.mxu1 %v7322_v22  ;;  %2004 = vmatpush1.bf16.msra.mxu0 %v7320_v20 }
 0x25f   : > { %1926 = vmatprep.subr.bf16.mxu1 %v7323_v23  ;;  %2005 = vmatprep.subr.bf16.mxu0 %v7321_v21 }
 0x262   : > { %1927 = vmatpush1.bf16.msra.mxu1 %v7324_v24  ;;  %2006 = vmatpush1.bf16.msra.mxu0 %v7322_v22 }
 0x263   : > { %1928 = vmatprep.subr.bf16.mxu1 %v7325_v25  ;;  %2007 = vmatprep.subr.bf16.mxu0 %v7323_v23 }
 0x266   : > { %1929 = vmatpush1.bf16.msra.mxu1 %v7326_v27  ;;  %2008 = vmatpush1.bf16.msra.mxu0 %v7324_v24  ;;  %v7336_v24 = vld [vmem:[%s10164_s1 + $0xb0] ss:$8 sps:$4 sm:$0xff]  }
 0x267   : > { %1930 = vmatprep.subr.bf16.mxu1 %v7327_v28  ;;  %2009 = vmatprep.subr.bf16.mxu0 %v7325_v25 }
 0x26a   : > { %1931 = vmatpush1.bf16.msra.mxu1 %v7328_v32  ;;  %2010 = vmatpush1.bf16.msra.mxu0 %v7326_v27 }
 0x26b   : > { %1932 = vmatprep.subr.bf16.mxu1 %v7329_v34  ;;  %2011 = vmatprep.subr.bf16.mxu0 %v7327_v28  ;;  %v7337_v28 = vld [vmem:[%s10164_s1 + $0xc4] ss:$8 sps:$4 sm:$0xff]  }
 0x26e   : > { %1933 = vmatpush1.bf16.msra.mxu1 %v7330_v52  ;;  %2012 = vmatpush1.bf16.msra.mxu0 %v7328_v32 }
 0x26f   : > { %1934 = vmatprep.subr.bf16.mxu1 %v7331_v9  ;;  %2013 = vmatprep.subr.bf16.mxu0 %v7329_v34 }
 0x272   : > { %1935 = vmatpush1.bf16.msra.mxu1 %v7332_v10  ;;  %2014 = vmatpush1.bf16.msra.mxu0 %v7330_v52 }
 0x273   : > { %1936 = vmatprep.subr.bf16.mxu1 %v7333_v13  ;;  %2015 = vmatprep.subr.bf16.mxu0 %v7331_v9 }
 0x276   : > { %1937 = vmatpush1.bf16.msra.mxu1 %v7334_v15  ;;  %2016 = vmatpush1.bf16.msra.mxu0 %v7332_v10  ;;  %v7338_v10 = vld [vmem:[%s10164_s1 + $0xc0] ss:$8 sps:$4 sm:$0xff]  }
 0x277   : > { %1938 = vmatprep.subr.bf16.mxu1 %v7335_v44  ;;  %2017 = vmatprep.subr.bf16.mxu0 %v7333_v13 }
 0x278   : > { %v1322_v19 = vpop.f32.mrb[20].mxu1 }
 0x279   : > { %v1323_v20 = vadd.f32 %v1322_v19, %v7999_v49  ;;  %v1324_v21 = vpop.f32.mrb[21].mxu1  ;;  %v6746_v19 = vld [vmem:[%s10166_s3 + $0x40] sm:$0xff]  }
 0x27a   : > { %v1325_v22 = vadd.f32 %v1324_v21, %v8003_v50  ;;  %v1326_v23 = vpop.f32.mrb[22].mxu1  ;;  %1939 = vmatpush1.bf16.msra.mxu1 %v7336_v24  ;;  %2018 = vmatpush1.bf16.msra.mxu0 %v7334_v15 }
 0x27b   : > { %7170 = vtanh.f32 %v1323_v20  ;;  %v1327_v25 = vadd.f32 %v1326_v23, %v7999_v49  ;;  %v1328_v27 = vpop.f32.mrb[23].mxu1  ;;  %1940 = vmatprep.subr.bf16.mxu1 %v7337_v28  ;;  %2019 = vmatprep.subr.bf16.mxu0 %v7335_v44  ;;  %v7339_v44 = vld [vmem:[%s10164_s1 + $0xd4] ss:$8 sps:$4 sm:$0xff]   ;;  %v1911_v23 = vsel %vm1910_vm0, %v8703_v31, %v8699_v29  ;;  %v6749_v29 = vld [vmem:[%s10166_s3 + $0x140] sm:$0xff]  }
 0x27c   : > { %7172 = vtanh.f32 %v1325_v22  ;;  %v1329_v32 = vadd.f32 %v1328_v27, %v8003_v50  ;;  %v1403_v34 = vpop.f32.mrb[24].mxu0  ;;  %v1985_v27 = vpop.permute.xlu0 %1984 }
 0x27d   : > { %7174 = vtanh.f32 %v1327_v25  ;;  %v1404_v52 = vadd.f32 %v1403_v34, %v7999_v49  ;;  %v1405_v9 = vpop.f32.mrb[25].mxu0  ;;  %v6747_v25 = vld [vmem:[%s10166_s3] sm:$0xff]   ;;  %v1991_v34 = vsel %vm1990_vm4, %v1985_v27, %v8726_v33  ;;  %v6757_v27 = vld [vmem:[%s10166_s3 + $0x150] sm:$0xff]  }
 0x27e   : > { %7176 = vtanh.f32 %v1329_v32  ;;  %1941 = vmatpush1.bf16.msra.mxu1 %v7338_v10  ;;  %2020 = vmatpush1.bf16.msra.mxu0 %v7336_v24  ;;  %v1406_v13 = vadd.f32 %v1405_v9, %v8003_v50  ;;  %v1407_v15 = vpop.f32.mrb[26].mxu0  ;;  %v7340_v24 = vld [vmem:[%s10164_s1 + $0xd0] ss:$8 sps:$4 sm:$0xff]   ;;  %v6751_v9 = vld [vmem:[%s10166_s3 + $0x100] sm:$0xff]  }
 0x27f   : > { %1942 = vmatprep.subr.bf16.mxu1 %v7339_v44  ;;  %2021 = vmatprep.subr.bf16.mxu0 %v7337_v28  ;;  %7178 = vtanh.f32 %v1404_v52  ;;  %v1408_v20 = vadd.f32 %v1407_v15, %v7999_v49  ;;  %v1409_v21 = vpop.f32.mrb[27].mxu0  ;;  %v6748_v28 = vld [vmem:[%s10166_s3 + $0x48] sm:$0xff]   ;;  %v6752_v15 = vld [vmem:[%s10166_s3 + $0x50] sm:$0xff]  }
 0x280   : > { %7180 = vtanh.f32 %v1406_v13  ;;  %v1410_v22 = vadd.f32 %v1409_v21, %v8003_v50  ;;  %v6750_v52 = vld [vmem:[%s10166_s3 + $0x8] sm:$0xff]   ;;  %v10187_v13 = vpack.c.bf16 %v8038_v0, %v8030_v62  ;;  %v6754_v21 = vld [vmem:[%s10166_s3 + $0x10] sm:$0xff]  }
 0x281   : > { %7182 = vtanh.f32 %v1408_v20 }
 0x282   : > { %1943 = vmatpush1.bf16.msra.mxu1 %v7340_v24  ;;  %2022 = vmatpush1.bf16.msra.mxu0 %v7338_v10  ;;  %7184 = vtanh.f32 %v1410_v22  ;;  %v6755_v22 = vld [vmem:[%s10166_s3 + $0x108] sm:$0xff]  }
 0x283   : > { %2023 = vmatprep.subr.bf16.mxu0 %v7339_v44  ;;  %6183 = vmatprep.subr.bf16.mxu1 %v6746_v19  ;;  %v6753_v44 = vld [vmem:[%s10166_s3 + $0x148] sm:$0xff]  }
 0x285   : > { %v8847_v31 = vpop.eup %7170  ;;  %1949 = vmatmul.mubr.bf16.vlgmr.msra.gmra.mrb[36].mxu1 %v1911_v23 }
 0x286   : > { %v8849_v32 = vpop.eup %7172  ;;  %2024 = vmatpush1.bf16.msra.mxu0 %v7340_v24  ;;  %6184 = vmatpush3.bf16.msra.mxu1 %v6747_v25  ;;  %v10188_v24 = vpack.c.bf16 %v8319_v43, %v8311_v41  ;;  %v6756_v25 = vld [vmem:[%s10166_s3 + $0x58] sm:$0xff]   ;;  %v6759_v43 = vld [vmem:[%s10166_s3 + $0x110] sm:$0xff]  }
 0x287   : > { %v8859_v10 = vpop.eup %7174  ;;  %4817 = vmatprep.mubr.bf16.mxu1 %v10187_v13  ;;  %6185 = vmatprep.subr.bf16.mxu1 %v6748_v28  ;;  %v6758_v41 = vld [vmem:[%s10166_s3 + $0x18] sm:$0xff]   ;;  %v6762_v13 = vld [vmem:[%s10166_s3 + $0x20] sm:$0xff]  }
 0x288   : > { %v8867_v33 = vpop.eup %7176  ;;  %6227 = vmatprep.subr.bf16.mxu0 %v6749_v29  ;;  %v1335_v19 = vpack.c.bf16 %v8859_v10, %v8847_v31  ;;  %v6975_v31 = vld [vmem:[%s10166_s3 + $0x800] sm:$0xff]  }
 0x289   : > { %v8874_v20 = vpop.eup %7178  ;;  %2030 = vmatmul.mubr.bf16.vlgmr.msra.gmra.mrb[40].mxu0 %v1991_v34  ;;  %v1336_v62 = vpack.c.bf16 %v8867_v33, %v8849_v32  ;;  %v6947_v32 = vld [vmem:[%s10166_s3 + $0x708] sm:$0xff]   ;;  %v6948_v33 = vld [vmem:[%s10166_s3 + $0x5d8] sm:$0xff]  }
 0x28a   : > { %v8878_v0 = vpop.eup %7180  ;;  %6186 = vmatpush3.bf16.msra.mxu1 %v6750_v52  ;;  %6228 = vmatpush3.bf16.msra.mxu0 %v6751_v9  ;;  %v6760_v52 = vld [vmem:[%s10166_s3 + $0x60] sm:$0xff]   ;;  %v6761_v9 = vld [vmem:[%s10166_s3 + $0x158] sm:$0xff]  }
 0x28b   : > { %v8886_v23 = vpop.eup %7182  ;;  %4899 = vmatprep.mubr.bf16.mxu0 %v10188_v24  ;;  %6187 = vmatprep.subr.bf16.mxu1 %v6752_v15  ;;  %v6763_v15 = vld [vmem:[%s10166_s3 + $0x118] sm:$0xff]   ;;  %v6767_v24 = vld [vmem:[%s10166_s3 + $0x120] sm:$0xff]  }
 0x28c   : > { %v8897_v28 = vpop.eup %7184  ;;  %6229 = vmatprep.subr.bf16.mxu0 %v6753_v44  ;;  %v1416_v29 = vpack.c.bf16 %v8886_v23, %v8874_v20  ;;  %v6764_v44 = vld [vmem:[%s10166_s3 + $0x68] sm:$0xff]   ;;  %v6949_v20 = vld [vmem:[%s10166_s3 + $0x750] sm:$0xff]  }
 0x28d   : > { %v1417_v34 = vpack.c.bf16 %v8897_v28, %v8878_v0  ;;  %v6918_v0 = vld [vmem:[%s10166_s3 + $0x498] sm:$0xff]   ;;  %v6951_v23 = vld [vmem:[%s10166_s3 + $0x710] sm:$0xff]  }
 0x28e   : > { %6188 = vmatpush3.bf16.msra.mxu1 %v6754_v21  ;;  %6230 = vmatpush3.bf16.msra.mxu0 %v6755_v22  ;;  %v6765_v21 = vld [vmem:[%s10166_s3 + $0x160] sm:$0xff]   ;;  %v6766_v22 = vld [vmem:[%s10166_s3 + $0x28] sm:$0xff]  }
 0x28f   : > { %6189 = vmatprep.subr.bf16.mxu1 %v6756_v25  ;;  %6231 = vmatprep.subr.bf16.mxu0 %v6757_v27  ;;  %v6768_v25 = vld [vmem:[%s10166_s3 + $0x70] sm:$0xff]   ;;  %v6769_v27 = vld [vmem:[%s10166_s3 + $0x168] sm:$0xff]  }
 0x292   : > { %6190 = vmatpush3.bf16.msra.mxu1 %v6758_v41  ;;  %6232 = vmatpush3.bf16.msra.mxu0 %v6759_v43  ;;  %v6770_v41 = vld [vmem:[%s10166_s3 + $0x30] sm:$0xff]   ;;  %v6771_v43 = vld [vmem:[%s10166_s3 + $0x128] sm:$0xff]  }
 0x293   : > { %6191 = vmatprep.subr.bf16.mxu1 %v6760_v52  ;;  %6233 = vmatprep.subr.bf16.mxu0 %v6761_v9  ;;  %v6772_v52 = vld [vmem:[%s10166_s3 + $0x78] sm:$0xff]   ;;  %v6773_v9 = vld [vmem:[%s10166_s3 + $0x170] sm:$0xff]  }
 0x296   : > { %6192 = vmatpush3.bf16.msra.mxu1 %v6762_v13  ;;  %6234 = vmatpush3.bf16.msra.mxu0 %v6763_v15  ;;  %v6774_v13 = vld [vmem:[%s10166_s3 + $0x38] sm:$0xff]   ;;  %v6775_v15 = vld [vmem:[%s10166_s3 + $0x130] sm:$0xff]  }
 0x297   : > { %6193 = vmatprep.subr.bf16.mxu1 %v6764_v44  ;;  %6235 = vmatprep.subr.bf16.mxu0 %v6765_v21  ;;  %v6776_v44 = vld [vmem:[%s10166_s3 + $0xc0] sm:$0xff]   ;;  %v6777_v21 = vld [vmem:[%s10166_s3 + $0x178] sm:$0xff]  }
 0x29a   : > { %6194 = vmatpush3.bf16.msra.mxu1 %v6766_v22  ;;  %6236 = vmatpush3.bf16.msra.mxu0 %v6767_v24  ;;  %v6778_v22 = vld [vmem:[%s10166_s3 + $0x80] sm:$0xff]   ;;  %v6779_v24 = vld [vmem:[%s10166_s3 + $0x138] sm:$0xff]  }
 0x29b   : > { %6195 = vmatprep.subr.bf16.mxu1 %v6768_v25  ;;  %6237 = vmatprep.subr.bf16.mxu0 %v6769_v27  ;;  %v6780_v25 = vld [vmem:[%s10166_s3 + $0xc8] sm:$0xff]   ;;  %v6781_v27 = vld [vmem:[%s10166_s3 + $0x240] sm:$0xff]  }
 0x29e   : > { %6196 = vmatpush3.bf16.msra.mxu1 %v6770_v41  ;;  %6238 = vmatpush3.bf16.msra.mxu0 %v6771_v43  ;;  %v10189_v41 = vpack.c.bf16 %v8034_v63, %v8028_v61  ;;  %v10190_v43 = vpack.c.bf16 %v8298_v4, %v8289_v26  ;;  %v6784_v61 = vld [vmem:[%s10166_s3 + $0xd0] sm:$0xff]   ;;  %v6785_v63 = vld [vmem:[%s10166_s3 + $0x248] sm:$0xff]   ;;  %v10191_v26 = vpack.c.bf16 %v8315_v42, %v8305_v39  ;;  %v6790_v42 = vld [vmem:[%s10166_s3 + $0x98] sm:$0xff]  }
 0x29f   : > { %6197 = vmatprep.subr.bf16.mxu1 %v6772_v52  ;;  %6239 = vmatprep.subr.bf16.mxu0 %v6773_v9  ;;  %v6782_v52 = vld [vmem:[%s10166_s3 + $0x88] sm:$0xff]   ;;  %v6783_v9 = vld [vmem:[%s10166_s3 + $0x200] sm:$0xff]   ;;  %v6786_v4 = vld [vmem:[%s10166_s3 + $0x90] sm:$0xff]  }
 0x2a0   : > { %v6789_v39 = vld [vmem:[%s10166_s3 + $0x250] sm:$0xff]  }
 0x2a2   : > { %6198 = vmatpush3.bf16.msra.mxu1 %v6774_v13  ;;  %6240 = vmatpush3.bf16.msra.mxu0 %v6775_v15  ;;  %v10192_v13 = vpack.c.bf16 %v8425_v6, %v8417_v51  ;;  %v6787_v15 = vld [vmem:[%s10166_s3 + $0x208] sm:$0xff]   ;;  %v6791_v51 = vld [vmem:[%s10166_s3 + $0x210] sm:$0xff]   ;;  %v6792_v6 = vld [vmem:[%s10166_s3 + $0xe0] sm:$0xff]  }
 0x2a3   : > { %6205 = vmatprep.subr.bf16.mxu1 %v6776_v44  ;;  %6241 = vmatprep.subr.bf16.mxu0 %v6777_v21  ;;  %v6788_v44 = vld [vmem:[%s10166_s3 + $0xd8] sm:$0xff]  }
 0x2a5   : > { %4818 = vmatmul.mubr.bf16.vlgmr.msra.gmra.mrb[40].mxu1 %v10189_v41 }
 0x2a6   : > { %6206 = vmatpush3.bf16.msra.mxu1 %v6778_v22  ;;  %4858 = vmatprep.mubr.bf16.mxu1 %v10190_v43  ;;  %v6793_v22 = vld [vmem:[%s10166_s3 + $0x258] sm:$0xff]   ;;  %v6794_v43 = vld [vmem:[%s10166_s3 + $0xa0] sm:$0xff]  }
 0x2a7   : > { %6242 = vmatpush3.bf16.msra.mxu0 %v6779_v24  ;;  %6207 = vmatprep.subr.bf16.mxu1 %v6780_v25 }
 0x2a8   : > { %6271 = vmatprep.subr.bf16.mxu0 %v6781_v27 }
 0x2aa   : > { %4900 = vmatmul.mubr.bf16.vlgmr.msra.gmra.mrb[44].mxu0 %v10191_v26  ;;  %6208 = vmatpush3.bf16.msra.mxu1 %v6782_v52 }
 0x2ab   : > { %6272 = vmatpush3.bf16.msra.mxu0 %v6783_v9  ;;  %4981 = vmatprep.mubr.bf16.mxu0 %v10192_v13 }
 0x2ac   : > { %6209 = vmatprep.subr.bf16.mxu1 %v6784_v61  ;;  %6273 = vmatprep.subr.bf16.mxu0 %v6785_v63  ;;  %v6795_v61 = vld [vmem:[%s10166_s3 + $0x218] sm:$0xff]   ;;  %v6796_v63 = vld [vmem:[%s10166_s3 + $0xe8] sm:$0xff]  }
 0x2ae   : > { %6210 = vmatpush3.bf16.msra.mxu1 %v6786_v4  ;;  %v6797_v4 = vld [vmem:[%s10166_s3 + $0x260] sm:$0xff]  }
 0x2af   : > { %6274 = vmatpush3.bf16.msra.mxu0 %v6787_v15  ;;  %6211 = vmatprep.subr.bf16.mxu1 %v6788_v44 }
 0x2b0   : > { %v1484_v21 = vpop.f32.mrb[24].mxu1  ;;  %6275 = vmatprep.subr.bf16.mxu0 %v6789_v39  ;;  %v6798_v39 = vld [vmem:[%s10166_s3 + $0xa8] sm:$0xff]  }
 0x2b1   : > { %v1485_v24 = vadd.f32 %v1484_v21, %v7999_v49  ;;  %v1486_v25 = vpop.f32.mrb[25].mxu1  ;;  %v6800_v21 = vld [vmem:[%s10166_s3 + $0xf0] sm:$0xff]  }
 0x2b2   : > { %v1487_v27 = vadd.f32 %v1486_v25, %v8003_v50  ;;  %v1488_v41 = vpop.f32.mrb[26].mxu1  ;;  %6212 = vmatpush3.bf16.msra.mxu1 %v6790_v42  ;;  %v6801_v25 = vld [vmem:[%s10166_s3 + $0x268] sm:$0xff]  }
 0x2b3   : > { %7186 = vtanh.f32 %v1485_v24  ;;  %v1489_v52 = vadd.f32 %v1488_v41, %v7999_v49  ;;  %6276 = vmatpush3.bf16.msra.mxu0 %v6791_v51  ;;  %v1490_v9 = vpop.f32.mrb[27].mxu1  ;;  %6213 = vmatprep.subr.bf16.mxu1 %v6792_v6  ;;  %v6799_v6 = vld [vmem:[%s10166_s3 + $0x220] sm:$0xff]   ;;  %v6802_v41 = vld [vmem:[%s10166_s3 + $0xb0] sm:$0xff]  }
 0x2b4   : > { %7188 = vtanh.f32 %v1487_v27  ;;  %v1491_v26 = vadd.f32 %v1490_v9, %v8003_v50  ;;  %6277 = vmatprep.subr.bf16.mxu0 %v6793_v22  ;;  %v1555_v13 = vpop.f32.mrb[28].mxu0  ;;  %v6805_v9 = vld [vmem:[%s10166_s3 + $0x270] sm:$0xff]  }
 0x2b5   : > { %7190 = vtanh.f32 %v1489_v52  ;;  %v1556_v15 = vadd.f32 %v1555_v13, %v7999_v49  ;;  %v1557_v44 = vpop.f32.mrb[29].mxu0  ;;  %v6804_v52 = vld [vmem:[%s10166_s3 + $0xf8] sm:$0xff]   ;;  %v6807_v13 = vld [vmem:[%s10166_s3 + $0x230] sm:$0xff]  }
 0x2b6   : > { %7192 = vtanh.f32 %v1491_v26  ;;  %6214 = vmatpush3.bf16.msra.mxu1 %v6794_v43  ;;  %v1558_v42 = vadd.f32 %v1557_v44, %v8003_v50  ;;  %v1559_v51 = vpop.f32.mrb[30].mxu0  ;;  %v6803_v43 = vld [vmem:[%s10166_s3 + $0x228] sm:$0xff]   ;;  %v6806_v26 = vld [vmem:[%s10166_s3 + $0xb8] sm:$0xff]  }
 0x2b7   : > { %6278 = vmatpush3.bf16.msra.mxu0 %v6795_v61  ;;  %6215 = vmatprep.subr.bf16.mxu1 %v6796_v63  ;;  %7194 = vtanh.f32 %v1556_v15  ;;  %v1560_v22 = vadd.f32 %v1559_v51, %v7999_v49  ;;  %v1561_v24 = vpop.f32.mrb[31].mxu0  ;;  %v6808_v15 = vld [vmem:[%s10166_s3 + $0x1c0] sm:$0xff]  }
 0x2b8   : > { %6279 = vmatprep.subr.bf16.mxu0 %v6797_v4  ;;  %7196 = vtanh.f32 %v1558_v42  ;;  %v1562_v27 = vadd.f32 %v1561_v24, %v8003_v50 }
 0x2b9   : > { %7198 = vtanh.f32 %v1560_v22  ;;  %v6810_v22 = vld [vmem:[%s10166_s3 + $0x180] sm:$0xff]  }
 0x2ba   : > { %6216 = vmatpush3.bf16.msra.mxu1 %v6798_v39  ;;  %7200 = vtanh.f32 %v1562_v27  ;;  %v6809_v39 = vld [vmem:[%s10166_s3 + $0x278] sm:$0xff]   ;;  %v6812_v27 = vld [vmem:[%s10166_s3 + $0x1c8] sm:$0xff]  }
 0x2bb   : > { %6280 = vmatpush3.bf16.msra.mxu0 %v6799_v6  ;;  %6217 = vmatprep.subr.bf16.mxu1 %v6800_v21 }
 0x2bc   : > { %6281 = vmatprep.subr.bf16.mxu0 %v6801_v25  ;;  %v6811_v25 = vld [vmem:[%s10166_s3 + $0x238] sm:$0xff]  }
 0x2bd   : > { %v9067_v61 = vpop.eup %7186 }
 0x2be   : > { %v9069_v63 = vpop.eup %7188  ;;  %6218 = vmatpush3.bf16.msra.mxu1 %v6802_v41 }
 0x2bf   : > { %v9074_v4 = vpop.eup %7190  ;;  %6282 = vmatpush3.bf16.msra.mxu0 %v6803_v43  ;;  %6219 = vmatprep.subr.bf16.mxu1 %v6804_v52  ;;  %v6813_v43 = vld [vmem:[%s10166_s3 + $0x340] sm:$0xff]  }
 0x2c0   : > { %v9082_v44 = vpop.eup %7192  ;;  %6283 = vmatprep.subr.bf16.mxu0 %v6805_v9  ;;  %v10193_v9 = vpack.c.bf16 %v8294_v37, %v8285_v7  ;;  %v6816_v7 = vld [vmem:[%s10166_s3 + $0x1d0] sm:$0xff]   ;;  %v6817_v37 = vld [vmem:[%s10166_s3 + $0x348] sm:$0xff]  }
 0x2c1   : > { %v9089_v51 = vpop.eup %7194  ;;  %v1498_v6 = vpack.c.bf16 %v9082_v44, %v9069_v63  ;;  %v6977_v63 = vld [vmem:[%s10166_s3 + $0x848] sm:$0xff]  }
 0x2c2   : > { %v9093_v21 = vpop.eup %7196  ;;  %6220 = vmatpush3.bf16.msra.mxu1 %v6806_v26 }
 0x2c3   : > { %v9098_v24 = vpop.eup %7198  ;;  %6284 = vmatpush3.bf16.msra.mxu0 %v6807_v13  ;;  %6249 = vmatprep.subr.bf16.mxu1 %v6808_v15  ;;  %v10194_v13 = vpack.c.bf16 %v8406_v46, %v8396_v48  ;;  %v6814_v15 = vld [vmem:[%s10166_s3 + $0x188] sm:$0xff]   ;;  %v10195_v48 = vpack.c.bf16 %v8421_v3, %v8411_v56  ;;  %v6818_v46 = vld [vmem:[%s10166_s3 + $0x190] sm:$0xff]   ;;  %v6822_v3 = vld [vmem:[%s10166_s3 + $0x198] sm:$0xff]  }
 0x2c4   : > { %v9106_v41 = vpop.eup %7200  ;;  %6285 = vmatprep.subr.bf16.mxu0 %v6809_v39  ;;  %v1568_v52 = vpack.c.bf16 %v9098_v24, %v9089_v51  ;;  %v6815_v39 = vld [vmem:[%s10166_s3 + $0x300] sm:$0xff]   ;;  %v6821_v56 = vld [vmem:[%s10166_s3 + $0x350] sm:$0xff]   ;;  %v6980_v51 = vld [vmem:[%s10166_s3 + $0x6d8] sm:$0xff]  }
 0x2c5   : > { %4859 = vmatmul.mubr.bf16.vlgmr.msra.gmra.mrb[44].mxu1 %v10193_v9  ;;  %v1569_v26 = vpack.c.bf16 %v9106_v41, %v9093_v21  ;;  %v6824_v9 = vld [vmem:[%s10166_s3 + $0x1e0] sm:$0xff]   ;;  %v6953_v21 = vld [vmem:[%s10166_s3 + $0x758] sm:$0xff]  }
 0x2c6   : > { %6250 = vmatpush3.bf16.msra.mxu1 %v6810_v22  ;;  %4940 = vmatprep.mubr.bf16.mxu1 %v10194_v13  ;;  %v10196_v22 = vld [vmem:[#allocation10_spill] sm:$0xff]  ;;  %v6954_v41 = vld [vmem:[%s10166_s3 + $0x5a0] sm:$0xff]  }
 0x2c7   : > { %6286 = vmatpush3.bf16.msra.mxu0 %v6811_v25  ;;  %6251 = vmatprep.subr.bf16.mxu1 %v6812_v27  ;;  %v10197_v25 = vpack.c.bf16 %v8530_v1, %v10196_v22  ;;  %v6819_v27 = vld [vmem:[%s10166_s3 + $0x308] sm:$0xff]   ;;  %v6823_v1 = vld [vmem:[%s10166_s3 + $0x310] sm:$0xff]   ;;  %v6825_v13 = vld [vmem:[%s10166_s3 + $0x358] sm:$0xff]  }
 0x2c8   : > { %6315 = vmatprep.subr.bf16.mxu0 %v6813_v43  ;;  %v6820_v43 = vld [vmem:[%s10166_s3 + $0x1d8] sm:$0xff]   ;;  %v6832_v22 = vld [vmem:[%s10166_s3 + $0x1f0] sm:$0xff]  }
 0x2ca   : > { %4982 = vmatmul.mubr.bf16.vlgmr.msra.gmra.mrb[48].mxu0 %v10195_v48  ;;  %6252 = vmatpush3.bf16.msra.mxu1 %v6814_v15  ;;  %v6826_v15 = vld [vmem:[%s10166_s3 + $0x1a0] sm:$0xff]   ;;  %v6830_v48 = vld [vmem:[%s10166_s3 + $0x1a8] sm:$0xff]  }
 0x2cb   : > { %6316 = vmatpush3.bf16.msra.mxu0 %v6815_v39  ;;  %5063 = vmatprep.mubr.bf16.mxu0 %v10197_v25  ;;  %v6827_v39 = vld [vmem:[%s10166_s3 + $0x318] sm:$0xff]   ;;  %v6833_v25 = vld [vmem:[%s10166_s3 + $0x368] sm:$0xff]  }
 0x2cc   : > { %6253 = vmatprep.subr.bf16.mxu1 %v6816_v7  ;;  %6317 = vmatprep.subr.bf16.mxu0 %v6817_v37  ;;  %v6828_v7 = vld [vmem:[%s10166_s3 + $0x1e8] sm:$0xff]   ;;  %v6829_v37 = vld [vmem:[%s10166_s3 + $0x360] sm:$0xff]  }
 0x2ce   : > { %6254 = vmatpush3.bf16.msra.mxu1 %v6818_v46  ;;  %v6831_v46 = vld [vmem:[%s10166_s3 + $0x320] sm:$0xff]  }
 0x2cf   : > { %6318 = vmatpush3.bf16.msra.mxu0 %v6819_v27  ;;  %6255 = vmatprep.subr.bf16.mxu1 %v6820_v43  ;;  %v6834_v27 = vld [vmem:[%s10166_s3 + $0x1b0] sm:$0xff]   ;;  %v6835_v43 = vld [vmem:[%s10166_s3 + $0x328] sm:$0xff]  }
 0x2d0   : > { %6319 = vmatprep.subr.bf16.mxu0 %v6821_v56  ;;  %v6836_v56 = vld [vmem:[%s10166_s3 + $0x1f8] sm:$0xff]  }
 0x2d2   : > { %6256 = vmatpush3.bf16.msra.mxu1 %v6822_v3  ;;  %v6837_v3 = vld [vmem:[%s10166_s3 + $0x370] sm:$0xff]  }
 0x2d3   : > { %6320 = vmatpush3.bf16.msra.mxu0 %v6823_v1  ;;  %6257 = vmatprep.subr.bf16.mxu1 %v6824_v9  ;;  %v6838_v1 = vld [vmem:[%s10166_s3 + $0x1b8] sm:$0xff]   ;;  %v6839_v9 = vld [vmem:[%s10166_s3 + $0x330] sm:$0xff]  }
 0x2d4   : > { %6321 = vmatprep.subr.bf16.mxu0 %v6825_v13  ;;  %v6840_v13 = vld [vmem:[%s10166_s3 + $0x2c0] sm:$0xff]  }
 0x2d6   : > { %6258 = vmatpush3.bf16.msra.mxu1 %v6826_v15  ;;  %v6841_v15 = vld [vmem:[%s10166_s3 + $0x378] sm:$0xff]  }
 0x2d7   : > { %6322 = vmatpush3.bf16.msra.mxu0 %v6827_v39  ;;  %6259 = vmatprep.subr.bf16.mxu1 %v6828_v7  ;;  %v6842_v39 = vld [vmem:[%s10166_s3 + $0x280] sm:$0xff]   ;;  %v6843_v7 = vld [vmem:[%s10166_s3 + $0x338] sm:$0xff]  }
 0x2d8   : > { %6323 = vmatprep.subr.bf16.mxu0 %v6829_v37  ;;  %v6844_v37 = vld [vmem:[%s10166_s3 + $0x2c8] sm:$0xff]  }
 0x2da   : > { %6260 = vmatpush3.bf16.msra.mxu1 %v6830_v48  ;;  %v6845_v48 = vld [vmem:[%s10166_s3 + $0x440] sm:$0xff]  }
 0x2db   : > { %6324 = vmatpush3.bf16.msra.mxu0 %v6831_v46  ;;  %6261 = vmatprep.subr.bf16.mxu1 %v6832_v22  ;;  %v10198_v46 = vld [vmem:[#allocation4_spill] sm:$0xff]  ;;  %v10199_v22 = vld [vmem:[#allocation3_spill] sm:$0xff] }
 0x2dc   : > { %6325 = vmatprep.subr.bf16.mxu0 %v6833_v25  ;;  %v10200_v25 = vpack.c.bf16 %v10198_v46, %v10199_v22  ;;  %v10205_v22 = vld [vmem:[#allocation9_spill] sm:$0xff] }
 0x2de   : > { %6262 = vmatpush3.bf16.msra.mxu1 %v6834_v27  ;;  %v10201_v27 = vld [vmem:[#allocation8_spill] sm:$0xff] }
 0x2df   : > { %6326 = vmatpush3.bf16.msra.mxu0 %v6835_v43  ;;  %6263 = vmatprep.subr.bf16.mxu1 %v6836_v56  ;;  %v10202_v43 = vld [vmem:[#allocation6_spill] sm:$0xff] }
 0x2e0   : > { %6327 = vmatprep.subr.bf16.mxu0 %v6837_v3  ;;  %v10203_v56 = vpack.c.bf16 %v10201_v27, %v10202_v43  ;;  %v6846_v3 = vld [vmem:[%s10166_s3 + $0x288] sm:$0xff]  }
 0x2e2   : > { %6264 = vmatpush3.bf16.msra.mxu1 %v6838_v1  ;;  %v6847_v1 = vld [vmem:[%s10166_s3 + $0x400] sm:$0xff]  }
 0x2e3   : > { %6328 = vmatpush3.bf16.msra.mxu0 %v6839_v9  ;;  %6293 = vmatprep.subr.bf16.mxu1 %v6840_v13  ;;  %v6848_v13 = vld [vmem:[%s10166_s3 + $0x2d0] sm:$0xff]  }
 0x2e4   : > { %6329 = vmatprep.subr.bf16.mxu0 %v6841_v15  ;;  %v6849_v15 = vld [vmem:[%s10166_s3 + $0x448] sm:$0xff]  }
 0x2e5   : > { %4941 = vmatmul.mubr.bf16.vlgmr.msra.gmra.mrb[48].mxu1 %v10200_v25 }
 0x2e6   : > { %6294 = vmatpush3.bf16.msra.mxu1 %v6842_v39  ;;  %5022 = vmatprep.mubr.bf16.mxu1 %v10203_v56 }
 0x2e7   : > { %6330 = vmatpush3.bf16.msra.mxu0 %v6843_v7  ;;  %6295 = vmatprep.subr.bf16.mxu1 %v6844_v37  ;;  %v10204_v37 = vld [vmem:[#allocation11_spill] sm:$0xff] }
 0x2e8   : > { %v1636_v9 = vpop.f32.mrb[28].mxu1  ;;  %6359 = vmatprep.subr.bf16.mxu0 %v6845_v48  ;;  %v10206_v25 = vpack.c.bf16 %v10204_v37, %v10205_v22  ;;  %v6850_v48 = vld [vmem:[%s10166_s3 + $0x290] sm:$0xff]  }
 0x2e9   : > { %v1637_v39 = vadd.f32 %v1636_v9, %v7999_v49  ;;  %v1638_v46 = vpop.f32.mrb[29].mxu1  ;;  %v6851_v9 = vld [vmem:[%s10166_s3 + $0x408] sm:$0xff]  }
 0x2ea   : > { %v1639_v7 = vadd.f32 %v1638_v46, %v8003_v50  ;;  %5064 = vmatmul.mubr.bf16.vlgmr.msra.gmra.mrb[52].mxu0 %v10206_v25  ;;  %v1640_v27 = vpop.f32.mrb[30].mxu1  ;;  %6296 = vmatpush3.bf16.msra.mxu1 %v6846_v3  ;;  %v6852_v3 = vld [vmem:[%s10166_s3 + $0x2d8] sm:$0xff]  }
 0x2eb   : > { %7202 = vtanh.f32 %v1637_v39  ;;  %v1641_v43 = vadd.f32 %v1640_v27, %v7999_v49  ;;  %6360 = vmatpush3.bf16.msra.mxu0 %v6847_v1  ;;  %5145 = vmatprep.mubr.bf16.mxu0 %v1103_v2  ;;  %v1642_v56 = vpop.f32.mrb[31].mxu1  ;;  %v6853_v1 = vld [vmem:[%s10166_s3 + $0x450] sm:$0xff]   ;;  %v6854_v39 = vld [vmem:[%s10166_s3 + $0x298] sm:$0xff]  }
 0x2ec   : > { %7204 = vtanh.f32 %v1639_v7  ;;  %v1643_v46 = vadd.f32 %v1642_v56, %v8003_v50  ;;  %6297 = vmatprep.subr.bf16.mxu1 %v6848_v13  ;;  %6361 = vmatprep.subr.bf16.mxu0 %v6849_v15  ;;  %v1717_v30 = vpop.f32.mrb[32].mxu0  ;;  %v6855_v13 = vld [vmem:[%s10166_s3 + $0x410] sm:$0xff]   ;;  %v6856_v15 = vld [vmem:[%s10166_s3 + $0x2e0] sm:$0xff]   ;;  %v6857_v27 = vld [vmem:[%s10166_s3 + $0x458] sm:$0xff]  }
 0x2ed   : > { %7206 = vtanh.f32 %v1641_v43  ;;  %v1718_v58 = vadd.f32 %v1717_v30, %v7999_v49  ;;  %v1719_v2 = vpop.f32.mrb[33].mxu0  ;;  %v6858_v43 = vld [vmem:[%s10166_s3 + $0x2a0] sm:$0xff]   ;;  %v6859_v56 = vld [vmem:[%s10166_s3 + $0x418] sm:$0xff]   ;;  %v6862_v30 = vld [vmem:[%s10166_s3 + $0x2a8] sm:$0xff]  }
 0x2ee   : > { %7208 = vtanh.f32 %v1643_v46  ;;  %6298 = vmatpush3.bf16.msra.mxu1 %v6850_v48  ;;  %v1720_v7 = vadd.f32 %v1719_v2, %v8003_v50  ;;  %v1721_v37 = vpop.f32.mrb[34].mxu0  ;;  %v6863_v2 = vld [vmem:[%s10166_s3 + $0x420] sm:$0xff]  }
 0x2ef   : > { %6362 = vmatpush3.bf16.msra.mxu0 %v6851_v9  ;;  %6299 = vmatprep.subr.bf16.mxu1 %v6852_v3  ;;  %7210 = vtanh.f32 %v1718_v58  ;;  %v1722_v22 = vadd.f32 %v1721_v37, %v7999_v49  ;;  %v1723_v25 = vpop.f32.mrb[35].mxu0  ;;  %v6860_v9 = vld [vmem:[%s10166_s3 + $0x2e8] sm:$0xff]   ;;  %v6861_v3 = vld [vmem:[%s10166_s3 + $0x460] sm:$0xff]  }
 0x2f0   : > { %6363 = vmatprep.subr.bf16.mxu0 %v6853_v1  ;;  %7212 = vtanh.f32 %v1720_v7  ;;  %v1724_v48 = vadd.f32 %v1723_v25, %v8003_v50  ;;  %v6865_v37 = vld [vmem:[%s10166_s3 + $0x468] sm:$0xff]  }
 0x2f1   : > { %7214 = vtanh.f32 %v1722_v22  ;;  %v10208_v22 = vld [vmem:[#allocation5_spill] sm:$0xff] }
 0x2f2   : > { %6300 = vmatpush3.bf16.msra.mxu1 %v6854_v39  ;;  %7216 = vtanh.f32 %v1724_v48  ;;  %v6864_v39 = vld [vmem:[%s10166_s3 + $0x2f0] sm:$0xff]  }
 0x2f3   : > { %6364 = vmatpush3.bf16.msra.mxu0 %v6855_v13  ;;  %6301 = vmatprep.subr.bf16.mxu1 %v6856_v15  ;;  %v6872_v13 = vld [vmem:[%s10166_s3 + $0x3c0] sm:$0xff]  }
 0x2f4   : > { %6365 = vmatprep.subr.bf16.mxu0 %v6857_v27  ;;  %v6866_v27 = vld [vmem:[%s10166_s3 + $0x2b0] sm:$0xff]  }
 0x2f5   : > { %v9291_v46 = vpop.eup %7202 }
 0x2f6   : > { %v9293_v1 = vpop.eup %7204  ;;  %6302 = vmatpush3.bf16.msra.mxu1 %v6858_v43  ;;  %v6867_v43 = vld [vmem:[%s10166_s3 + $0x428] sm:$0xff]  }
 0x2f7   : > { %v9298_v58 = vpop.eup %7206  ;;  %6366 = vmatpush3.bf16.msra.mxu0 %v6859_v56  ;;  %6303 = vmatprep.subr.bf16.mxu1 %v6860_v9  ;;  %v6868_v56 = vld [vmem:[%s10166_s3 + $0x2f8] sm:$0xff]  }
 0x2f8   : > { %v9306_v7 = vpop.eup %7208  ;;  %6367 = vmatprep.subr.bf16.mxu0 %v6861_v3  ;;  %v6869_v3 = vld [vmem:[%s10166_s3 + $0x470] sm:$0xff]  }
 0x2f9   : > { %v9313_v15 = vpop.eup %7210 }
 0x2fa   : > { %v9317_v25 = vpop.eup %7212  ;;  %6304 = vmatpush3.bf16.msra.mxu1 %v6862_v30  ;;  %v6873_v30 = vld [vmem:[%s10166_s3 + $0x478] sm:$0xff]  }
 0x2fb   : > { %v9322_v48 = vpop.eup %7214  ;;  %6368 = vmatpush3.bf16.msra.mxu0 %v6863_v2  ;;  %6305 = vmatprep.subr.bf16.mxu1 %v6864_v39  ;;  %v6870_v39 = vld [vmem:[%s10166_s3 + $0x2b8] sm:$0xff]  }
 0x2fc   : > { %v9330_v9 = vpop.eup %7216  ;;  %6369 = vmatprep.subr.bf16.mxu0 %v6865_v37  ;;  %v6871_v37 = vld [vmem:[%s10166_s3 + $0x430] sm:$0xff]  }
 0x2fd   : > { %v1731_v2 = vpack.c.bf16 %v9330_v9, %v9317_v25 }
 0x2fe   : > { %6306 = vmatpush3.bf16.msra.mxu1 %v6866_v27  ;;  %v6874_v27 = vld [vmem:[%s10166_s3 + $0x380] sm:$0xff]  }
 0x2ff   : > { %6370 = vmatpush3.bf16.msra.mxu0 %v6867_v43  ;;  %6307 = vmatprep.subr.bf16.mxu1 %v6868_v56  ;;  %v6875_v43 = vld [vmem:[%s10166_s3 + $0x438] sm:$0xff]   ;;  %v6876_v56 = vld [vmem:[%s10166_s3 + $0x3c8] sm:$0xff]  }
 0x300   : > { %6371 = vmatprep.subr.bf16.mxu0 %v6869_v3  ;;  %v6877_v3 = vld [vmem:[%s10166_s3 + $0x540] sm:$0xff]  }
 0x302   : > { %6308 = vmatpush3.bf16.msra.mxu1 %v6870_v39  ;;  %v10207_v39 = vld [vmem:[#allocation7_spill] sm:$0xff] }
 0x303   : > { %6372 = vmatpush3.bf16.msra.mxu0 %v6871_v37  ;;  %6337 = vmatprep.subr.bf16.mxu1 %v6872_v13  ;;  %v10209_v42 = vpack.c.bf16 %v10207_v39, %v10208_v22  ;;  %v6878_v13 = vld [vmem:[%s10166_s3 + $0x388] sm:$0xff]   ;;  %v6884_v22 = vld [vmem:[%s10166_s3 + $0x3d8] sm:$0xff]   ;;  %v6896_v39 = vld [vmem:[%s10166_s3 + $0x3f0] sm:$0xff]  }
 0x304   : > { %6373 = vmatprep.subr.bf16.mxu0 %v6873_v30  ;;  %v6879_v30 = vld [vmem:[%s10166_s3 + $0x500] sm:$0xff]   ;;  %v6891_v37 = vld [vmem:[%s10166_s3 + $0x518] sm:$0xff]  }
 0x305   : > { %5023 = vmatmul.mubr.bf16.vlgmr.msra.gmra.mrb[52].mxu1 %v10209_v42  ;;  %v6880_v42 = vld [vmem:[%s10166_s3 + $0x3d0] sm:$0xff]  }
 0x306   : > { %6338 = vmatpush3.bf16.msra.mxu1 %v6874_v27  ;;  %5104 = vmatprep.mubr.bf16.mxu1 %v1022_v36  ;;  %v6883_v36 = vld [vmem:[%s10166_s3 + $0x508] sm:$0xff]  }
 0x307   : > { %6374 = vmatpush3.bf16.msra.mxu0 %v6875_v43  ;;  %6339 = vmatprep.subr.bf16.mxu1 %v6876_v56  ;;  %v6892_v27 = vld [vmem:[%s10166_s3 + $0x3e8] sm:$0xff]   ;;  %v6893_v43 = vld [vmem:[%s10166_s3 + $0x560] sm:$0xff]  }
 0x308   : > { %6403 = vmatprep.subr.bf16.mxu0 %v6877_v3  ;;  %v6894_v56 = vld [vmem:[%s10166_s3 + $0x3a8] sm:$0xff]   ;;  %v6895_v3 = vld [vmem:[%s10166_s3 + $0x520] sm:$0xff]  }
 0x30a   : > { %5146 = vmatmul.mubr.bf16.vlgmr.msra.gmra.mrb[56].mxu0 %v1102_v45  ;;  %6340 = vmatpush3.bf16.msra.mxu1 %v6878_v13  ;;  %v6887_v45 = vld [vmem:[%s10166_s3 + $0x510] sm:$0xff]   ;;  %v6897_v13 = vld [vmem:[%s10166_s3 + $0x568] sm:$0xff]  }
 0x30b   : > { %6404 = vmatpush3.bf16.msra.mxu0 %v6879_v30  ;;  %5227 = vmatprep.mubr.bf16.mxu0 %v1255_v18  ;;  %v6890_v18 = vld [vmem:[%s10166_s3 + $0x3a0] sm:$0xff]   ;;  %v6898_v30 = vld [vmem:[%s10166_s3 + $0x3b0] sm:$0xff]  }
 0x30c   : > { %6341 = vmatprep.subr.bf16.mxu1 %v6880_v42  ;;  %6405 = vmatprep.subr.bf16.mxu0 %v6881_v60  ;;  %v6899_v42 = vld [vmem:[%s10166_s3 + $0x528] sm:$0xff]   ;;  %v6900_v60 = vld [vmem:[%s10166_s3 + $0x3f8] sm:$0xff]  }
 0x30e   : > { %6342 = vmatpush3.bf16.msra.mxu1 %v6882_v57  ;;  %v6901_v57 = vld [vmem:[%s10166_s3 + $0x570] sm:$0xff]  }
 0x30f   : > { %6406 = vmatpush3.bf16.msra.mxu0 %v6883_v36  ;;  %6343 = vmatprep.subr.bf16.mxu1 %v6884_v22  ;;  %v6902_v36 = vld [vmem:[%s10166_s3 + $0x3b8] sm:$0xff]   ;;  %v6903_v22 = vld [vmem:[%s10166_s3 + $0x530] sm:$0xff]  }
 0x310   : > { %6407 = vmatprep.subr.bf16.mxu0 %v6885_v54  ;;  %v6904_v54 = vld [vmem:[%s10166_s3 + $0x4c0] sm:$0xff]  }
 0x312   : > { %6344 = vmatpush3.bf16.msra.mxu1 %v6886_v38 }
 0x313   : > { %6408 = vmatpush3.bf16.msra.mxu0 %v6887_v45  ;;  %6345 = vmatprep.subr.bf16.mxu1 %v6888_v5  ;;  %v6905_v45 = vld [vmem:[%s10166_s3 + $0x578] sm:$0xff]  }
 0x314   : > { %6409 = vmatprep.subr.bf16.mxu0 %v6889_v16 }
 0x316   : > { %6346 = vmatpush3.bf16.msra.mxu1 %v6890_v18 }
 0x317   : > { %6410 = vmatpush3.bf16.msra.mxu0 %v6891_v37  ;;  %6347 = vmatprep.subr.bf16.mxu1 %v6892_v27  ;;  %v6906_v27 = vld [vmem:[%s10166_s3 + $0x480] sm:$0xff]  }
 0x318   : > { %6411 = vmatprep.subr.bf16.mxu0 %v6893_v43 }
 0x31a   : > { %6348 = vmatpush3.bf16.msra.mxu1 %v6894_v56 }
 0x31b   : > { %6412 = vmatpush3.bf16.msra.mxu0 %v6895_v3  ;;  %6349 = vmatprep.subr.bf16.mxu1 %v6896_v39  ;;  %v6907_v3 = vld [vmem:[%s10166_s3 + $0x538] sm:$0xff]   ;;  %v6908_v39 = vld [vmem:[%s10166_s3 + $0x4c8] sm:$0xff]  }
 0x31c   : > { %6413 = vmatprep.subr.bf16.mxu0 %v6897_v13 }
 0x31e   : > { %6350 = vmatpush3.bf16.msra.mxu1 %v6898_v30  ;;  %v6909_v30 = vld [vmem:[%s10166_s3 + $0x640] sm:$0xff]  }
 0x31f   : > { %6414 = vmatpush3.bf16.msra.mxu0 %v6899_v42  ;;  %6351 = vmatprep.subr.bf16.mxu1 %v6900_v60  ;;  %v10210_v60 = vpack.c.bf16 %v8615_v8, %v8600_v47  ;;  %v6911_v47 = vld [vmem:[%s10166_s3 + $0x600] sm:$0xff]  }
 0x320   : > { %v1798_v38 = vpop.f32.mrb[32].mxu1  ;;  %6415 = vmatprep.subr.bf16.mxu0 %v6901_v57 }
 0x321   : > { %v1799_v5 = vadd.f32 %v1798_v38, %v7999_v49  ;;  %v1800_v16 = vpop.f32.mrb[33].mxu1 }
 0x322   : > { %v1801_v18 = vadd.f32 %v1800_v16, %v8003_v50  ;;  %v1802_v37 = vpop.f32.mrb[34].mxu1  ;;  %6352 = vmatpush3.bf16.msra.mxu1 %v6902_v36  ;;  %v6915_v16 = vld [vmem:[%s10166_s3 + $0x608] sm:$0xff]  }
 0x323   : > { %7218 = vtanh.f32 %v1799_v5  ;;  %v1803_v43 = vadd.f32 %v1802_v37, %v7999_v49  ;;  %6416 = vmatpush3.bf16.msra.mxu0 %v6903_v22  ;;  %v1804_v56 = vpop.f32.mrb[35].mxu1  ;;  %6381 = vmatprep.subr.bf16.mxu1 %v6904_v54  ;;  %v6910_v22 = vld [vmem:[%s10166_s3 + $0x488] sm:$0xff]   ;;  %v6914_v5 = vld [vmem:[%s10166_s3 + $0x490] sm:$0xff]   ;;  %v6920_v37 = vld [vmem:[%s10166_s3 + $0x4e0] sm:$0xff]  }
 0x324   : > { %7220 = vtanh.f32 %v1801_v18  ;;  %v1805_v13 = vadd.f32 %v1804_v56, %v8003_v50  ;;  %6417 = vmatprep.subr.bf16.mxu0 %v6905_v45  ;;  %v1879_v42 = vpop.f32.mrb[36].mxu0 }
 0x325   : > { %7222 = vtanh.f32 %v1803_v43  ;;  %5105 = vmatmul.mubr.bf16.vlgmr.msra.gmra.mrb[56].mxu1 %v10210_v60  ;;  %v1880_v57 = vadd.f32 %v1879_v42, %v7999_v49  ;;  %v1881_v36 = vpop.f32.mrb[37].mxu0  ;;  %v6921_v43 = vld [vmem:[%s10166_s3 + $0x658] sm:$0xff]  }
 0x326   : > { %7224 = vtanh.f32 %v1805_v13  ;;  %6382 = vmatpush3.bf16.msra.mxu1 %v6906_v27  ;;  %5186 = vmatprep.mubr.bf16.mxu1 %v1184_v12  ;;  %v1882_v54 = vadd.f32 %v1881_v36, %v8003_v50  ;;  %v1883_v38 = vpop.f32.mrb[38].mxu0  ;;  %v6923_v60 = vld [vmem:[%s10166_s3 + $0x618] sm:$0xff]  }
 0x327   : > { %6418 = vmatpush3.bf16.msra.mxu0 %v6907_v3  ;;  %6383 = vmatprep.subr.bf16.mxu1 %v6908_v39  ;;  %7226 = vtanh.f32 %v1880_v57  ;;  %v1884_v8 = vadd.f32 %v1883_v38, %v7999_v49  ;;  %v1885_v45 = vpop.f32.mrb[39].mxu0  ;;  %v6924_v57 = vld [vmem:[%s10166_s3 + $0x4e8] sm:$0xff]  }
 0x328   : > { %6447 = vmatprep.subr.bf16.mxu0 %v6909_v30  ;;  %7228 = vtanh.f32 %v1882_v54  ;;  %v1886_v12 = vadd.f32 %v1885_v45, %v8003_v50  ;;  %v6922_v30 = vld [vmem:[%s10166_s3 + $0x4a0] sm:$0xff]   ;;  %v6928_v45 = vld [vmem:[%s10166_s3 + $0x4f0] sm:$0xff]  }
 0x329   : > { %7230 = vtanh.f32 %v1884_v8  ;;  %v6927_v8 = vld [vmem:[%s10166_s3 + $0x620] sm:$0xff]  }
 0x32a   : > { %5228 = vmatmul.mubr.bf16.vlgmr.msra.gmra.mrb[60].mxu0 %v1254_v17  ;;  %6384 = vmatpush3.bf16.msra.mxu1 %v6910_v22  ;;  %7232 = vtanh.f32 %v1886_v12  ;;  %v6925_v22 = vld [vmem:[%s10166_s3 + $0x660] sm:$0xff]   ;;  %v6931_v12 = vld [vmem:[%s10166_s3 + $0x628] sm:$0xff]  }
 0x32b   : > { %6448 = vmatpush3.bf16.msra.mxu0 %v6911_v47  ;;  %5309 = vmatprep.mubr.bf16.mxu0 %v1417_v34  ;;  %v6919_v34 = vld [vmem:[%s10166_s3 + $0x610] sm:$0xff]   ;;  %v6926_v47 = vld [vmem:[%s10166_s3 + $0x4a8] sm:$0xff]  }
 0x32c   : > { %6385 = vmatprep.subr.bf16.mxu1 %v6912_v40  ;;  %6449 = vmatprep.subr.bf16.mxu0 %v6913_v53  ;;  %v6929_v40 = vld [vmem:[%s10166_s3 + $0x668] sm:$0xff]   ;;  %v6930_v53 = vld [vmem:[%s10166_s3 + $0x4b0] sm:$0xff]  }
 0x32d   : > { %v9515_v17 = vpop.eup %7218 }
 0x32e   : > { %v9517_v18 = vpop.eup %7220  ;;  %6386 = vmatpush3.bf16.msra.mxu1 %v6914_v5  ;;  %v6932_v5 = vld [vmem:[%s10166_s3 + $0x4f8] sm:$0xff]  }
 0x32f   : > { %v9522_v28 = vpop.eup %7222  ;;  %6450 = vmatpush3.bf16.msra.mxu0 %v6915_v16  ;;  %6387 = vmatprep.subr.bf16.mxu1 %v6916_v11  ;;  %v6933_v16 = vld [vmem:[%s10166_s3 + $0x670] sm:$0xff]   ;;  %v6934_v11 = vld [vmem:[%s10166_s3 + $0x4b8] sm:$0xff]  }
 0x330   : > { %v9530_v27 = vpop.eup %7224  ;;  %6451 = vmatprep.subr.bf16.mxu0 %v6917_v14  ;;  %v1811_v56 = vpack.c.bf16 %v9522_v28, %v9515_v17  ;;  %v6935_v14 = vld [vmem:[%s10166_s3 + $0x630] sm:$0xff]   ;;  %v7072_v28 = vld [vmem:[%s10166_s3 + $0x9d8] sm:$0xff]  }
 0x331   : > { %v9537_v3 = vpop.eup %7226  ;;  %v1812_v39 = vpack.c.bf16 %v9530_v27, %v9517_v18  ;;  %v7042_v18 = vld [vmem:[%s10166_s3 + $0x890] sm:$0xff]   ;;  %v7043_v27 = vld [vmem:[%s10166_s3 + $0xa08] sm:$0xff]  }
 0x332   : > { %v9541_v13 = vpop.eup %7228  ;;  %6388 = vmatpush3.bf16.msra.mxu1 %v6918_v0  ;;  %v6936_v0 = vld [vmem:[%s10166_s3 + $0x5c0] sm:$0xff]   ;;  %v7071_v17 = vld [vmem:[%s10166_s3 + $0x990] sm:$0xff]  }
 0x333   : > { %v9546_v42 = vpop.eup %7230  ;;  %6452 = vmatpush3.bf16.msra.mxu0 %v6919_v34  ;;  %6389 = vmatprep.subr.bf16.mxu1 %v6920_v37  ;;  %v6937_v34 = vld [vmem:[%s10166_s3 + $0x678] sm:$0xff]   ;;  %v6938_v37 = vld [vmem:[%s10166_s3 + $0x580] sm:$0xff]  }
 0x334   : > { %v9554_v36 = vpop.eup %7232  ;;  %6453 = vmatprep.subr.bf16.mxu0 %v6921_v43  ;;  %v1892_v54 = vpack.c.bf16 %v9546_v42, %v9537_v3  ;;  %v6939_v43 = vld [vmem:[%s10166_s3 + $0x638] sm:$0xff]   ;;  %v7045_v3 = vld [vmem:[%s10166_s3 + $0xa50] sm:$0xff]  }
 0x335   : > { %v1893_v38 = vpack.c.bf16 %v9554_v36, %v9541_v13  ;;  %v7015_v13 = vld [vmem:[%s10166_s3 + $0x910] sm:$0xff]   ;;  %v7016_v36 = vld [vmem:[%s10166_s3 + $0x7e0] sm:$0xff]   ;;  %v7046_v42 = vld [vmem:[%s10166_s3 + $0x898] sm:$0xff]  }
 0x336   : > { %6390 = vmatpush3.bf16.msra.mxu1 %v6922_v30  ;;  %v6940_v30 = vld [vmem:[%s10166_s3 + $0x5c8] sm:$0xff]  }
 0x337   : > { %6454 = vmatpush3.bf16.msra.mxu0 %v6923_v60  ;;  %6391 = vmatprep.subr.bf16.mxu1 %v6924_v57  ;;  %v6941_v60 = vld [vmem:[%s10166_s3 + $0x740] sm:$0xff]   ;;  %v6942_v57 = vld [vmem:[%s10166_s3 + $0x588] sm:$0xff]  }
 0x338   : > { %6455 = vmatprep.subr.bf16.mxu0 %v6925_v22  ;;  %v6943_v22 = vld [vmem:[%s10166_s3 + $0x700] sm:$0xff]  }
 0x33a   : > { %6392 = vmatpush3.bf16.msra.mxu1 %v6926_v47  ;;  %v6956_v47 = vld [vmem:[%s10166_s3 + $0x5e8] sm:$0xff]  }
 0x33b   : > { %6456 = vmatpush3.bf16.msra.mxu0 %v6927_v8  ;;  %6393 = vmatprep.subr.bf16.mxu1 %v6928_v45  ;;  %v6957_v8 = vld [vmem:[%s10166_s3 + $0x760] sm:$0xff]   ;;  %v6958_v45 = vld [vmem:[%s10166_s3 + $0x5a8] sm:$0xff]  }
 0x33c   : > { %6457 = vmatprep.subr.bf16.mxu0 %v6929_v40  ;;  %v6959_v40 = vld [vmem:[%s10166_s3 + $0x720] sm:$0xff]  }
 0x33e   : > { %6394 = vmatpush3.bf16.msra.mxu1 %v6930_v53  ;;  %v6960_v53 = vld [vmem:[%s10166_s3 + $0x5f0] sm:$0xff]  }
 0x33f   : > { %6458 = vmatpush3.bf16.msra.mxu0 %v6931_v12  ;;  %6395 = vmatprep.subr.bf16.mxu1 %v6932_v5  ;;  %v6961_v5 = vld [vmem:[%s10166_s3 + $0x768] sm:$0xff]  }
 0x340   : > { %6459 = vmatprep.subr.bf16.mxu0 %v6933_v16 }
 0x342   : > { %6396 = vmatpush3.bf16.msra.mxu1 %v6934_v11 }
 0x343   : > { %6460 = vmatpush3.bf16.msra.mxu0 %v6935_v14  ;;  %6425 = vmatprep.subr.bf16.mxu1 %v6936_v0 }
 0x344   : > { %6461 = vmatprep.subr.bf16.mxu0 %v6937_v34  ;;  %v6962_v34 = vld [vmem:[%s10166_s3 + $0x5b0] sm:$0xff]  }
 0x345   : > { %5187 = vmatmul.mubr.bf16.vlgmr.msra.gmra.mrb[60].mxu1 %v1183_v59  ;;  %v6946_v59 = vld [vmem:[%s10166_s3 + $0x590] sm:$0xff]  }
 0x346   : > { %6426 = vmatpush3.bf16.msra.mxu1 %v6938_v37  ;;  %5268 = vmatprep.mubr.bf16.mxu1 %v1336_v62  ;;  %v6950_v62 = vld [vmem:[%s10166_s3 + $0x598] sm:$0xff]  }
 0x347   : > { %6462 = vmatpush3.bf16.msra.mxu0 %v6939_v43  ;;  %6427 = vmatprep.subr.bf16.mxu1 %v6940_v30  ;;  %v6963_v30 = vld [vmem:[%s10166_s3 + $0x728] sm:$0xff]  }
 0x348   : > { %6491 = vmatprep.subr.bf16.mxu0 %v6941_v60  ;;  %v6964_v60 = vld [vmem:[%s10166_s3 + $0x5f8] sm:$0xff]  }
 0x34a   : > { %5310 = vmatmul.mubr.bf16.vlgmr.msra.gmra.mrb[64].mxu0 %v1416_v29  ;;  %6428 = vmatpush3.bf16.msra.mxu1 %v6942_v57  ;;  %v6952_v29 = vld [vmem:[%s10166_s3 + $0x5e0] sm:$0xff]  }
 0x34b   : > { %6492 = vmatpush3.bf16.msra.mxu0 %v6943_v22  ;;  %5391 = vmatprep.mubr.bf16.mxu0 %v1569_v26  ;;  %v6955_v26 = vld [vmem:[%s10166_s3 + $0x718] sm:$0xff]   ;;  %v6965_v22 = vld [vmem:[%s10166_s3 + $0x770] sm:$0xff]  }
 0x34c   : > { %6429 = vmatprep.subr.bf16.mxu1 %v6944_v35  ;;  %6493 = vmatprep.subr.bf16.mxu0 %v6945_v55 }
 0x34e   : > { %6430 = vmatpush3.bf16.msra.mxu1 %v6946_v59 }
 0x34f   : > { %6494 = vmatpush3.bf16.msra.mxu0 %v6947_v32  ;;  %6431 = vmatprep.subr.bf16.mxu1 %v6948_v33  ;;  %v6966_v32 = vld [vmem:[%s10166_s3 + $0x5b8] sm:$0xff]  }
 0x350   : > { %6495 = vmatprep.subr.bf16.mxu0 %v6949_v20 }
 0x352   : > { %6432 = vmatpush3.bf16.msra.mxu1 %v6950_v62  ;;  %v6967_v62 = vld [vmem:[%s10166_s3 + $0x730] sm:$0xff]  }
 0x353   : > { %6496 = vmatpush3.bf16.msra.mxu0 %v6951_v23  ;;  %6433 = vmatprep.subr.bf16.mxu1 %v6952_v29  ;;  %v6968_v23 = vld [vmem:[%s10166_s3 + $0x6c0] sm:$0xff]  }
 0x354   : > { %6497 = vmatprep.subr.bf16.mxu0 %v6953_v21 }
 0x356   : > { %6434 = vmatpush3.bf16.msra.mxu1 %v6954_v41  ;;  %v6969_v41 = vld [vmem:[%s10166_s3 + $0x778] sm:$0xff]  }
 0x357   : > { %6498 = vmatpush3.bf16.msra.mxu0 %v6955_v26  ;;  %6435 = vmatprep.subr.bf16.mxu1 %v6956_v47  ;;  %v6970_v47 = vld [vmem:[%s10166_s3 + $0x680] sm:$0xff]  }
 0x358   : > { %v1950_v12 = vpop.f32.mrb[36].mxu1  ;;  %6499 = vmatprep.subr.bf16.mxu0 %v6957_v8  ;;  %v6972_v8 = vld [vmem:[%s10166_s3 + $0x6c8] sm:$0xff]  }
 0x359   : > { %v1951_v16 = vadd.f32 %v1950_v12, %v7999_v49  ;;  %v1952_v11 = vpop.f32.mrb[37].mxu1 }
 0x35a   : > { %v1953_v14 = vadd.f32 %v1952_v11, %v8003_v50  ;;  %v1954_v0 = vpop.f32.mrb[38].mxu1  ;;  %6436 = vmatpush3.bf16.msra.mxu1 %v6958_v45  ;;  %v6978_v11 = vld [vmem:[%s10166_s3 + $0x690] sm:$0xff]  }
 0x35b   : > { %7234 = vtanh.f32 %v1951_v16  ;;  %v1955_v37 = vadd.f32 %v1954_v0, %v7999_v49  ;;  %6500 = vmatpush3.bf16.msra.mxu0 %v6959_v40  ;;  %v1956_v43 = vpop.f32.mrb[39].mxu1  ;;  %6437 = vmatprep.subr.bf16.mxu1 %v6960_v53  ;;  %v6974_v53 = vld [vmem:[%s10166_s3 + $0x688] sm:$0xff]  }
 0x35c   : > { %7236 = vtanh.f32 %v1953_v14  ;;  %v1957_v57 = vadd.f32 %v1956_v43, %v8003_v50  ;;  %6501 = vmatprep.subr.bf16.mxu0 %v6961_v5  ;;  %v2031_v35 = vpop.f32.mrb[40].mxu0  ;;  %v6979_v0 = vld [vmem:[%s10166_s3 + $0x808] sm:$0xff]   ;;  %v6985_v43 = vld [vmem:[%s10166_s3 + $0x858] sm:$0xff]  }
 0x35d   : > { %7238 = vtanh.f32 %v1955_v37  ;;  %v2032_v55 = vadd.f32 %v2031_v35, %v7999_v49  ;;  %v2033_v59 = vpop.f32.mrb[41].mxu0  ;;  %v6984_v37 = vld [vmem:[%s10166_s3 + $0x6e0] sm:$0xff]   ;;  %v6990_v35 = vld [vmem:[%s10166_s3 + $0x6a8] sm:$0xff]  }
 0x35e   : > { %7240 = vtanh.f32 %v1957_v57  ;;  %6438 = vmatpush3.bf16.msra.mxu1 %v6962_v34  ;;  %v2034_v33 = vadd.f32 %v2033_v59, %v8003_v50  ;;  %v2035_v20 = vpop.f32.mrb[42].mxu0  ;;  %v6983_v34 = vld [vmem:[%s10166_s3 + $0x810] sm:$0xff]   ;;  %v6988_v57 = vld [vmem:[%s10166_s3 + $0x6e8] sm:$0xff]  }
 0x35f   : > { %6502 = vmatpush3.bf16.msra.mxu0 %v6963_v30  ;;  %6439 = vmatprep.subr.bf16.mxu1 %v6964_v60  ;;  %7242 = vtanh.f32 %v2032_v55  ;;  %v2036_v29 = vadd.f32 %v2035_v20, %v7999_v49  ;;  %v2037_v21 = vpop.f32.mrb[43].mxu0  ;;  %v6971_v49 = vld [vmem:[%s10166_s3 + $0x738] sm:$0xff]   ;;  %v6986_v30 = vld [vmem:[%s10166_s3 + $0x6a0] sm:$0xff]   ;;  %v6992_v59 = vld [vmem:[%s10166_s3 + $0x6f0] sm:$0xff]  }
 0x360   : > { %6503 = vmatprep.subr.bf16.mxu0 %v6965_v22  ;;  %7244 = vtanh.f32 %v2034_v33  ;;  %v2038_v26 = vadd.f32 %v2037_v21, %v8003_v50  ;;  %v6973_v50 = vld [vmem:[%s10166_s3 + $0x840] sm:$0xff]   ;;  %v6987_v60 = vld [vmem:[%s10166_s3 + $0x818] sm:$0xff]   ;;  %v6993_v33 = vld [vmem:[%s10166_s3 + $0x868] sm:$0xff]  }
 0x361   : > { %7246 = vtanh.f32 %v2036_v29  ;;  %v6989_v22 = vld [vmem:[%s10166_s3 + $0x860] sm:$0xff]   ;;  %v6994_v29 = vld [vmem:[%s10166_s3 + $0x6b0] sm:$0xff]  }
 0x362   : > { %6440 = vmatpush3.bf16.msra.mxu1 %v6966_v32  ;;  %7248 = vtanh.f32 %v2038_v26  ;;  %v6991_v55 = vld [vmem:[%s10166_s3 + $0x820] sm:$0xff]   ;;  %v6996_v26 = vld [vmem:[%s10166_s3 + $0x6f8] sm:$0xff]  }
 0x363   : > { %6504 = vmatpush3.bf16.msra.mxu0 %v6967_v62  ;;  %6469 = vmatprep.subr.bf16.mxu1 %v6968_v23 }
 0x364   : > { %6505 = vmatprep.subr.bf16.mxu0 %v6969_v41  ;;  %v6995_v41 = vld [vmem:[%s10166_s3 + $0x828] sm:$0xff]  }
 0x365   : > { %v9727_v45 = vpop.eup %7234  ;;  %5269 = vmatmul.mubr.bf16.vlgmr.msra.gmra.mrb[64].mxu1 %v1335_v19  ;;  %v6976_v19 = vld [vmem:[%s10166_s3 + $0x6d0] sm:$0xff]  }
 0x366   : > { %v9732_v40 = vpop.eup %7236  ;;  %6470 = vmatpush3.bf16.msra.mxu1 %v6970_v47  ;;  %5350 = vmatprep.mubr.bf16.mxu1 %v1498_v6 }
 0x367   : > { %v9740_v12 = vpop.eup %7238  ;;  %6506 = vmatpush3.bf16.msra.mxu0 %v6971_v49  ;;  %6471 = vmatprep.subr.bf16.mxu1 %v6972_v8  ;;  %v6997_v49 = vld [vmem:[%s10166_s3 + $0x870] sm:$0xff]  }
 0x368   : > { %v9745_v10 = vpop.eup %7240  ;;  %6535 = vmatprep.subr.bf16.mxu0 %v6973_v50  ;;  %v1963_v44 = vpack.c.bf16 %v9740_v12, %v9727_v45 }
 0x369   : > { %v9755_v6 = vpop.eup %7242  ;;  %v1964_v5 = vpack.c.bf16 %v9745_v10, %v9732_v40  ;;  %v7074_v40 = vld [vmem:[%s10166_s3 + $0x9e0] sm:$0xff]  }
 0x36a   : > { %v9759_v16 = vpop.eup %7244  ;;  %5392 = vmatmul.mubr.bf16.vlgmr.msra.gmra.mrb[68].mxu0 %v1568_v52  ;;  %6472 = vmatpush3.bf16.msra.mxu1 %v6974_v53  ;;  %v6981_v52 = vld [vmem:[%s10166_s3 + $0x850] sm:$0xff]   ;;  %v6998_v53 = vld [vmem:[%s10166_s3 + $0x6b8] sm:$0xff]   ;;  %v7075_v10 = vld [vmem:[%s10166_s3 + $0x9a0] sm:$0xff]  }
 0x36b   : > { %v9767_v14 = vpop.eup %7246  ;;  %6536 = vmatpush3.bf16.msra.mxu0 %v6975_v31  ;;  %5473 = vmatprep.mubr.bf16.mxu0 %v1731_v2  ;;  %v6982_v2 = vld [vmem:[%s10166_s3 + $0x698] sm:$0xff]  }
 0x36c   : > { %v9778_v24 = vpop.eup %7248  ;;  %6473 = vmatprep.subr.bf16.mxu1 %v6976_v19  ;;  %6537 = vmatprep.subr.bf16.mxu0 %v6977_v63  ;;  %v2044_v25 = vpack.c.bf16 %v9767_v14, %v9755_v6  ;;  %v6999_v63 = vld [vmem:[%s10166_s3 + $0x830] sm:$0xff]   ;;  %v7076_v6 = vld [vmem:[%s10166_s3 + $0x9e8] sm:$0xff]  }
 0x36d   : > { %v2045_v9 = vpack.c.bf16 %v9778_v24, %v9759_v16  ;;  %v7048_v16 = vld [vmem:[%s10166_s3 + $0x8e0] sm:$0xff]   ;;  %v7049_v24 = vld [vmem:[%s10166_s3 + $0xa58] sm:$0xff]   ;;  %v7078_v14 = vld [vmem:[%s10166_s3 + $0x9f0] sm:$0xff]  }
 0x36e   : > { %6474 = vmatpush3.bf16.msra.mxu1 %v6978_v11  ;;  %v7000_v11 = vld [vmem:[%s10166_s3 + $0x7c0] sm:$0xff]  }
 0x36f   : > { %6538 = vmatpush3.bf16.msra.mxu0 %v6979_v0  ;;  %6475 = vmatprep.subr.bf16.mxu1 %v6980_v51  ;;  %v7001_v51 = vld [vmem:[%s10166_s3 + $0x878] sm:$0xff]  }
 0x370   : > { %6539 = vmatprep.subr.bf16.mxu0 %v6981_v52 }
 0x372   : > { %6476 = vmatpush3.bf16.msra.mxu1 %v6982_v2  ;;  %v7002_v2 = vld [vmem:[%s10166_s3 + $0x780] sm:$0xff]  }
 0x373   : > { %6540 = vmatpush3.bf16.msra.mxu0 %v6983_v34  ;;  %6477 = vmatprep.subr.bf16.mxu1 %v6984_v37  ;;  %v7003_v34 = vld [vmem:[%s10166_s3 + $0x838] sm:$0xff]   ;;  %v7004_v37 = vld [vmem:[%s10166_s3 + $0x7c8] sm:$0xff]  }
 0x374   : > { %6541 = vmatprep.subr.bf16.mxu0 %v6985_v43  ;;  %v7005_v43 = vld [vmem:[%s10166_s3 + $0x940] sm:$0xff]  }
 0x376   : > { %6478 = vmatpush3.bf16.msra.mxu1 %v6986_v30  ;;  %v10211_v30 = vpack.c.bf16 %v9074_v4, %v9067_v61  ;;  %v7008_v61 = vld [vmem:[%s10166_s3 + $0x7d0] sm:$0xff]   ;;  %v7009_v4 = vld [vmem:[%s10166_s3 + $0x948] sm:$0xff]  }
 0x377   : > { %6542 = vmatpush3.bf16.msra.mxu0 %v6987_v60  ;;  %6479 = vmatprep.subr.bf16.mxu1 %v6988_v57  ;;  %v10212_v60 = vpack.c.bf16 %v9306_v7, %v9293_v1  ;;  %v7006_v57 = vld [vmem:[%s10166_s3 + $0x788] sm:$0xff]   ;;  %v10213_v1 = vpack.c.bf16 %v9322_v48, %v9313_v15  ;;  %v7010_v7 = vld [vmem:[%s10166_s3 + $0x790] sm:$0xff]   ;;  %v7014_v48 = vld [vmem:[%s10166_s3 + $0x798] sm:$0xff]  }
 0x378   : > { %v6199_v32 = vpop.f32.mrb[40].mxu1  ;;  %6543 = vmatprep.subr.bf16.mxu0 %v6989_v22  ;;  %v7007_v22 = vld [vmem:[%s10166_s3 + $0x900] sm:$0xff]   ;;  %v7013_v15 = vld [vmem:[%s10166_s3 + $0x950] sm:$0xff]  }
 0x379   : > { %v6200_v20 = vpop.f32.mrb[41].mxu1 }
 0x37a   : > { %v9823_v62 = vadd.f32 %v6200_v20, %v6199_v32  ;;  %v6202_v23 = vpop.f32.mrb[42].mxu1  ;;  %6480 = vmatpush3.bf16.msra.mxu1 %v6990_v35  ;;  %v7011_v35 = vld [vmem:[%s10166_s3 + $0x908] sm:$0xff]   ;;  %v7019_v32 = vld [vmem:[%s10166_s3 + $0x918] sm:$0xff]   ;;  %v7021_v20 = vld [vmem:[%s10166_s3 + $0x960] sm:$0xff]  }
 0x37b   : > { %6544 = vmatpush3.bf16.msra.mxu0 %v6991_v55  ;;  %v6203_v21 = vpop.f32.mrb[43].mxu1  ;;  %6481 = vmatprep.subr.bf16.mxu1 %v6992_v59  ;;  %v7012_v55 = vld [vmem:[%s10166_s3 + $0x7d8] sm:$0xff]   ;;  %v7018_v59 = vld [vmem:[%s10166_s3 + $0x7a0] sm:$0xff]  }
 0x37c   : > { %v9834_v47 = vadd.f32 %v6203_v21, %v6202_v23  ;;  %6545 = vmatprep.subr.bf16.mxu0 %v6993_v33  ;;  %v7020_v33 = vld [vmem:[%s10166_s3 + $0x7e8] sm:$0xff]   ;;  %v7023_v21 = vld [vmem:[%s10166_s3 + $0x920] sm:$0xff]  }
 0x37d   : > { %v6243_v8 = vpop.f32.mrb[44].mxu0  ;;  %v7022_v23 = vld [vmem:[%s10166_s3 + $0x7a8] sm:$0xff]  }
 0x37e   : > { %v6244_v50 = vpop.f32.mrb[45].mxu0  ;;  %6482 = vmatpush3.bf16.msra.mxu1 %v6994_v29  ;;  %v5844_v29 = vld [vmem:[%s10167_s4] ss:$0 sm:$0xff] }
 0x37f   : > { %v9842_v31 = vadd.f32 %v6244_v50, %v6243_v8  ;;  %v6246_v19 = vpop.f32.mrb[46].mxu0  ;;  %6546 = vmatpush3.bf16.msra.mxu0 %v6995_v41  ;;  %6483 = vmatprep.subr.bf16.mxu1 %v6996_v26  ;;  %v7024_v41 = vld [vmem:[%s10166_s3 + $0x7f0] sm:$0xff]   ;;  %v4820_v50 = vadd.f32 %v9823_v62, %v5844_v29  ;;  %v4823_v62 = vadd.f32 %v9834_v47, %v5844_v29  ;;  %v7055_v29 = vld [vmem:[%s10166_s3 + $0xa20] sm:$0xff]  }
 0x380   : > { %v6247_v0 = vpop.f32.mrb[47].mxu0  ;;  %6547 = vmatprep.subr.bf16.mxu0 %v6997_v49  ;;  %v7025_v49 = vld [vmem:[%s10166_s3 + $0x968] sm:$0xff]  }
 0x381   : > { %v9853_v52 = vadd.f32 %v6247_v0, %v6246_v19  ;;  %v7027_v0 = vld [vmem:[%s10166_s3 + $0x928] sm:$0xff]  }
 0x382   : > { %6484 = vmatpush3.bf16.msra.mxu1 %v6998_v53 }
 0x383   : > { %6548 = vmatpush3.bf16.msra.mxu0 %v6999_v63  ;;  %6513 = vmatprep.subr.bf16.mxu1 %v7000_v11  ;;  %v7026_v63 = vld [vmem:[%s10166_s3 + $0x7b0] sm:$0xff]  }
 0x384   : > { %6549 = vmatprep.subr.bf16.mxu0 %v7001_v51  ;;  %v7028_v51 = vld [vmem:[%s10166_s3 + $0x7f8] sm:$0xff]  }
 0x385   : > { %5351 = vmatmul.mubr.bf16.vlgmr.msra.gmra.mrb[68].mxu1 %v10211_v30 }
 0x386   : > { %6514 = vmatpush3.bf16.msra.mxu1 %v7002_v2  ;;  %5432 = vmatprep.mubr.bf16.mxu1 %v10212_v60 }
 0x387   : > { %6550 = vmatpush3.bf16.msra.mxu0 %v7003_v34  ;;  %6515 = vmatprep.subr.bf16.mxu1 %v7004_v37  ;;  %v7029_v37 = vld [vmem:[%s10166_s3 + $0x970] sm:$0xff]  }
 0x388   : > { %6579 = vmatprep.subr.bf16.mxu0 %v7005_v43 }
 0x38a   : > { %5474 = vmatmul.mubr.bf16.vlgmr.msra.gmra.mrb[72].mxu0 %v10213_v1  ;;  %6516 = vmatpush3.bf16.msra.mxu1 %v7006_v57  ;;  %v7030_v57 = vld [vmem:[%s10166_s3 + $0x7b8] sm:$0xff]   ;;  %v7032_v1 = vld [vmem:[%s10166_s3 + $0x8c0] sm:$0xff]  }
 0x38b   : > { %6580 = vmatpush3.bf16.msra.mxu0 %v7007_v22  ;;  %5555 = vmatprep.mubr.bf16.mxu0 %v1893_v38  ;;  %v7017_v38 = vld [vmem:[%s10166_s3 + $0x958] sm:$0xff]  }
 0x38c   : > { %6517 = vmatprep.subr.bf16.mxu1 %v7008_v61  ;;  %6581 = vmatprep.subr.bf16.mxu0 %v7009_v4  ;;  %v7031_v4 = vld [vmem:[%s10166_s3 + $0x930] sm:$0xff]  }
 0x38e   : > { %6518 = vmatpush3.bf16.msra.mxu1 %v7010_v7 }
 0x38f   : > { %6582 = vmatpush3.bf16.msra.mxu0 %v7011_v35  ;;  %6519 = vmatprep.subr.bf16.mxu1 %v7012_v55 }
 0x390   : > { %6583 = vmatprep.subr.bf16.mxu0 %v7013_v15  ;;  %v7034_v15 = vld [vmem:[%s10166_s3 + $0x880] sm:$0xff]  }
 0x392   : > { %6520 = vmatpush3.bf16.msra.mxu1 %v7014_v48  ;;  %v7035_v48 = vld [vmem:[%s10166_s3 + $0x938] sm:$0xff]  }
 0x393   : > { %6584 = vmatpush3.bf16.msra.mxu0 %v7015_v13  ;;  %6521 = vmatprep.subr.bf16.mxu1 %v7016_v36  ;;  %v7036_v13 = vld [vmem:[%s10166_s3 + $0x8c8] sm:$0xff]   ;;  %v10214_v36 = vpack.c.bf16 %v9298_v58, %v9291_v46  ;;  %v7040_v46 = vld [vmem:[%s10166_s3 + $0x8d0] sm:$0xff]  }
 0x394   : > { %6585 = vmatprep.subr.bf16.mxu0 %v7017_v38  ;;  %v7038_v38 = vld [vmem:[%s10166_s3 + $0x888] sm:$0xff]  }
 0x395   : > { %v7041_v58 = vld [vmem:[%s10166_s3 + $0xa48] sm:$0xff]  }
 0x396   : > { %6522 = vmatpush3.bf16.msra.mxu1 %v7018_v59  ;;  %v7039_v59 = vld [vmem:[%s10166_s3 + $0xa00] sm:$0xff]  }
 0x397   : > { %6586 = vmatpush3.bf16.msra.mxu0 %v7019_v32  ;;  %6523 = vmatprep.subr.bf16.mxu1 %v7020_v33  ;;  %v7051_v32 = vld [vmem:[%s10166_s3 + $0xa18] sm:$0xff]   ;;  %v7052_v33 = vld [vmem:[%s10166_s3 + $0x8e8] sm:$0xff]  }
 0x398   : > { %v6221_v26 = vpop.f32.mrb[44].mxu1  ;;  %6587 = vmatprep.subr.bf16.mxu0 %v7021_v20  ;;  %v7053_v20 = vld [vmem:[%s10166_s3 + $0xa60] sm:$0xff]  }
 0x399   : > { %v6222_v8 = vpop.f32.mrb[45].mxu1 }
 0x39a   : > { %v6223_v53 = vadd.f32 %v6222_v8, %v6221_v26  ;;  %v6224_v19 = vpop.f32.mrb[46].mxu1  ;;  %6524 = vmatpush3.bf16.msra.mxu1 %v7022_v23  ;;  %v7054_v23 = vld [vmem:[%s10166_s3 + $0x8a8] sm:$0xff]  }
 0x39b   : > { %6588 = vmatpush3.bf16.msra.mxu0 %v7023_v21  ;;  %v6225_v11 = vpop.f32.mrb[47].mxu1  ;;  %6525 = vmatprep.subr.bf16.mxu1 %v7024_v41  ;;  %v7056_v21 = vld [vmem:[%s10166_s3 + $0x8f0] sm:$0xff]   ;;  %v7057_v26 = vld [vmem:[%s10166_s3 + $0xa68] sm:$0xff]  }
 0x39c   : > { %v4861_v2 = vadd.f32 %v6223_v53, %v4820_v50  ;;  %v6226_v34 = vadd.f32 %v6225_v11, %v6224_v19  ;;  %6589 = vmatprep.subr.bf16.mxu0 %v7025_v49  ;;  %v7058_v53 = vld [vmem:[%s10166_s3 + $0x8b0] sm:$0xff]   ;;  %v7060_v11 = vld [vmem:[%s10166_s3 + $0x8f8] sm:$0xff]  }
 0x39d   : > { %v6287_v43 = vpop.f32.mrb[48].mxu0 }
 0x39e   : > { %v4864_v30 = vadd.f32 %v6226_v34, %v4823_v62  ;;  %v6288_v60 = vpop.f32.mrb[49].mxu0  ;;  %6526 = vmatpush3.bf16.msra.mxu1 %v7026_v63  ;;  %v9960_v22 = vadd.f32 %v9842_v31, %v4861_v2  ;;  %v7033_v31 = vld [vmem:[%s10166_s3 + $0x978] sm:$0xff]   ;;  %v7059_v63 = vld [vmem:[%s10166_s3 + $0xa28] sm:$0xff]   ;;  %v7061_v62 = vld [vmem:[%s10166_s3 + $0xa70] sm:$0xff]  }
 0x39f   : > { %v9962_v61 = vadd.f32 %v6288_v60, %v6287_v43  ;;  %v6290_v47 = vpop.f32.mrb[50].mxu0  ;;  %6590 = vmatpush3.bf16.msra.mxu0 %v7027_v0  ;;  %6527 = vmatprep.subr.bf16.mxu1 %v7028_v51  ;;  %v7062_v43 = vld [vmem:[%s10166_s3 + $0x8b8] sm:$0xff]  }
 0x3a0   : > { %v6291_v7 = vpop.f32.mrb[51].mxu0  ;;  %6591 = vmatprep.subr.bf16.mxu0 %v7029_v37  ;;  %v9974_v35 = vadd.f32 %v9853_v52, %v4864_v30  ;;  %v7037_v52 = vld [vmem:[%s10166_s3 + $0xa40] sm:$0xff]  }
 0x3a1   : > { %v9976_v55 = vadd.f32 %v6291_v7, %v6290_v47  ;;  %v7064_v47 = vld [vmem:[%s10166_s3 + $0x9c0] sm:$0xff]  }
 0x3a2   : > { %6528 = vmatpush3.bf16.msra.mxu1 %v7030_v57 }
 0x3a3   : > { %6592 = vmatpush3.bf16.msra.mxu0 %v7031_v4  ;;  %6557 = vmatprep.subr.bf16.mxu1 %v7032_v1  ;;  %v7065_v1 = vld [vmem:[%s10166_s3 + $0xa78] sm:$0xff]  }
 0x3a4   : > { %6593 = vmatprep.subr.bf16.mxu0 %v7033_v31  ;;  %v7066_v31 = vld [vmem:[%s10166_s3 + $0x980] sm:$0xff]  }
 0x3a5   : > { %5433 = vmatmul.mubr.bf16.vlgmr.msra.gmra.mrb[72].mxu1 %v10214_v36 }
 0x3a6   : > { %6558 = vmatpush3.bf16.msra.mxu1 %v7034_v15  ;;  %5514 = vmatprep.mubr.bf16.mxu1 %v1812_v39  ;;  %v7044_v39 = vld [vmem:[%s10166_s3 + $0x8d8] sm:$0xff]   ;;  %v7068_v15 = vld [vmem:[%s10166_s3 + $0x9c8] sm:$0xff]  }
 0x3a7   : > { %6594 = vmatpush3.bf16.msra.mxu0 %v7035_v48  ;;  %6559 = vmatprep.subr.bf16.mxu1 %v7036_v13  ;;  %v7070_v48 = vld [vmem:[%s10166_s3 + $0x9d0] sm:$0xff]  }
 0x3a8   : > { %6623 = vmatprep.subr.bf16.mxu0 %v7037_v52 }
 0x3aa   : > { %5556 = vmatmul.mubr.bf16.vlgmr.msra.gmra.mrb[76].mxu0 %v1892_v54  ;;  %6560 = vmatpush3.bf16.msra.mxu1 %v7038_v38  ;;  %v7047_v54 = vld [vmem:[%s10166_s3 + $0xa10] sm:$0xff]  }
 0x3ab   : > { %6624 = vmatpush3.bf16.msra.mxu0 %v7039_v59  ;;  %5637 = vmatprep.mubr.bf16.mxu0 %v2045_v9  ;;  %v7050_v9 = vld [vmem:[%s10166_s3 + $0x8a0] sm:$0xff]   ;;  %v7079_v38 = vld [vmem:[%s10166_s3 + $0x9b0] sm:$0xff]  }
 0x3ac   : > { %6561 = vmatprep.subr.bf16.mxu1 %v7040_v46  ;;  %6625 = vmatprep.subr.bf16.mxu0 %v7041_v58  ;;  %v7080_v46 = vld [vmem:[%s10166_s3 + $0x9f8] sm:$0xff]  }
 0x3ae   : > { %6562 = vmatpush3.bf16.msra.mxu1 %v7042_v18 }
 0x3af   : > { %6626 = vmatpush3.bf16.msra.mxu0 %v7043_v27  ;;  %6563 = vmatprep.subr.bf16.mxu1 %v7044_v39 }
 0x3b0   : > { %6627 = vmatprep.subr.bf16.mxu0 %v7045_v3 }
 0x3b2   : > { %6564 = vmatpush3.bf16.msra.mxu1 %v7046_v42  ;;  %v7081_v42 = vld [vmem:[%s10166_s3 + $0x9b8] sm:$0xff]  }
 0x3b3   : > { %6628 = vmatpush3.bf16.msra.mxu0 %v7047_v54  ;;  %6565 = vmatprep.subr.bf16.mxu1 %v7048_v16 }
 0x3b4   : > { %6629 = vmatprep.subr.bf16.mxu0 %v7049_v24 }
 0x3b6   : > { %6566 = vmatpush3.bf16.msra.mxu1 %v7050_v9 }
 0x3b7   : > { %6630 = vmatpush3.bf16.msra.mxu0 %v7051_v32  ;;  %6567 = vmatprep.subr.bf16.mxu1 %v7052_v33 }
 0x3b8   : > { %v6265_v41 = vpop.f32.mrb[48].mxu1  ;;  %6631 = vmatprep.subr.bf16.mxu0 %v7053_v20 }
 0x3b9   : > { %v6266_v49 = vpop.f32.mrb[49].mxu1 }
 0x3ba   : > { %v6267_v8 = vadd.f32 %v6266_v49, %v6265_v41  ;;  %v6268_v50 = vpop.f32.mrb[50].mxu1  ;;  %6568 = vmatpush3.bf16.msra.mxu1 %v7054_v23 }
 0x3bb   : > { %6632 = vmatpush3.bf16.msra.mxu0 %v7055_v29  ;;  %v6269_v19 = vpop.f32.mrb[51].mxu1  ;;  %6569 = vmatprep.subr.bf16.mxu1 %v7056_v21 }
 0x3bc   : > { %v4943_v0 = vadd.f32 %v6267_v8, %v9960_v22  ;;  %v6270_v51 = vadd.f32 %v6269_v19, %v6268_v50  ;;  %6633 = vmatprep.subr.bf16.mxu0 %v7057_v26  ;;  %v7063_v22 = vld [vmem:[%s10166_s3 + $0xa30] sm:$0xff]  }
 0x3bd   : > { %v6331_v2 = vpop.f32.mrb[52].mxu0 }
 0x3be   : > { %v4946_v34 = vadd.f32 %v6270_v51, %v9974_v35  ;;  %v6332_v37 = vpop.f32.mrb[53].mxu0  ;;  %6570 = vmatpush3.bf16.msra.mxu1 %v7058_v53  ;;  %v4984_v30 = vadd.f32 %v9962_v61, %v4943_v0  ;;  %v7067_v35 = vld [vmem:[%s10166_s3 + $0xa38] sm:$0xff]  }
 0x3bf   : > { %v6333_v60 = vadd.f32 %v6332_v37, %v6331_v2  ;;  %v6334_v57 = vpop.f32.mrb[54].mxu0  ;;  %6634 = vmatpush3.bf16.msra.mxu0 %v7059_v63  ;;  %6571 = vmatprep.subr.bf16.mxu1 %v7060_v11 }
 0x3c0   : > { %v6335_v4 = vpop.f32.mrb[55].mxu0  ;;  %6635 = vmatprep.subr.bf16.mxu0 %v7061_v62  ;;  %v4987_v61 = vadd.f32 %v9976_v55, %v4946_v34  ;;  %v7069_v55 = vld [vmem:[%s10166_s3 + $0x988] sm:$0xff]  }
 0x3c1   : > { %v6336_v7 = vadd.f32 %v6335_v4, %v6334_v57 }
 0x3c2   : > { %6572 = vmatpush3.bf16.msra.mxu1 %v7062_v43 }
 0x3c3   : > { %6636 = vmatpush3.bf16.msra.mxu0 %v7063_v22  ;;  %6601 = vmatprep.subr.bf16.mxu1 %v7064_v47 }
 0x3c4   : > { %6637 = vmatprep.subr.bf16.mxu0 %v7065_v1 }
 0x3c5   : > { %5515 = vmatmul.mubr.bf16.vlgmr.msra.gmra.mrb[76].mxu1 %v1811_v56  ;;  %v7073_v56 = vld [vmem:[%s10166_s3 + $0x998] sm:$0xff]  }
 0x3c6   : > { %6602 = vmatpush3.bf16.msra.mxu1 %v7066_v31  ;;  %5596 = vmatprep.mubr.bf16.mxu1 %v1964_v5  ;;  %v7077_v5 = vld [vmem:[%s10166_s3 + $0x9a8] sm:$0xff]  }
 0x3c7   : > { %6638 = vmatpush3.bf16.msra.mxu0 %v7067_v35  ;;  %6603 = vmatprep.subr.bf16.mxu1 %v7068_v15 }
 0x3ca   : > { %5638 = vmatmul.mubr.bf16.vlgmr.msra.gmra.mrb[80].mxu0 %v2044_v25  ;;  %6604 = vmatpush3.bf16.msra.mxu1 %v7069_v55 }
 0x3cb   : > { %6605 = vmatprep.subr.bf16.mxu1 %v7070_v48 }
 0x3ce   : > { %6606 = vmatpush3.bf16.msra.mxu1 %v7071_v17 }
 0x3cf   : > { %6607 = vmatprep.subr.bf16.mxu1 %v7072_v28 }
 0x3d2   : > { %6608 = vmatpush3.bf16.msra.mxu1 %v7073_v56 }
 0x3d3   : > { %6609 = vmatprep.subr.bf16.mxu1 %v7074_v40 }
 0x3d6   : > { %6610 = vmatpush3.bf16.msra.mxu1 %v7075_v10 }
 0x3d7   : > { %6611 = vmatprep.subr.bf16.mxu1 %v7076_v6 }
 0x3d8   : > { %v6309_v25 = vpop.f32.mrb[52].mxu1 }
 0x3d9   : > { %v6310_v13 = vpop.f32.mrb[53].mxu1 }
 0x3da   : > { %v6311_v52 = vadd.f32 %v6310_v13, %v6309_v25  ;;  %v6312_v36 = vpop.f32.mrb[54].mxu1  ;;  %6612 = vmatpush3.bf16.msra.mxu1 %v7077_v5 }
 0x3db   : > { %v6313_v59 = vpop.f32.mrb[55].mxu1  ;;  %6613 = vmatprep.subr.bf16.mxu1 %v7078_v14 }
 0x3dc   : > { %v5025_v58 = vadd.f32 %v6311_v52, %v4984_v30  ;;  %v6314_v18 = vadd.f32 %v6313_v59, %v6312_v36 }
 0x3dd   : > { %v6375_v27 = vpop.f32.mrb[56].mxu0 }
 0x3de   : > { %v5028_v39 = vadd.f32 %v6314_v18, %v4987_v61  ;;  %v6376_v3 = vpop.f32.mrb[57].mxu0  ;;  %6614 = vmatpush3.bf16.msra.mxu1 %v7079_v38  ;;  %v5066_v54 = vadd.f32 %v6333_v60, %v5025_v58 }
 0x3df   : > { %v6377_v16 = vadd.f32 %v6376_v3, %v6375_v27  ;;  %v6378_v24 = vpop.f32.mrb[58].mxu0  ;;  %6615 = vmatprep.subr.bf16.mxu1 %v7080_v46 }
 0x3e0   : > { %v6379_v9 = vpop.f32.mrb[59].mxu0  ;;  %v5069_v32 = vadd.f32 %v6336_v7, %v5028_v39 }
 0x3e1   : > { %v6380_v33 = vadd.f32 %v6379_v9, %v6378_v24 }
 0x3e2   : > { %6616 = vmatpush3.bf16.msra.mxu1 %v7081_v42 }
 0x3e5   : > { %5597 = vmatmul.mubr.bf16.vlgmr.msra.gmra.mrb[80].mxu1 %v1963_v44 }
 0x3f8   : > { %v6353_v20 = vpop.f32.mrb[56].mxu1 }
 0x3f9   : > { %v6354_v23 = vpop.f32.mrb[57].mxu1 }
 0x3fa   : > { %v6355_v29 = vadd.f32 %v6354_v23, %v6353_v20  ;;  %v6356_v21 = vpop.f32.mrb[58].mxu1 }
 0x3fb   : > { %v6357_v41 = vpop.f32.mrb[59].mxu1 }
 0x3fc   : > { %v5107_v26 = vadd.f32 %v6355_v29, %v5066_v54  ;;  %v6358_v49 = vadd.f32 %v6357_v41, %v6356_v21 }
 0x3fd   : > { %v6419_v8 = vpop.f32.mrb[60].mxu0 }
 0x3fe   : > { %v5110_v50 = vadd.f32 %v6358_v49, %v5069_v32  ;;  %v6420_v53 = vpop.f32.mrb[61].mxu0  ;;  %v5148_v19 = vadd.f32 %v6377_v16, %v5107_v26 }
 0x3ff   : > { %v6421_v63 = vadd.f32 %v6420_v53, %v6419_v8  ;;  %v6422_v11 = vpop.f32.mrb[62].mxu0 }
 0x400   : > { %v6423_v0 = vpop.f32.mrb[63].mxu0  ;;  %v5151_v51 = vadd.f32 %v6380_v33, %v5110_v50 }
 0x401   : > { %v6424_v62 = vadd.f32 %v6423_v0, %v6422_v11 }
 0x418   : > { %v6397_v2 = vpop.f32.mrb[60].mxu1 }
 0x419   : > { %v6398_v34 = vpop.f32.mrb[61].mxu1 }
 0x41a   : > { %v6399_v45 = vadd.f32 %v6398_v34, %v6397_v2  ;;  %v6400_v12 = vpop.f32.mrb[62].mxu1 }
 0x41b   : > { %v6401_v44 = vpop.f32.mrb[63].mxu1 }
 0x41c   : > { %v5189_v37 = vadd.f32 %v6399_v45, %v5148_v19  ;;  %v6402_v43 = vadd.f32 %v6401_v44, %v6400_v12 }
 0x41d   : > { %v6463_v30 = vpop.f32.mrb[64].mxu0 }
 0x41e   : > { %v5192_v60 = vadd.f32 %v6402_v43, %v5151_v51  ;;  %v6464_v57 = vpop.f32.mrb[65].mxu0  ;;  %v5230_v22 = vadd.f32 %v6421_v63, %v5189_v37 }
 0x41f   : > { %v6465_v47 = vadd.f32 %v6464_v57, %v6463_v30  ;;  %v6466_v4 = vpop.f32.mrb[66].mxu0 }
 0x420   : > { %v6467_v1 = vpop.f32.mrb[67].mxu0  ;;  %v5233_v61 = vadd.f32 %v6424_v62, %v5192_v60 }
 0x421   : > { %v6468_v7 = vadd.f32 %v6467_v1, %v6466_v4 }
 0x438   : > { %v6441_v31 = vpop.f32.mrb[64].mxu1 }
 0x439   : > { %v6442_v35 = vpop.f32.mrb[65].mxu1 }
 0x43a   : > { %v6443_v15 = vadd.f32 %v6442_v35, %v6441_v31  ;;  %v6444_v55 = vpop.f32.mrb[66].mxu1 }
 0x43b   : > { %v6445_v48 = vpop.f32.mrb[67].mxu1 }
 0x43c   : > { %v5271_v17 = vadd.f32 %v6443_v15, %v5230_v22  ;;  %v6446_v28 = vadd.f32 %v6445_v48, %v6444_v55 }
 0x43d   : > { %v6507_v56 = vpop.f32.mrb[68].mxu0 }
 0x43e   : > { %v5274_v40 = vadd.f32 %v6446_v28, %v5233_v61  ;;  %v6508_v10 = vpop.f32.mrb[69].mxu0  ;;  %v5312_v6 = vadd.f32 %v6465_v47, %v5271_v17 }
 0x43f   : > { %v6509_v5 = vadd.f32 %v6508_v10, %v6507_v56  ;;  %v6510_v14 = vpop.f32.mrb[70].mxu0 }
 0x440   : > { %v6511_v25 = vpop.f32.mrb[71].mxu0  ;;  %v5315_v13 = vadd.f32 %v6468_v7, %v5274_v40 }
 0x441   : > { %v6512_v52 = vadd.f32 %v6511_v25, %v6510_v14 }
 0x458   : > { %v6485_v36 = vpop.f32.mrb[68].mxu1 }
 0x459   : > { %v6486_v38 = vpop.f32.mrb[69].mxu1 }
 0x45a   : > { %v6487_v59 = vadd.f32 %v6486_v38, %v6485_v36  ;;  %v6488_v46 = vpop.f32.mrb[70].mxu1 }
 0x45b   : > { %v6489_v58 = vpop.f32.mrb[71].mxu1 }
 0x45c   : > { %v5353_v18 = vadd.f32 %v6487_v59, %v5312_v6  ;;  %v6490_v27 = vadd.f32 %v6489_v58, %v6488_v46 }
 0x45d   : > { %v6551_v39 = vpop.f32.mrb[72].mxu0 }
 0x45e   : > { %v5356_v3 = vadd.f32 %v6490_v27, %v5315_v13  ;;  %v6552_v42 = vpop.f32.mrb[73].mxu0  ;;  %v5394_v54 = vadd.f32 %v6509_v5, %v5353_v18 }
 0x45f   : > { %v6553_v16 = vadd.f32 %v6552_v42, %v6551_v39  ;;  %v6554_v24 = vpop.f32.mrb[74].mxu0 }
 0x460   : > { %v6555_v9 = vpop.f32.mrb[75].mxu0  ;;  %v5397_v32 = vadd.f32 %v6512_v52, %v5356_v3 }
 0x461   : > { %v6556_v33 = vadd.f32 %v6555_v9, %v6554_v24 }
 0x478   : > { %v6529_v20 = vpop.f32.mrb[72].mxu1 }
 0x479   : > { %v6530_v23 = vpop.f32.mrb[73].mxu1 }
 0x47a   : > { %v6531_v29 = vadd.f32 %v6530_v23, %v6529_v20  ;;  %v6532_v21 = vpop.f32.mrb[74].mxu1 }
 0x47b   : > { %v6533_v41 = vpop.f32.mrb[75].mxu1 }
 0x47c   : > { %v5435_v26 = vadd.f32 %v6531_v29, %v5394_v54  ;;  %v6534_v49 = vadd.f32 %v6533_v41, %v6532_v21 }
 0x47d   : > { %v6595_v8 = vpop.f32.mrb[76].mxu0 }
 0x47e   : > { %v5438_v50 = vadd.f32 %v6534_v49, %v5397_v32  ;;  %v6596_v53 = vpop.f32.mrb[77].mxu0  ;;  %v5476_v19 = vadd.f32 %v6553_v16, %v5435_v26 }
 0x47f   : > { %v6597_v63 = vadd.f32 %v6596_v53, %v6595_v8  ;;  %v6598_v11 = vpop.f32.mrb[78].mxu0 }
 0x480   : > { %v6599_v0 = vpop.f32.mrb[79].mxu0  ;;  %v5479_v51 = vadd.f32 %v6556_v33, %v5438_v50 }
 0x481   : > { %v6600_v62 = vadd.f32 %v6599_v0, %v6598_v11 }
 0x498   : > { %v6573_v2 = vpop.f32.mrb[76].mxu1 }
 0x499   : > { %v6574_v34 = vpop.f32.mrb[77].mxu1 }
 0x49a   : > { %v6575_v45 = vadd.f32 %v6574_v34, %v6573_v2  ;;  %v6576_v12 = vpop.f32.mrb[78].mxu1 }
 0x49b   : > { %v6577_v44 = vpop.f32.mrb[79].mxu1 }
 0x49c   : > { %v5517_v37 = vadd.f32 %v6575_v45, %v5476_v19  ;;  %v6578_v43 = vadd.f32 %v6577_v44, %v6576_v12 }
 0x49d   : > { %v6639_v30 = vpop.f32.mrb[80].mxu0 }
 0x49e   : > { %v5520_v60 = vadd.f32 %v6578_v43, %v5479_v51  ;;  %v6640_v57 = vpop.f32.mrb[81].mxu0  ;;  %v5558_v22 = vadd.f32 %v6597_v63, %v5517_v37 }
 0x49f   : > { %v6641_v47 = vadd.f32 %v6640_v57, %v6639_v30  ;;  %v6642_v4 = vpop.f32.mrb[82].mxu0 }
 0x4a0   : > { %v6643_v1 = vpop.f32.mrb[83].mxu0  ;;  %v5561_v61 = vadd.f32 %v6600_v62, %v5520_v60 }
 0x4a1   : > { %v6644_v7 = vadd.f32 %v6643_v1, %v6642_v4 }
 0x4b8   : > { %v6617_v31 = vpop.f32.mrb[80].mxu1 }
 0x4b9   : > { %v6618_v35 = vpop.f32.mrb[81].mxu1 }
 0x4ba   : > { %v6619_v15 = vadd.f32 %v6618_v35, %v6617_v31  ;;  %v6620_v55 = vpop.f32.mrb[82].mxu1 }
 0x4bb   : > { %v6621_v48 = vpop.f32.mrb[83].mxu1 }
 0x4bc   : > { %v5599_v17 = vadd.f32 %v6619_v15, %v5558_v22  ;;  %v6622_v28 = vadd.f32 %v6621_v48, %v6620_v55 }
 0x4be   : > { %v5602_v56 = vadd.f32 %v6622_v28, %v5561_v61  ;;  %v5640_v40 = vadd.f32 %v6641_v47, %v5599_v17 }
 0x4c0   : > { %v5647_v10 = vsel %vm5646_vm5, %v5640_v40, -inf  ;;  %v5643_v6 = vadd.f32 %v6644_v7, %v5602_v56 }
 0x4c1   : > { %5648 = vmax.xlane.f32.xlu1 %v5647_v10 }
 0x4c2   : > { %v5650_v5 = vsel %vm5646_vm5, %v5643_v6, -inf }
 0x4c3   : > { %5651 = vmax.xlane.f32.xlu0 %v5650_v5 }
 0x54e   : > { %v5649_v14 = vpop.xlane.xlu1 %5648 }
 0x54f   : > { %v5653_v25 = vsub.f32 %v5640_v40, %v5649_v14 }
 0x550   : > { %v5652_v13 = vpop.xlane.xlu0 %5651 }
 0x551   : > { %v5655_v52 = vmul.f32 1.442695, %v5653_v25  ;;  %v5654_v36 = vsub.f32 %v5643_v6, %v5652_v13 }
 0x553   : > { %7250 = vpow2.f32 %v5655_v52  ;;  %v5657_v38 = vmul.f32 1.442695, %v5654_v36 }
 0x555   : > { %7252 = vpow2.f32 %v5657_v38 }
 0x55d   : > { %v7251_v59 = vpop.eup %7250 }
 0x55e   : > { %v5659_v46 = vsel %vm5646_vm5, %v7251_v59, 0.0 }
 0x55f   : > { %v7253_v58 = vpop.eup %7252  ;;  %5660 = vadd.xlane.f32.xlu0 %v5659_v46 }
 0x560   : > { %v5662_v18 = vsel %vm5646_vm5, %v7253_v58, 0.0 }
 0x561   : > { %5663 = vadd.xlane.f32.xlu1 %v5662_v18 }
 0x5ec   : > { %v5661_v27 = vpop.xlane.xlu0 %5660 }
 0x5ed   : > { %7254 = vlog2.f32 %v5661_v27 }
 0x5ee   : > { %v5664_v39 = vpop.xlane.xlu1 %5663 }
 0x5ef   : > { %7256 = vlog2.f32 %v5664_v39 }
 0x5f7   : > { %v7255_v3 = vpop.eup %7254 }
 0x5f8   : > { %v5666_v42 = vmul.f32 0.6931472, %v7255_v3 }
 0x5f9   : > { %v7257_v54 = vpop.eup %7256 }
 0x5fa   : > { %v5669_v16 = vsub.f32 %v5653_v25, %v5666_v42  ;;  %v5668_v24 = vmul.f32 0.6931472, %v7257_v54 }
 0x5fc   : > { %5671 = vst.msk [vmem:[%s229_s8] sm:$0xff] %vm5646_vm5, %v5669_v16  ;;  %v5670_v9 = vsub.f32 %v5654_v36, %v5668_v24 }
 0x5fe   : > { %5672 = vst.msk [vmem:[%s229_s8 + $0x8] sm:$0xff] %vm5646_vm5, %v5670_v9 }
 0x5ff PF: > { %s15_s18 = sadd.s32 1, %s7347_s18  }
 0x600   : > { %p12_p4 = scmp.ge.s32.totalorder %s15_s18, 4  }
 0x602   :  { %14 = sbr.rel (!%p12_p4) target bundleno = 1 (0x1), region = 70 }

</bundles_post_ra>
